<compile_context>
chip_gen: v5e
topology: v5e:2x2
jax: 0.10.0
libtpu: 0.0.40
codegen_flags: <defaults>
</compile_context>

<pallas_src>
import functools

import jax
import jax.numpy as jnp
from jax.experimental import pallas as pl
from jax.experimental.pallas import tpu as pltpu


# ----------------------------- Pallas kernel --------------------------------
def _transformer_kernel(x_ref, enc_w_ref, enc_b_ref,
                        wqkv_ref, bqkv_ref, wo_ref, bo_ref,
                        l1w_ref, l1b_ref, l2w_ref, l2b_ref,
                        n1w_ref, n1b_ref, n2w_ref, n2b_ref,
                        head_mask_ref, attn_bias_ref, block_ones_ref,
                        pool_ref, fcw_ref, fcb_ref,
                        o_ref, *, num_layers, num_heads, model_dim, scale):
    D = model_dim
    H = num_heads
    eps = 1e-5  # nn.LayerNorm default

    def layer_norm(z, w, b):
        mu = jnp.mean(z, axis=-1, keepdims=True)
        var = jnp.mean(jnp.square(z - mu), axis=-1, keepdims=True)
        return (z - mu) * jax.lax.rsqrt(var + eps) * w + b

    # constant masks, loaded once (hoisted out of the unrolled layer loop)
    head_mask = head_mask_ref[...]      # (H*N, D)   1 where feature column belongs to the head
    attn_bias = attn_bias_ref[...]      # (N, H*N)   0 within the same d1-group, -1e30 otherwise
    block_ones = block_ones_ref[...]    # (H*N, H*N) 1 within the same head block

    # input encoder: (N, IN) @ (IN, D)
    h = jnp.dot(x_ref[...], enc_w_ref[...], preferred_element_type=jnp.float32) + enc_b_ref[...]

    for l in range(num_layers):          # num_layers (static, unrolled)
        # ---- fused multi-head self attention (post-norm block) ----
        qkv = jnp.dot(h, wqkv_ref[l], preferred_element_type=jnp.float32) + bqkv_ref[l]
        q = qkv[:, :D] * scale
        k = qkv[:, D:2 * D]
        v = qkv[:, 2 * D:]
        # Replicate K/V rows once per head and zero the other heads' feature columns, so a single
        # (N, D) x (H*N, D) contraction yields all H heads' (N, N) score blocks side by side, and a
        # single (N, H*N) x (H*N, D) matmul yields the head-concatenated attention output.
        k_heads = jnp.concatenate([k] * H, axis=0) * head_mask          # (H*N, D)
        v_heads = jnp.concatenate([v] * H, axis=0) * head_mask          # (H*N, D)
        s = jnp.einsum('nd,md->nm', q, k_heads,
                       preferred_element_type=jnp.float32)              # (N, H*N)
        s = s + attn_bias                                               # block-diag group mask
        # per-row global max is a per-row constant, so it is a valid shift for every head block
        s = s - jnp.max(s, axis=-1, keepdims=True)
        p = jnp.exp(s)
        denom = jnp.dot(p, block_ones, preferred_element_type=jnp.float32)  # per-head-block sums
        p = p * pl.reciprocal(denom, approx=True)
        attn = jnp.dot(p, v_heads, preferred_element_type=jnp.float32)      # (N, D), heads concat
        attn = jnp.dot(attn, wo_ref[l], preferred_element_type=jnp.float32) + bo_ref[l]
        h = layer_norm(h + attn, n1w_ref[l], n1b_ref[l])

        # ---- feed-forward block: relu(h W1 + b1) W2 + b2 ----
        ff = jnp.dot(h, l1w_ref[l], preferred_element_type=jnp.float32) + l1b_ref[l]
        ff = jnp.maximum(ff, 0.0)
        ff = jnp.dot(ff, l2w_ref[l], preferred_element_type=jnp.float32) + l2b_ref[l]
        # TODO(synk): nn.Dropout is identity in eval/inference mode; train-mode masking omitted.
        h = layer_norm(h + ff, n2w_ref[l], n2b_ref[l])

    # mean over the d1 (group) axis as one tiny constant matmul, then the classifier head
    # (output lane dim is padded to 128 for a lane-dense unmasked store; sliced in the wrapper)
    pooled = jnp.dot(pool_ref[...], h, preferred_element_type=jnp.float32)   # (T, D)
    o_ref[...] = (jnp.dot(pooled, fcw_ref[...], preferred_element_type=jnp.float32)
                  + fcb_ref[...]).astype(o_ref.dtype)


# ------------------------------ wrapper (glue) -------------------------------
def transformer_classifier_forward(x, params, num_heads):
    d0, d1, input_dim = x.shape
    T, G = d0, d1
    D = params['enc_w'].shape[0]
    L = params['in_proj_w'].shape[0]
    FF = params['lin1_w'].shape[1]
    C = params['fc_w'].shape[0]
    H = num_heads
    hd = D // H
    GT = G * T
    HGT = H * GT
    C_pad = ((C + 127) // 128) * 128

    # tokens flattened group-major: row = g*T + t  (g indexes d1, t indexes d0)
    xk = jnp.transpose(x, (1, 0, 2)).reshape(GT, input_dim).astype(jnp.float32)

    # fused QKV weight: qkv = h @ in_proj_w[l].T + in_proj_b[l]
    wqkv = jnp.transpose(params['in_proj_w'], (0, 2, 1))              # (L, D, 3D)
    bqkv = params['in_proj_b'].reshape(L, 1, 3 * D)
    wo = jnp.transpose(params['out_proj_w'], (0, 2, 1))               # (L, D, D)
    bo = params['out_proj_b'].reshape(L, 1, D)

    # constant masks: head block-diagonalization, within-group attention mask, group-mean matrix
    grp = jnp.arange(GT) // T                                         # group id of each row
    same_group = grp[:, None] == grp[None, :]                         # (GT, GT)
    attn_bias = jnp.where(jnp.tile(same_group, (1, H)), 0.0, -1e30).astype(jnp.float32)  # (GT, HGT)
    row_head = jnp.arange(HGT) // GT
    col_head = jnp.arange(D) // hd
    head_mask = (row_head[:, None] == col_head[None, :]).astype(jnp.float32)             # (HGT, D)
    block_ones = (row_head[:, None] == row_head[None, :]).astype(jnp.float32)            # (HGT, HGT)
    pool = ((jnp.arange(T)[:, None] == (jnp.arange(GT) % T)[None, :])
            .astype(jnp.float32) / G)                                                    # (T, GT)

    # lane-dense classifier head (pad C -> multiple of 128, slice after the call)
    fcw_p = jnp.zeros((D, C_pad), jnp.float32).at[:, :C].set(params['fc_w'].T)
    fcb_p = jnp.zeros((1, C_pad), jnp.float32).at[:, :C].set(params['fc_b'])

    operands = [
        xk,
        params['enc_w'].T, params['enc_b'].reshape(1, D),
        wqkv, bqkv, wo, bo,
        jnp.transpose(params['lin1_w'], (0, 2, 1)), params['lin1_b'].reshape(L, 1, FF),
        jnp.transpose(params['lin2_w'], (0, 2, 1)), params['lin2_b'].reshape(L, 1, D),
        params['n1_w'].reshape(L, 1, D), params['n1_b'].reshape(L, 1, D),
        params['n2_w'].reshape(L, 1, D), params['n2_b'].reshape(L, 1, D),
        head_mask, attn_bias, block_ones, pool, fcw_p, fcb_p,
    ]

    kernel = functools.partial(_transformer_kernel, num_layers=L, num_heads=H,
                               model_dim=D, scale=float(hd) ** -0.5)

    # Single program, no grid: all operands are whole-array VMEM blocks (a few MiB total here).
    # TODO(synk): for realistic sizes (D>=512, FF=2048, L>=6) stream lin1_w/lin2_w per layer
    # (layer grid axis or pltpu.emit_pipeline) instead of keeping them all VMEM-resident, and
    # split the group axis into a "parallel" grid dim to use both v7x TensorCores.
    out = pl.pallas_call(
        kernel,
        out_shape=jax.ShapeDtypeStruct((T, C_pad), jnp.float32),
        compiler_params=pltpu.CompilerParams(vmem_limit_bytes=48 * 1024 * 1024),
    )(*operands)
    return out[:, :C]


# ------------------------- deterministic parameters --------------------------
def init_params(key, input_dim, model_dim, num_layers, num_classes, ff_dim):
    ks = iter(jax.random.split(key, 32))

    def w(shape, fan_in):
        return jax.random.normal(next(ks), shape, jnp.float32) / jnp.sqrt(fan_in)

    def b(shape, scale=0.02):
        return scale * jax.random.normal(next(ks), shape, jnp.float32)

    D, L, FF, C = model_dim, num_layers, ff_dim, num_classes
    return {
        'enc_w': w((D, input_dim), input_dim), 'enc_b': b((D,)),
        'in_proj_w': w((L, 3 * D, D), D), 'in_proj_b': b((L, 3 * D)),
        'out_proj_w': w((L, D, D), D), 'out_proj_b': b((L, D)),
        'lin1_w': w((L, FF, D), D), 'lin1_b': b((L, FF)),
        'lin2_w': w((L, D, FF), FF), 'lin2_b': b((L, D)),
        'n1_w': jnp.ones((L, D), jnp.float32) + b((L, D), 0.05), 'n1_b': b((L, D), 0.05),
        'n2_w': jnp.ones((L, D), jnp.float32) + b((L, D), 0.05), 'n2_b': b((L, D), 0.05),
        'fc_w': w((C, D), D), 'fc_b': b((C,)),
    }


# ------------------------- pure-JAX reference (check) ------------------------
def reference_forward(x, p, num_heads):
    def ln(z, w, b, eps=1e-5):
        mu = z.mean(-1, keepdims=True)
        var = ((z - mu) ** 2).mean(-1, keepdims=True)
        return (z - mu) / jnp.sqrt(var + eps) * w + b

    h = x @ p['enc_w'].T + p['enc_b']                      # (S, N, D), S=d0, N=d1
    S, N, D = h.shape
    hd = D // num_heads
    L = p['in_proj_w'].shape[0]
    for l in range(L):
        W, B = p['in_proj_w'][l], p['in_proj_b'][l]
        q = h @ W[:D].T + B[:D]
        k = h @ W[D:2 * D].T + B[D:2 * D]
        v = h @ W[2 * D:].T + B[2 * D:]

        def split(t):
            return t.reshape(S, N, num_heads, hd).transpose(1, 2, 0, 3)   # (N,H,S,hd)

        qh, kh, vh = split(q), split(k), split(v)
        s = jnp.einsum('nhqd,nhkd->nhqk', qh * (hd ** -0.5), kh)
        a = jax.nn.softmax(s, axis=-1)
        o = jnp.einsum('nhqk,nhkd->nhqd', a, vh).transpose(2, 0, 1, 3).reshape(S, N, D)
        attn = o @ p['out_proj_w'][l].T + p['out_proj_b'][l]
        h = ln(h + attn, p['n1_w'][l], p['n1_b'][l])
        ff = jax.nn.relu(h @ p['lin1_w'][l].T + p['lin1_b'][l])
        ff = ff @ p['lin2_w'][l].T + p['lin2_b'][l]
        h = ln(h + ff, p['n2_w'][l], p['n2_b'][l])
    pooled = h.mean(axis=1)                                # x.mean(dim=1)
    return pooled @ p['fc_w'].T + p['fc_b']


# ---------------------------------- main --------------------------------------
if __name__ == "__main__":
    INPUT_DIM, MODEL_DIM, NUM_HEADS, NUM_LAYERS, NUM_CLASSES = 16, 32, 4, 2, 4
    FF_DIM = 2048  # nn.TransformerEncoderLayer default dim_feedforward

    key = jax.random.PRNGKey(0)
    k_x, k_p = jax.random.split(key)
    # x: (d0=2, d1=8, input_dim=16)
    x = jax.random.normal(k_x, (2, 8, INPUT_DIM), jnp.float32)
    params = init_params(k_p, INPUT_DIM, MODEL_DIM, NUM_LAYERS, NUM_CLASSES, FF_DIM)

    out = jax.block_until_ready(transformer_classifier_forward(x, params, NUM_HEADS))
    ref = jax.block_until_ready(reference_forward(x, params, NUM_HEADS))

    assert out.shape == (x.shape[0], NUM_CLASSES), out.shape
    assert jnp.allclose(out, ref, rtol=2e-3, atol=2e-3), (out, ref)
    print("KERNEL_OK")
</pallas_src>

<mosaic_0001>
module attributes {stable_mosaic.version = 11 : i64} {
  func.func @_transformer_kernel(%arg0: memref<16x16xf32, #tpu.memory_space<vmem>>, %arg1: memref<16x32xf32, #tpu.memory_space<vmem>>, %arg2: memref<1x32xf32, #tpu.memory_space<vmem>>, %arg3: memref<2x32x96xf32, #tpu.memory_space<vmem>>, %arg4: memref<2x1x96xf32, #tpu.memory_space<vmem>>, %arg5: memref<2x32x32xf32, #tpu.memory_space<vmem>>, %arg6: memref<2x1x32xf32, #tpu.memory_space<vmem>>, %arg7: memref<2x32x2048xf32, #tpu.memory_space<vmem>>, %arg8: memref<2x1x2048xf32, #tpu.memory_space<vmem>>, %arg9: memref<2x2048x32xf32, #tpu.memory_space<vmem>>, %arg10: memref<2x1x32xf32, #tpu.memory_space<vmem>>, %arg11: memref<2x1x32xf32, #tpu.memory_space<vmem>>, %arg12: memref<2x1x32xf32, #tpu.memory_space<vmem>>, %arg13: memref<2x1x32xf32, #tpu.memory_space<vmem>>, %arg14: memref<2x1x32xf32, #tpu.memory_space<vmem>>, %arg15: memref<64x32xf32, #tpu.memory_space<vmem>>, %arg16: memref<16x64xf32, #tpu.memory_space<vmem>>, %arg17: memref<64x64xf32, #tpu.memory_space<vmem>>, %arg18: memref<2x16xf32, #tpu.memory_space<vmem>>, %arg19: memref<32x128xf32, #tpu.memory_space<vmem>>, %arg20: memref<1x128xf32, #tpu.memory_space<vmem>>, %arg21: memref<2x128xf32, #tpu.memory_space<vmem>>) attributes {dimension_semantics = [], scalar_prefetch = 0 : i64, scratch_operands = 0 : i64, tpu.core_type = #tpu.core_type<tc>} {
    %c0 = arith.constant 0 : index
    %c0_0 = arith.constant 0 : index
    %0 = vector.load %arg15[%c0, %c0_0] : memref<64x32xf32, #tpu.memory_space<vmem>>, vector<64x32xf32>
    %c0_1 = arith.constant 0 : index
    %c0_2 = arith.constant 0 : index
    %1 = vector.load %arg16[%c0_1, %c0_2] : memref<16x64xf32, #tpu.memory_space<vmem>>, vector<16x64xf32>
    %c0_3 = arith.constant 0 : index
    %c0_4 = arith.constant 0 : index
    %2 = vector.load %arg17[%c0_3, %c0_4] : memref<64x64xf32, #tpu.memory_space<vmem>>, vector<64x64xf32>
    %c0_5 = arith.constant 0 : index
    %c0_6 = arith.constant 0 : index
    %3 = vector.load %arg0[%c0_5, %c0_6] : memref<16x16xf32, #tpu.memory_space<vmem>>, vector<16x16xf32>
    %c0_7 = arith.constant 0 : index
    %c0_8 = arith.constant 0 : index
    %4 = vector.load %arg1[%c0_7, %c0_8] : memref<16x32xf32, #tpu.memory_space<vmem>>, vector<16x32xf32>
    %cst = arith.constant dense<0.000000e+00> : vector<16x32xf32>
    %5 = tpu.matmul %3, %4, %cst {dimension_numbers = #tpu.dot_dimension_numbers<[1], [0], [0], [1], [0, 0, 1, 1], [], []>} : vector<16x16xf32>, vector<16x32xf32>, vector<16x32xf32> -> vector<16x32xf32>
    %c0_9 = arith.constant 0 : index
    %c0_10 = arith.constant 0 : index
    %6 = vector.load %arg2[%c0_9, %c0_10] : memref<1x32xf32, #tpu.memory_space<vmem>>, vector<1x32xf32>
    %7 = vector.broadcast %6 : vector<1x32xf32> to vector<16x32xf32>
    %8 = arith.addf %5, %7 : vector<16x32xf32>
    %c0_11 = arith.constant 0 : index
    %c0_12 = arith.constant 0 : index
    %c0_13 = arith.constant 0 : index
    %9 = vector.load %arg3[%c0_11, %c0_12, %c0_13] : memref<2x32x96xf32, #tpu.memory_space<vmem>>, vector<1x32x96xf32>
    %10 = vector.shape_cast %9 : vector<1x32x96xf32> to vector<32x96xf32>
    %cst_14 = arith.constant dense<0.000000e+00> : vector<16x96xf32>
    %11 = tpu.matmul %8, %10, %cst_14 {dimension_numbers = #tpu.dot_dimension_numbers<[1], [0], [0], [1], [0, 0, 1, 1], [], []>} : vector<16x32xf32>, vector<32x96xf32>, vector<16x96xf32> -> vector<16x96xf32>
    %c0_15 = arith.constant 0 : index
    %c0_16 = arith.constant 0 : index
    %c0_17 = arith.constant 0 : index
    %12 = vector.load %arg4[%c0_15, %c0_16, %c0_17] : memref<2x1x96xf32, #tpu.memory_space<vmem>>, vector<1x1x96xf32>
    %13 = vector.shape_cast %12 : vector<1x1x96xf32> to vector<1x96xf32>
    %14 = vector.broadcast %13 : vector<1x96xf32> to vector<16x96xf32>
    %15 = arith.addf %11, %14 : vector<16x96xf32>
    %16 = vector.extract_strided_slice %15 {offsets = [0, 0], sizes = [16, 32], strides = [1, 1]} : vector<16x96xf32> to vector<16x32xf32>
    %cst_18 = arith.constant 0.353553385 : f32
    %17 = vector.broadcast %cst_18 : f32 to vector<16x32xf32>
    %18 = arith.mulf %16, %17 : vector<16x32xf32>
    %19 = vector.extract_strided_slice %15 {offsets = [0, 32], sizes = [16, 32], strides = [1, 1]} : vector<16x96xf32> to vector<16x32xf32>
    %20 = vector.extract_strided_slice %15 {offsets = [0, 64], sizes = [16, 32], strides = [1, 1]} : vector<16x96xf32> to vector<16x32xf32>
    %21 = tpu.concatenate %19, %19, %19, %19 in 0 : vector<16x32xf32>, vector<16x32xf32>, vector<16x32xf32>, vector<16x32xf32> -> vector<64x32xf32>
    %22 = arith.mulf %21, %0 : vector<64x32xf32>
    %23 = tpu.concatenate %20, %20, %20, %20 in 0 : vector<16x32xf32>, vector<16x32xf32>, vector<16x32xf32>, vector<16x32xf32> -> vector<64x32xf32>
    %24 = arith.mulf %23, %0 : vector<64x32xf32>
    "tpu.trace_start"() <{level = 10 : i32, message = "nd,md->nm"}> : () -> ()
    %cst_19 = arith.constant dense<0.000000e+00> : vector<16x64xf32>
    %25 = tpu.matmul %18, %22, %cst_19 {dimension_numbers = #tpu.dot_dimension_numbers<[1], [1], [0], [0], [0, 0, 1, 0], [], []>} : vector<16x32xf32>, vector<64x32xf32>, vector<16x64xf32> -> vector<16x64xf32>
    "tpu.trace_stop"() : () -> ()
    %26 = arith.addf %25, %1 : vector<16x64xf32>
    %cst_20 = arith.constant dense<0xFF800000> : vector<16xf32>
    %27 = vector.multi_reduction <maximumf>, %26, %cst_20 [1] : vector<16x64xf32> to vector<16xf32>
    %28 = vector.shape_cast %27 : vector<16xf32> to vector<16x1xf32>
    %29 = vector.broadcast %28 : vector<16x1xf32> to vector<16x64xf32>
    %30 = arith.subf %26, %29 : vector<16x64xf32>
    %31 = math.exp %30 : vector<16x64xf32>
    %cst_21 = arith.constant dense<0.000000e+00> : vector<16x64xf32>
    %32 = tpu.matmul %31, %2, %cst_21 {dimension_numbers = #tpu.dot_dimension_numbers<[1], [0], [0], [1], [0, 0, 1, 1], [], []>} : vector<16x64xf32>, vector<64x64xf32>, vector<16x64xf32> -> vector<16x64xf32>
    %33 = tpu.reciprocal %32 {approx = true} : vector<16x64xf32> -> vector<16x64xf32>
    %34 = arith.mulf %31, %33 : vector<16x64xf32>
    %cst_22 = arith.constant dense<0.000000e+00> : vector<16x32xf32>
    %35 = tpu.matmul %34, %24, %cst_22 {dimension_numbers = #tpu.dot_dimension_numbers<[1], [0], [0], [1], [0, 0, 1, 1], [], []>} : vector<16x64xf32>, vector<64x32xf32>, vector<16x32xf32> -> vector<16x32xf32>
    %c0_23 = arith.constant 0 : index
    %c0_24 = arith.constant 0 : index
    %c0_25 = arith.constant 0 : index
    %36 = vector.load %arg5[%c0_23, %c0_24, %c0_25] : memref<2x32x32xf32, #tpu.memory_space<vmem>>, vector<1x32x32xf32>
    %37 = vector.shape_cast %36 : vector<1x32x32xf32> to vector<32x32xf32>
    %cst_26 = arith.constant dense<0.000000e+00> : vector<16x32xf32>
    %38 = tpu.matmul %35, %37, %cst_26 {dimension_numbers = #tpu.dot_dimension_numbers<[1], [0], [0], [1], [0, 0, 1, 1], [], []>} : vector<16x32xf32>, vector<32x32xf32>, vector<16x32xf32> -> vector<16x32xf32>
    %c0_27 = arith.constant 0 : index
    %c0_28 = arith.constant 0 : index
    %c0_29 = arith.constant 0 : index
    %39 = vector.load %arg6[%c0_27, %c0_28, %c0_29] : memref<2x1x32xf32, #tpu.memory_space<vmem>>, vector<1x1x32xf32>
    %40 = vector.shape_cast %39 : vector<1x1x32xf32> to vector<1x32xf32>
    %41 = vector.broadcast %40 : vector<1x32xf32> to vector<16x32xf32>
    %42 = arith.addf %38, %41 : vector<16x32xf32>
    %43 = arith.addf %8, %42 : vector<16x32xf32>
    %c0_30 = arith.constant 0 : index
    %c0_31 = arith.constant 0 : index
    %c0_32 = arith.constant 0 : index
    %44 = vector.load %arg11[%c0_30, %c0_31, %c0_32] : memref<2x1x32xf32, #tpu.memory_space<vmem>>, vector<1x1x32xf32>
    %45 = vector.shape_cast %44 : vector<1x1x32xf32> to vector<1x32xf32>
    %c0_33 = arith.constant 0 : index
    %c0_34 = arith.constant 0 : index
    %c0_35 = arith.constant 0 : index
    %46 = vector.load %arg12[%c0_33, %c0_34, %c0_35] : memref<2x1x32xf32, #tpu.memory_space<vmem>>, vector<1x1x32xf32>
    %47 = vector.shape_cast %46 : vector<1x1x32xf32> to vector<1x32xf32>
    %cst_36 = arith.constant dense<0.000000e+00> : vector<16xf32>
    %48 = vector.multi_reduction <add>, %43, %cst_36 [1] : vector<16x32xf32> to vector<16xf32>
    %49 = vector.shape_cast %48 : vector<16xf32> to vector<16x1xf32>
    %cst_37 = arith.constant 3.200000e+01 : f32
    %50 = vector.broadcast %cst_37 : f32 to vector<16x1xf32>
    %51 = arith.divf %49, %50 : vector<16x1xf32>
    %52 = vector.broadcast %51 : vector<16x1xf32> to vector<16x32xf32>
    %53 = arith.subf %43, %52 : vector<16x32xf32>
    %54 = arith.mulf %53, %53 : vector<16x32xf32>
    %cst_38 = arith.constant dense<0.000000e+00> : vector<16xf32>
    %55 = vector.multi_reduction <add>, %54, %cst_38 [1] : vector<16x32xf32> to vector<16xf32>
    %56 = vector.shape_cast %55 : vector<16xf32> to vector<16x1xf32>
    %cst_39 = arith.constant 3.200000e+01 : f32
    %57 = vector.broadcast %cst_39 : f32 to vector<16x1xf32>
    %58 = arith.divf %56, %57 : vector<16x1xf32>
    %59 = vector.broadcast %51 : vector<16x1xf32> to vector<16x32xf32>
    %60 = arith.subf %43, %59 : vector<16x32xf32>
    %cst_40 = arith.constant 9.99999974E-6 : f32
    %61 = vector.broadcast %cst_40 : f32 to vector<16x1xf32>
    %62 = arith.addf %58, %61 : vector<16x1xf32>
    %63 = math.rsqrt %62 : vector<16x1xf32>
    %64 = vector.broadcast %63 : vector<16x1xf32> to vector<16x32xf32>
    %65 = arith.mulf %60, %64 : vector<16x32xf32>
    %66 = vector.broadcast %45 : vector<1x32xf32> to vector<16x32xf32>
    %67 = arith.mulf %65, %66 : vector<16x32xf32>
    %68 = vector.broadcast %47 : vector<1x32xf32> to vector<16x32xf32>
    %69 = arith.addf %67, %68 : vector<16x32xf32>
    %c0_41 = arith.constant 0 : index
    %c0_42 = arith.constant 0 : index
    %c0_43 = arith.constant 0 : index
    %70 = vector.load %arg7[%c0_41, %c0_42, %c0_43] : memref<2x32x2048xf32, #tpu.memory_space<vmem>>, vector<1x32x2048xf32>
    %71 = vector.shape_cast %70 : vector<1x32x2048xf32> to vector<32x2048xf32>
    %cst_44 = arith.constant dense<0.000000e+00> : vector<16x2048xf32>
    %72 = tpu.matmul %69, %71, %cst_44 {dimension_numbers = #tpu.dot_dimension_numbers<[1], [0], [0], [1], [0, 0, 1, 1], [], []>} : vector<16x32xf32>, vector<32x2048xf32>, vector<16x2048xf32> -> vector<16x2048xf32>
    %c0_45 = arith.constant 0 : index
    %c0_46 = arith.constant 0 : index
    %c0_47 = arith.constant 0 : index
    %73 = vector.load %arg8[%c0_45, %c0_46, %c0_47] : memref<2x1x2048xf32, #tpu.memory_space<vmem>>, vector<1x1x2048xf32>
    %74 = vector.shape_cast %73 : vector<1x1x2048xf32> to vector<1x2048xf32>
    %75 = vector.broadcast %74 : vector<1x2048xf32> to vector<16x2048xf32>
    %76 = arith.addf %72, %75 : vector<16x2048xf32>
    %cst_48 = arith.constant 0.000000e+00 : f32
    %77 = vector.broadcast %cst_48 : f32 to vector<16x2048xf32>
    %78 = arith.maximumf %76, %77 : vector<16x2048xf32>
    %c0_49 = arith.constant 0 : index
    %c0_50 = arith.constant 0 : index
    %c0_51 = arith.constant 0 : index
    %79 = vector.load %arg9[%c0_49, %c0_50, %c0_51] : memref<2x2048x32xf32, #tpu.memory_space<vmem>>, vector<1x2048x32xf32>
    %80 = vector.shape_cast %79 : vector<1x2048x32xf32> to vector<2048x32xf32>
    %cst_52 = arith.constant dense<0.000000e+00> : vector<16x32xf32>
    %81 = tpu.matmul %78, %80, %cst_52 {dimension_numbers = #tpu.dot_dimension_numbers<[1], [0], [0], [1], [0, 0, 1, 1], [], []>} : vector<16x2048xf32>, vector<2048x32xf32>, vector<16x32xf32> -> vector<16x32xf32>
    %c0_53 = arith.constant 0 : index
    %c0_54 = arith.constant 0 : index
    %c0_55 = arith.constant 0 : index
    %82 = vector.load %arg10[%c0_53, %c0_54, %c0_55] : memref<2x1x32xf32, #tpu.memory_space<vmem>>, vector<1x1x32xf32>
    %83 = vector.shape_cast %82 : vector<1x1x32xf32> to vector<1x32xf32>
    %84 = vector.broadcast %83 : vector<1x32xf32> to vector<16x32xf32>
    %85 = arith.addf %81, %84 : vector<16x32xf32>
    %86 = arith.addf %69, %85 : vector<16x32xf32>
    %c0_56 = arith.constant 0 : index
    %c0_57 = arith.constant 0 : index
    %c0_58 = arith.constant 0 : index
    %87 = vector.load %arg13[%c0_56, %c0_57, %c0_58] : memref<2x1x32xf32, #tpu.memory_space<vmem>>, vector<1x1x32xf32>
    %88 = vector.shape_cast %87 : vector<1x1x32xf32> to vector<1x32xf32>
    %c0_59 = arith.constant 0 : index
    %c0_60 = arith.constant 0 : index
    %c0_61 = arith.constant 0 : index
    %89 = vector.load %arg14[%c0_59, %c0_60, %c0_61] : memref<2x1x32xf32, #tpu.memory_space<vmem>>, vector<1x1x32xf32>
    %90 = vector.shape_cast %89 : vector<1x1x32xf32> to vector<1x32xf32>
    %cst_62 = arith.constant dense<0.000000e+00> : vector<16xf32>
    %91 = vector.multi_reduction <add>, %86, %cst_62 [1] : vector<16x32xf32> to vector<16xf32>
    %92 = vector.shape_cast %91 : vector<16xf32> to vector<16x1xf32>
    %cst_63 = arith.constant 3.200000e+01 : f32
    %93 = vector.broadcast %cst_63 : f32 to vector<16x1xf32>
    %94 = arith.divf %92, %93 : vector<16x1xf32>
    %95 = vector.broadcast %94 : vector<16x1xf32> to vector<16x32xf32>
    %96 = arith.subf %86, %95 : vector<16x32xf32>
    %97 = arith.mulf %96, %96 : vector<16x32xf32>
    %cst_64 = arith.constant dense<0.000000e+00> : vector<16xf32>
    %98 = vector.multi_reduction <add>, %97, %cst_64 [1] : vector<16x32xf32> to vector<16xf32>
    %99 = vector.shape_cast %98 : vector<16xf32> to vector<16x1xf32>
    %cst_65 = arith.constant 3.200000e+01 : f32
    %100 = vector.broadcast %cst_65 : f32 to vector<16x1xf32>
    %101 = arith.divf %99, %100 : vector<16x1xf32>
    %102 = vector.broadcast %94 : vector<16x1xf32> to vector<16x32xf32>
    %103 = arith.subf %86, %102 : vector<16x32xf32>
    %cst_66 = arith.constant 9.99999974E-6 : f32
    %104 = vector.broadcast %cst_66 : f32 to vector<16x1xf32>
    %105 = arith.addf %101, %104 : vector<16x1xf32>
    %106 = math.rsqrt %105 : vector<16x1xf32>
    %107 = vector.broadcast %106 : vector<16x1xf32> to vector<16x32xf32>
    %108 = arith.mulf %103, %107 : vector<16x32xf32>
    %109 = vector.broadcast %88 : vector<1x32xf32> to vector<16x32xf32>
    %110 = arith.mulf %108, %109 : vector<16x32xf32>
    %111 = vector.broadcast %90 : vector<1x32xf32> to vector<16x32xf32>
    %112 = arith.addf %110, %111 : vector<16x32xf32>
    %c1 = arith.constant 1 : index
    %c0_67 = arith.constant 0 : index
    %c0_68 = arith.constant 0 : index
    %113 = vector.load %arg3[%c1, %c0_67, %c0_68] : memref<2x32x96xf32, #tpu.memory_space<vmem>>, vector<1x32x96xf32>
    %114 = vector.shape_cast %113 : vector<1x32x96xf32> to vector<32x96xf32>
    %cst_69 = arith.constant dense<0.000000e+00> : vector<16x96xf32>
    %115 = tpu.matmul %112, %114, %cst_69 {dimension_numbers = #tpu.dot_dimension_numbers<[1], [0], [0], [1], [0, 0, 1, 1], [], []>} : vector<16x32xf32>, vector<32x96xf32>, vector<16x96xf32> -> vector<16x96xf32>
    %c1_70 = arith.constant 1 : index
    %c0_71 = arith.constant 0 : index
    %c0_72 = arith.constant 0 : index
    %116 = vector.load %arg4[%c1_70, %c0_71, %c0_72] : memref<2x1x96xf32, #tpu.memory_space<vmem>>, vector<1x1x96xf32>
    %117 = vector.shape_cast %116 : vector<1x1x96xf32> to vector<1x96xf32>
    %118 = vector.broadcast %117 : vector<1x96xf32> to vector<16x96xf32>
    %119 = arith.addf %115, %118 : vector<16x96xf32>
    %120 = vector.extract_strided_slice %119 {offsets = [0, 0], sizes = [16, 32], strides = [1, 1]} : vector<16x96xf32> to vector<16x32xf32>
    %cst_73 = arith.constant 0.353553385 : f32
    %121 = vector.broadcast %cst_73 : f32 to vector<16x32xf32>
    %122 = arith.mulf %120, %121 : vector<16x32xf32>
    %123 = vector.extract_strided_slice %119 {offsets = [0, 32], sizes = [16, 32], strides = [1, 1]} : vector<16x96xf32> to vector<16x32xf32>
    %124 = vector.extract_strided_slice %119 {offsets = [0, 64], sizes = [16, 32], strides = [1, 1]} : vector<16x96xf32> to vector<16x32xf32>
    %125 = tpu.concatenate %123, %123, %123, %123 in 0 : vector<16x32xf32>, vector<16x32xf32>, vector<16x32xf32>, vector<16x32xf32> -> vector<64x32xf32>
    %126 = arith.mulf %125, %0 : vector<64x32xf32>
    %127 = tpu.concatenate %124, %124, %124, %124 in 0 : vector<16x32xf32>, vector<16x32xf32>, vector<16x32xf32>, vector<16x32xf32> -> vector<64x32xf32>
    %128 = arith.mulf %127, %0 : vector<64x32xf32>
    "tpu.trace_start"() <{level = 10 : i32, message = "nd,md->nm"}> : () -> ()
    %cst_74 = arith.constant dense<0.000000e+00> : vector<16x64xf32>
    %129 = tpu.matmul %122, %126, %cst_74 {dimension_numbers = #tpu.dot_dimension_numbers<[1], [1], [0], [0], [0, 0, 1, 0], [], []>} : vector<16x32xf32>, vector<64x32xf32>, vector<16x64xf32> -> vector<16x64xf32>
    "tpu.trace_stop"() : () -> ()
    %130 = arith.addf %129, %1 : vector<16x64xf32>
    %cst_75 = arith.constant dense<0xFF800000> : vector<16xf32>
    %131 = vector.multi_reduction <maximumf>, %130, %cst_75 [1] : vector<16x64xf32> to vector<16xf32>
    %132 = vector.shape_cast %131 : vector<16xf32> to vector<16x1xf32>
    %133 = vector.broadcast %132 : vector<16x1xf32> to vector<16x64xf32>
    %134 = arith.subf %130, %133 : vector<16x64xf32>
    %135 = math.exp %134 : vector<16x64xf32>
    %cst_76 = arith.constant dense<0.000000e+00> : vector<16x64xf32>
    %136 = tpu.matmul %135, %2, %cst_76 {dimension_numbers = #tpu.dot_dimension_numbers<[1], [0], [0], [1], [0, 0, 1, 1], [], []>} : vector<16x64xf32>, vector<64x64xf32>, vector<16x64xf32> -> vector<16x64xf32>
    %137 = tpu.reciprocal %136 {approx = true} : vector<16x64xf32> -> vector<16x64xf32>
    %138 = arith.mulf %135, %137 : vector<16x64xf32>
    %cst_77 = arith.constant dense<0.000000e+00> : vector<16x32xf32>
    %139 = tpu.matmul %138, %128, %cst_77 {dimension_numbers = #tpu.dot_dimension_numbers<[1], [0], [0], [1], [0, 0, 1, 1], [], []>} : vector<16x64xf32>, vector<64x32xf32>, vector<16x32xf32> -> vector<16x32xf32>
    %c1_78 = arith.constant 1 : index
    %c0_79 = arith.constant 0 : index
    %c0_80 = arith.constant 0 : index
    %140 = vector.load %arg5[%c1_78, %c0_79, %c0_80] : memref<2x32x32xf32, #tpu.memory_space<vmem>>, vector<1x32x32xf32>
    %141 = vector.shape_cast %140 : vector<1x32x32xf32> to vector<32x32xf32>
    %cst_81 = arith.constant dense<0.000000e+00> : vector<16x32xf32>
    %142 = tpu.matmul %139, %141, %cst_81 {dimension_numbers = #tpu.dot_dimension_numbers<[1], [0], [0], [1], [0, 0, 1, 1], [], []>} : vector<16x32xf32>, vector<32x32xf32>, vector<16x32xf32> -> vector<16x32xf32>
    %c1_82 = arith.constant 1 : index
    %c0_83 = arith.constant 0 : index
    %c0_84 = arith.constant 0 : index
    %143 = vector.load %arg6[%c1_82, %c0_83, %c0_84] : memref<2x1x32xf32, #tpu.memory_space<vmem>>, vector<1x1x32xf32>
    %144 = vector.shape_cast %143 : vector<1x1x32xf32> to vector<1x32xf32>
    %145 = vector.broadcast %144 : vector<1x32xf32> to vector<16x32xf32>
    %146 = arith.addf %142, %145 : vector<16x32xf32>
    %147 = arith.addf %112, %146 : vector<16x32xf32>
    %c1_85 = arith.constant 1 : index
    %c0_86 = arith.constant 0 : index
    %c0_87 = arith.constant 0 : index
    %148 = vector.load %arg11[%c1_85, %c0_86, %c0_87] : memref<2x1x32xf32, #tpu.memory_space<vmem>>, vector<1x1x32xf32>
    %149 = vector.shape_cast %148 : vector<1x1x32xf32> to vector<1x32xf32>
    %c1_88 = arith.constant 1 : index
    %c0_89 = arith.constant 0 : index
    %c0_90 = arith.constant 0 : index
    %150 = vector.load %arg12[%c1_88, %c0_89, %c0_90] : memref<2x1x32xf32, #tpu.memory_space<vmem>>, vector<1x1x32xf32>
    %151 = vector.shape_cast %150 : vector<1x1x32xf32> to vector<1x32xf32>
    %cst_91 = arith.constant dense<0.000000e+00> : vector<16xf32>
    %152 = vector.multi_reduction <add>, %147, %cst_91 [1] : vector<16x32xf32> to vector<16xf32>
    %153 = vector.shape_cast %152 : vector<16xf32> to vector<16x1xf32>
    %cst_92 = arith.constant 3.200000e+01 : f32
    %154 = vector.broadcast %cst_92 : f32 to vector<16x1xf32>
    %155 = arith.divf %153, %154 : vector<16x1xf32>
    %156 = vector.broadcast %155 : vector<16x1xf32> to vector<16x32xf32>
    %157 = arith.subf %147, %156 : vector<16x32xf32>
    %158 = arith.mulf %157, %157 : vector<16x32xf32>
    %cst_93 = arith.constant dense<0.000000e+00> : vector<16xf32>
    %159 = vector.multi_reduction <add>, %158, %cst_93 [1] : vector<16x32xf32> to vector<16xf32>
    %160 = vector.shape_cast %159 : vector<16xf32> to vector<16x1xf32>
    %cst_94 = arith.constant 3.200000e+01 : f32
    %161 = vector.broadcast %cst_94 : f32 to vector<16x1xf32>
    %162 = arith.divf %160, %161 : vector<16x1xf32>
    %163 = vector.broadcast %155 : vector<16x1xf32> to vector<16x32xf32>
    %164 = arith.subf %147, %163 : vector<16x32xf32>
    %cst_95 = arith.constant 9.99999974E-6 : f32
    %165 = vector.broadcast %cst_95 : f32 to vector<16x1xf32>
    %166 = arith.addf %162, %165 : vector<16x1xf32>
    %167 = math.rsqrt %166 : vector<16x1xf32>
    %168 = vector.broadcast %167 : vector<16x1xf32> to vector<16x32xf32>
    %169 = arith.mulf %164, %168 : vector<16x32xf32>
    %170 = vector.broadcast %149 : vector<1x32xf32> to vector<16x32xf32>
    %171 = arith.mulf %169, %170 : vector<16x32xf32>
    %172 = vector.broadcast %151 : vector<1x32xf32> to vector<16x32xf32>
    %173 = arith.addf %171, %172 : vector<16x32xf32>
    %c1_96 = arith.constant 1 : index
    %c0_97 = arith.constant 0 : index
    %c0_98 = arith.constant 0 : index
    %174 = vector.load %arg7[%c1_96, %c0_97, %c0_98] : memref<2x32x2048xf32, #tpu.memory_space<vmem>>, vector<1x32x2048xf32>
    %175 = vector.shape_cast %174 : vector<1x32x2048xf32> to vector<32x2048xf32>
    %cst_99 = arith.constant dense<0.000000e+00> : vector<16x2048xf32>
    %176 = tpu.matmul %173, %175, %cst_99 {dimension_numbers = #tpu.dot_dimension_numbers<[1], [0], [0], [1], [0, 0, 1, 1], [], []>} : vector<16x32xf32>, vector<32x2048xf32>, vector<16x2048xf32> -> vector<16x2048xf32>
    %c1_100 = arith.constant 1 : index
    %c0_101 = arith.constant 0 : index
    %c0_102 = arith.constant 0 : index
    %177 = vector.load %arg8[%c1_100, %c0_101, %c0_102] : memref<2x1x2048xf32, #tpu.memory_space<vmem>>, vector<1x1x2048xf32>
    %178 = vector.shape_cast %177 : vector<1x1x2048xf32> to vector<1x2048xf32>
    %179 = vector.broadcast %178 : vector<1x2048xf32> to vector<16x2048xf32>
    %180 = arith.addf %176, %179 : vector<16x2048xf32>
    %cst_103 = arith.constant 0.000000e+00 : f32
    %181 = vector.broadcast %cst_103 : f32 to vector<16x2048xf32>
    %182 = arith.maximumf %180, %181 : vector<16x2048xf32>
    %c1_104 = arith.constant 1 : index
    %c0_105 = arith.constant 0 : index
    %c0_106 = arith.constant 0 : index
    %183 = vector.load %arg9[%c1_104, %c0_105, %c0_106] : memref<2x2048x32xf32, #tpu.memory_space<vmem>>, vector<1x2048x32xf32>
    %184 = vector.shape_cast %183 : vector<1x2048x32xf32> to vector<2048x32xf32>
    %cst_107 = arith.constant dense<0.000000e+00> : vector<16x32xf32>
    %185 = tpu.matmul %182, %184, %cst_107 {dimension_numbers = #tpu.dot_dimension_numbers<[1], [0], [0], [1], [0, 0, 1, 1], [], []>} : vector<16x2048xf32>, vector<2048x32xf32>, vector<16x32xf32> -> vector<16x32xf32>
    %c1_108 = arith.constant 1 : index
    %c0_109 = arith.constant 0 : index
    %c0_110 = arith.constant 0 : index
    %186 = vector.load %arg10[%c1_108, %c0_109, %c0_110] : memref<2x1x32xf32, #tpu.memory_space<vmem>>, vector<1x1x32xf32>
    %187 = vector.shape_cast %186 : vector<1x1x32xf32> to vector<1x32xf32>
    %188 = vector.broadcast %187 : vector<1x32xf32> to vector<16x32xf32>
    %189 = arith.addf %185, %188 : vector<16x32xf32>
    %190 = arith.addf %173, %189 : vector<16x32xf32>
    %c1_111 = arith.constant 1 : index
    %c0_112 = arith.constant 0 : index
    %c0_113 = arith.constant 0 : index
    %191 = vector.load %arg13[%c1_111, %c0_112, %c0_113] : memref<2x1x32xf32, #tpu.memory_space<vmem>>, vector<1x1x32xf32>
    %192 = vector.shape_cast %191 : vector<1x1x32xf32> to vector<1x32xf32>
    %c1_114 = arith.constant 1 : index
    %c0_115 = arith.constant 0 : index
    %c0_116 = arith.constant 0 : index
    %193 = vector.load %arg14[%c1_114, %c0_115, %c0_116] : memref<2x1x32xf32, #tpu.memory_space<vmem>>, vector<1x1x32xf32>
    %194 = vector.shape_cast %193 : vector<1x1x32xf32> to vector<1x32xf32>
    %cst_117 = arith.constant dense<0.000000e+00> : vector<16xf32>
    %195 = vector.multi_reduction <add>, %190, %cst_117 [1] : vector<16x32xf32> to vector<16xf32>
    %196 = vector.shape_cast %195 : vector<16xf32> to vector<16x1xf32>
    %cst_118 = arith.constant 3.200000e+01 : f32
    %197 = vector.broadcast %cst_118 : f32 to vector<16x1xf32>
    %198 = arith.divf %196, %197 : vector<16x1xf32>
    %199 = vector.broadcast %198 : vector<16x1xf32> to vector<16x32xf32>
    %200 = arith.subf %190, %199 : vector<16x32xf32>
    %201 = arith.mulf %200, %200 : vector<16x32xf32>
    %cst_119 = arith.constant dense<0.000000e+00> : vector<16xf32>
    %202 = vector.multi_reduction <add>, %201, %cst_119 [1] : vector<16x32xf32> to vector<16xf32>
    %203 = vector.shape_cast %202 : vector<16xf32> to vector<16x1xf32>
    %cst_120 = arith.constant 3.200000e+01 : f32
    %204 = vector.broadcast %cst_120 : f32 to vector<16x1xf32>
    %205 = arith.divf %203, %204 : vector<16x1xf32>
    %206 = vector.broadcast %198 : vector<16x1xf32> to vector<16x32xf32>
    %207 = arith.subf %190, %206 : vector<16x32xf32>
    %cst_121 = arith.constant 9.99999974E-6 : f32
    %208 = vector.broadcast %cst_121 : f32 to vector<16x1xf32>
    %209 = arith.addf %205, %208 : vector<16x1xf32>
    %210 = math.rsqrt %209 : vector<16x1xf32>
    %211 = vector.broadcast %210 : vector<16x1xf32> to vector<16x32xf32>
    %212 = arith.mulf %207, %211 : vector<16x32xf32>
    %213 = vector.broadcast %192 : vector<1x32xf32> to vector<16x32xf32>
    %214 = arith.mulf %212, %213 : vector<16x32xf32>
    %215 = vector.broadcast %194 : vector<1x32xf32> to vector<16x32xf32>
    %216 = arith.addf %214, %215 : vector<16x32xf32>
    %c0_122 = arith.constant 0 : index
    %c0_123 = arith.constant 0 : index
    %217 = vector.load %arg18[%c0_122, %c0_123] : memref<2x16xf32, #tpu.memory_space<vmem>>, vector<2x16xf32>
    %cst_124 = arith.constant dense<0.000000e+00> : vector<2x32xf32>
    %218 = tpu.matmul %217, %216, %cst_124 {dimension_numbers = #tpu.dot_dimension_numbers<[1], [0], [0], [1], [0, 0, 1, 1], [], []>} : vector<2x16xf32>, vector<16x32xf32>, vector<2x32xf32> -> vector<2x32xf32>
    %c0_125 = arith.constant 0 : index
    %c0_126 = arith.constant 0 : index
    %219 = vector.load %arg19[%c0_125, %c0_126] : memref<32x128xf32, #tpu.memory_space<vmem>>, vector<32x128xf32>
    %cst_127 = arith.constant dense<0.000000e+00> : vector<2x128xf32>
    %220 = tpu.matmul %218, %219, %cst_127 {dimension_numbers = #tpu.dot_dimension_numbers<[1], [0], [0], [1], [0, 0, 1, 1], [], []>} : vector<2x32xf32>, vector<32x128xf32>, vector<2x128xf32> -> vector<2x128xf32>
    %c0_128 = arith.constant 0 : index
    %c0_129 = arith.constant 0 : index
    %221 = vector.load %arg20[%c0_128, %c0_129] : memref<1x128xf32, #tpu.memory_space<vmem>>, vector<1x128xf32>
    %222 = vector.broadcast %221 : vector<1x128xf32> to vector<2x128xf32>
    %223 = arith.addf %220, %222 : vector<2x128xf32>
    %c0_130 = arith.constant 0 : index
    %c0_131 = arith.constant 0 : index
    %224 = vector.load %arg21[%c0_130, %c0_131] : memref<2x128xf32, #tpu.memory_space<vmem>>, vector<2x128xf32>
    tpu.vector_store %arg21[%c0_130, %c0_131], %223 {strides = array<i32>} : memref<2x128xf32, #tpu.memory_space<vmem>>, vector<2x128xf32>,
    return
  }
}

</mosaic_0001>

<bundles_post_ra>
// kernel: tpu_custom_call.1
= control target key start
LH: loop header
LB: loop body
LE: loop exit
PB: predicated region body
PF: predicated region fallthrough
CT: control target
= control target key end

     0   :  { %s6621_s0 = inlined_call_operand.vmem [shape: f32[16,16], index: 0, kind: input, shape index: {}]   ;;  %s6622_s1 = inlined_call_operand.vmem [shape: f32[16,32], index: 1, kind: input, shape index: {}]   ;;  %s6623_s2 = inlined_call_operand.vmem [shape: f32[1,32], index: 2, kind: input, shape index: {}]   ;;  %s6624_s3 = inlined_call_operand.vmem [shape: f32[2,32,96], index: 3, kind: input, shape index: {}]   ;;  %s6625_s4 = inlined_call_operand.vmem [shape: f32[2,1,96], index: 4, kind: input, shape index: {}]   ;;  %s6626_s5 = inlined_call_operand.vmem [shape: f32[2,32,32], index: 5, kind: input, shape index: {}]   ;;  %s6627_s6 = inlined_call_operand.vmem [shape: f32[2,1,32], index: 6, kind: input, shape index: {}]   ;;  %s6628_s7 = inlined_call_operand.vmem [shape: f32[2,32,2048], index: 7, kind: input, shape index: {}]   ;;  %s6629_s8 = inlined_call_operand.vmem [shape: f32[2,1,2048], index: 8, kind: input, shape index: {}]   ;;  %s6630_s9 = inlined_call_operand.vmem [shape: f32[2,2048,32], index: 9, kind: input, shape index: {}]   ;;  %s6631_s10 = inlined_call_operand.vmem [shape: f32[2,1,32], index: 10, kind: input, shape index: {}]   ;;  %s6632_s11 = inlined_call_operand.vmem [shape: f32[2,1,32], index: 11, kind: input, shape index: {}]   ;;  %s6633_s12 = inlined_call_operand.vmem [shape: f32[2,1,32], index: 12, kind: input, shape index: {}]   ;;  %s6634_s13 = inlined_call_operand.vmem [shape: f32[2,1,32], index: 13, kind: input, shape index: {}]   ;;  %s6635_s14 = inlined_call_operand.vmem [shape: f32[2,1,32], index: 14, kind: input, shape index: {}]   ;;  %s6636_s15 = inlined_call_operand.vmem [shape: f32[64,32], index: 15, kind: input, shape index: {}]   ;;  %s6637_s16 = inlined_call_operand.vmem [shape: f32[16,64], index: 16, kind: input, shape index: {}]   ;;  %s6638_s17 = inlined_call_operand.vmem [shape: f32[64,64], index: 17, kind: input, shape index: {}]   ;;  %s6639_s18 = inlined_call_operand.vmem [shape: f32[2,16], index: 18, kind: input, shape index: {}]   ;;  %s6640_s19 = inlined_call_operand.vmem [shape: f32[32,128], index: 19, kind: input, shape index: {}]   ;;  %s6641_s20 = inlined_call_operand.vmem [shape: f32[1,128], index: 20, kind: input, shape index: {}]   ;;  %s6642_s21 = inlined_call_operand.hbm [shape: f32[2,128], index: 21, kind: output, shape index: {}]  }
   0x1   :  { %6648 = sst [smem:[#allocation5_spill]] %s6621_s0 }
   0x2   :  { %6649 = sst [smem:[#allocation6_spill]] %s6622_s1 }
   0x3   :  { %6650 = sst [smem:[#allocation7_spill]] %s6623_s2 }
   0x4   :  { %6651 = sst [smem:[#allocation8_spill]] %s6624_s3 }
   0x5   :  { %6652 = sst [smem:[#allocation9_spill]] %s6625_s4 }
   0x6   :  { %6653 = sst [smem:[#allocation10_spill]] %s6626_s5 }
   0x7   :  { %s6654_s26 = sld [smem:[#allocation6_spill]]  ;;  %vm95_vm0 = vcmask 130048  }
   0x8   :  { %s6655_s0 = sld [smem:[#allocation5_spill]] }
   0x9   :  { %s6656_s5 = sld [smem:[#allocation8_spill]] }
   0xd   :  { %v90_v0 = vld [vmem:[%s6654_s26 + $0x8] sm:$0xff]  ;;  %v89_v1 = vld [vmem:[%s6654_s26] sm:$0xff] }
   0xe   :  { %116 = vmatpush.msra.mxu0 %v90_v0  ;;  %v87_v2 = vld [vmem:[%s6655_s0] sm:$0xff] }
   0xf   :  { %v128_v3 = vld [vmem:[%s6656_s5 + $0x18] sm:$0xff]  ;;  %v127_v4 = vld [vmem:[%s6656_s5 + $0x10] sm:$0xff] }
  0x10   :  { %152 = vmatpush.msra.mxu1 %v128_v3  ;;  %117 = vmatpush.msra.mxu0 %v89_v1 }
  0x11   :  { %3308 = vmatmul.msk.f32.vlgmr.msra.gmra.mxu0 %vm95_vm0, %v87_v2 }
  0x12   :  { %153 = vmatpush.msra.mxu1 %v127_v4 }
  0x13   :  { %26 = vsyncpa [#allocation3], 0  ;;  %v88_v5 = vld [vmem:[%s6655_s0 + $0x8] sm:$0xff]  ;;  %s3880_s3 = smov 32   ;;  %v125_v8 = vld [vmem:[%s6656_s5] sm:$0xff]  ;;  %s6657_s22 = sld [smem:[#allocation7_spill]] }
  0x14   :  { %v126_v6 = vld [vmem:[%s6656_s5 + $0x8] sm:$0xff]  ;;  %v76_v9 = vld [vmem:[%s6636_s15 + $0x38] sm:$0xff]  ;;  %v73_v10 = vld [vmem:[%s6636_s15 + $0x20] sm:$0xff]  ;;  %vm133_vm1 = vcmask 261120   ;;  %s6658_s23 = sld [smem:[#allocation9_spill]]  ;;  %s3881_s1 = smov 96  }
  0x15   :  { %v74_v7 = vld [vmem:[%s6636_s15 + $0x28] sm:$0xff]  ;;  %154 = vmatpush.msra.mxu1 %v126_v6  ;;  %187 = vrot.lane.b32.xlu0 %v76_v9, %s3880_s3  ;;  %v72_v11 = vld [vmem:[%s6636_s15 + $0x18] sm:$0xff]  ;;  %v75_v12 = vld [vmem:[%s6636_s15 + $0x30] sm:$0xff]  ;;  %s3882_s24 = smov 64   ;;  %vm306_vm2 = vcmask 523264   ;;  %s3299_s26 = sshll.u32 %s6642_s21, 4  ;;  %s3300_s26 = int_to_ptr.hbm [resolvable:$true] %s3299_s26 }
  0x16   :  { %183 = vrot.lane.b32.xlu1 %v74_v7, %s3880_s3  ;;  %v69_v13 = vld [vmem:[%s6636_s15] sm:$0xff]  ;;  %179 = vrot.lane.b32.xlu2 %v72_v11, %s3880_s3  ;;  %v4042_v14 = vld [vmem:[%s6636_s15 + $0x10] sm:$0xff] }
  0x17   :  { %155 = vmatpush.msra.mxu1 %v125_v8  ;;  %v4047_v15 = vld [vmem:[%s6636_s15 + $0x8] sm:$0xff]  ;;  %v77_v3 = vld [vmem:[%s6637_s16] sm:$0xff]  ;;  %s6659_s15 = sld [smem:[#allocation10_spill]] }
  0x19   :  { %3309 = vmatmul.msk.f32.gmra.mxu0 %vm95_vm0, %v88_v5  ;;  %v3794_v16 = vld [vmem:[%s6657_s22] ss:$0 sm:$0xff] }
  0x1a   :  { %v3795_v23 = vld [vmem:[%s6658_s23] ss:$0 sm:$0xff] }
  0x1d   :  { %185 = vrot.lane.b32.xlu0 %v75_v12, %s3880_s3 }
  0x1e   :  { %181 = vrot.lane.b32.xlu1 %v73_v10, %s3880_s3  ;;  %177 = vrot.lane.b32.xlu2 %v4042_v14, %s3880_s3 }
  0x25   :  { %175 = vrot.lane.b32.xlu0 %v4047_v15, %s3880_s3 }
  0x26   :  { %173 = vrot.lane.b32.xlu1 %v69_v13, %s3880_s3 }
  0x70   :  { %v4078_v29 = vpop.permute.xlu2 %179 }
  0x78   :  { %v4093_v36 = vpop.permute.xlu2 %177 }
  0x87   :  { %v4062_v21 = vpop.permute.xlu0 %187 }
  0x88   :  { %v4064_v22 = vpop.permute.xlu1 %183 }
  0x8e   :  { %v119_v17 = vpop.f32.mrf.mxu0 }
  0x8f   :  { %v4054_v18 = vadd.f32 %v3794_v16, %v119_v17  ;;  %v4069_v25 = vpop.permute.xlu0 %185 }
  0x90   :  { %v4076_v28 = vpop.permute.xlu1 %181 }
  0x91   :  { %3310 = vmatmul.msk.f32.vlgmr.msra.gmra.mxu1 %vm133_vm1, %v4054_v18 }
  0x96   :  { %v122_v19 = vpop.f32.mrf.mxu0 }
  0x97   :  { %v4058_v20 = vadd.f32 %v3794_v16, %v122_v19  ;;  %v4104_v40 = vpop.permute.xlu0 %175  ;;  %v84_v19 = vld [vmem:[%s6638_s17 + $0x28] sm:$0xff] }
  0x98   :  { %v4091_v35 = vpop.permute.xlu1 %173 }
  0x99   :  { %3311 = vmatmul.msk.f32.gmra.mxu1 %vm133_vm1, %v4058_v20 }
 0x10e   :  { %v157_v24 = vpop.f32.mrf.mxu1 }
 0x10f   :  { %v4071_v26 = vadd.f32 %v3795_v23, %v157_v24  ;;  %v82_v24 = vld [vmem:[%s6638_s17 + $0x18] sm:$0xff] }
 0x111   :  { %v203_v27 = vmul.f32 %v4069_v25, %v4071_v26  ;;  %v197_v37 = vmul.f32 %v4091_v35, %v4071_v26  ;;  %v201_v38 = vmul.f32 %v4076_v28, %v4071_v26  ;;  %v199_v39 = vmul.f32 %v4093_v36, %v4071_v26 }
 0x112   :  { %v163_v51 = vmul.f32 0.35355338, %v4071_v26 }
 0x113   :  { %257 = vrot.lane.b32.xlu0 %v203_v27, %s3881_s1  ;;  %v79_v27 = vld [vmem:[%s6638_s17] sm:$0xff] }
 0x116   :  { %v160_v30 = vpop.f32.mrf.mxu1 }
 0x117   :  { %v4080_v31 = vadd.f32 %v3795_v23, %v160_v30  ;;  %v83_v23 = vld [vmem:[%s6638_s17 + $0x20] sm:$0xff] }
 0x119   :  { %v204_v32 = vmul.f32 %v4062_v21, %v4080_v31  ;;  %v200_v33 = vmul.f32 %v4078_v29, %v4080_v31  ;;  %v202_v34 = vmul.f32 %v4064_v22, %v4080_v31  ;;  %v198_v41 = vmul.f32 %v4104_v40, %v4080_v31 }
 0x11a   :  { %v164_v56 = vmul.f32 0.35355338, %v4080_v31 }
 0x11b   :  { %259 = vrot.lane.b32.xlu2 %v204_v32, %s3881_s1  ;;  %251 = vrot.lane.b32.xlu0 %v200_v33, %s3881_s1 }
 0x11c   :  { %255 = vrot.lane.b32.xlu1 %v202_v34, %s3881_s1 }
 0x123   :  { %253 = vrot.lane.b32.xlu2 %v201_v38, %s3881_s1  ;;  %245 = vrot.lane.b32.xlu0 %v197_v37, %s3881_s1 }
 0x124   :  { %249 = vrot.lane.b32.xlu1 %v199_v39, %s3881_s1 }
 0x12b   :  { %247 = vrot.lane.b32.xlu2 %v198_v41, %s3881_s1  ;;  %219 = vrot.lane.b32.xlu0 %v76_v9, %s3882_s24  ;;  %v86_v9 = vld [vmem:[%s6638_s17 + $0x38] sm:$0xff] }
 0x12c   :  { %333 = vmatpush.msra.mxu3 %v86_v9 }
 0x133   :  { %217 = vrot.lane.b32.xlu0 %v75_v12, %s3882_s24 }
 0x13b   :  { %215 = vrot.lane.b32.xlu0 %v74_v7, %s3882_s24 }
 0x143   :  { %213 = vrot.lane.b32.xlu0 %v73_v10, %s3882_s24  ;;  %v85_v10 = vld [vmem:[%s6638_s17 + $0x30] sm:$0xff] }
 0x144   :  { %334 = vmatpush.msra.mxu3 %v85_v10 }
 0x146   :  { %335 = vmatpush.msra.mxu3 %v84_v19 }
 0x148   :  { %336 = vmatpush.msra.mxu3 %v83_v23  ;;  %v3883_v23 = vmov 32.0  }
 0x14a   :  { %337 = vmatpush.msra.mxu3 %v82_v24 }
 0x14b   :  { %211 = vrot.lane.b32.xlu0 %v72_v11, %s3882_s24  ;;  %v78_v11 = vld [vmem:[%s6637_s16 + $0x8] sm:$0xff] }
 0x153   :  { %205 = vrot.lane.b32.xlu0 %v69_v13, %s3882_s24 }
 0x175   :  { %v260_v42 = vpop.permute.xlu2 %259 }
 0x176   :  { %3312 = vmatpush.xpose.msk.msra.mxu2 %vm133_vm1, %v260_v42 }
 0x17d   :  { %v254_v46 = vpop.permute.xlu2 %253 }
 0x185   :  { %v258_v43 = vpop.permute.xlu0 %257  ;;  %v248_v50 = vpop.permute.xlu2 %247 }
 0x186   :  { %3313 = vmatpush.xpose.msk.msra.mxu2 %vm133_vm1, %v258_v43 }
 0x18d   :  { %v252_v44 = vpop.permute.xlu0 %251 }
 0x18e   :  { %v256_v45 = vpop.permute.xlu1 %255 }
 0x18f   :  { %3314 = vmatpush.xpose.msk.msra.mxu2 %vm133_vm1, %v256_v45 }
 0x193   :  { %3315 = vmatpush.xpose.msk.msra.mxu2 %vm133_vm1, %v254_v46 }
 0x195   :  { %v246_v47 = vpop.permute.xlu0 %245 }
 0x196   :  { %v250_v48 = vpop.permute.xlu1 %249 }
 0x197   :  { %3316 = vmatpush.xpose.msk.msra.mxu2 %vm133_vm1, %v252_v44 }
 0x19b   :  { %3317 = vmatpush.xpose.msk.msra.mxu2 %vm133_vm1, %v250_v48 }
 0x19d   :  { %v4121_v49 = vpop.permute.xlu0 %219 }
 0x19e   :  { %v236_v53 = vmul.f32 %v4121_v49, %v4080_v31 }
 0x19f   :  { %3318 = vmatpush.xpose.msk.msra.mxu2 %vm133_vm1, %v248_v50 }
 0x1a3   :  { %3319 = vmatpush.xpose.msk.msra.mxu2 %vm133_vm1, %v246_v47 }
 0x1a5   :  { %v4126_v52 = vpop.permute.xlu0 %217 }
 0x1a6   :  { %v235_v54 = vmul.f32 %v4126_v52, %v4071_v26  ;;  %3320 = vmatmul.msk.f32.vlgmr.msra.gmra.mxu2 %vm133_vm1, %v163_v51 }
 0x1a8   :  { %v3754_v55 = vpack.i.bf16 %v235_v54, %v236_v53 }
 0x1aa   :  { %3755 = vrot.lane.b32.xlu0 %v3754_v55, %s3882_s24  ;;  %v416_v55 = vld [vmem:[%s6659_s15 + $0x18] sm:$0xff] }
 0x1ab   :  { %439 = vmatpush.msrb.mxu1 %v416_v55  ;;  %v550_v55 = vld [vmem:[%s6628_s7 + $0x118] sm:$0xff] }
 0x1ad   :  { %v4135_v57 = vpop.permute.xlu0 %215 }
 0x1ae   :  { %3321 = vmatmul.msk.f32.gmra.mxu2 %vm133_vm1, %v164_v56  ;;  %v234_v59 = vmul.f32 %v4135_v57, %v4080_v31  ;;  %v415_v56 = vld [vmem:[%s6659_s15 + $0x10] sm:$0xff] }
 0x1af   :  { %440 = vmatpush.msrb.mxu1 %v415_v56  ;;  %v531_v56 = vld [vmem:[%s6628_s7 + $0x80] sm:$0xff] }
 0x1b5   :  { %v4138_v58 = vpop.permute.xlu0 %213 }
 0x1b6   :  { %v233_v60 = vmul.f32 %v4138_v58, %v4071_v26 }
 0x1b8   :  { %v3759_v61 = vpack.i.bf16 %v233_v60, %v234_v59 }
 0x1ba   :  { %3760 = vrot.lane.b32.xlu0 %v3759_v61, %s3882_s24 }
 0x1bd   :  { %v4145_v62 = vpop.permute.xlu0 %211 }
 0x1be   :  { %v232_v42 = vmul.f32 %v4145_v62, %v4080_v31 }
 0x1c5   :  { %v4147_v63 = vpop.permute.xlu0 %205 }
 0x1c6   :  { %v229_v47 = vmul.f32 %v4147_v63, %v4071_v26 }
 0x21c   :  { %v3756_v0 = vpop.permute.xlu0 %3755 }
 0x21d   :  { %v3757_v1 = vunpack.i.l.bf16 %v3756_v0  ;;  %v3758_v2 = vunpack.i.h.bf16 %v3756_v0 }
 0x21f   :  { %398 = vmatpush.msrb.mxu0 %v3757_v1 }
 0x221   :  { %399 = vmatpush.msrb.mxu0 %v3758_v2 }
 0x229   :  { %v300_v4 = vpop.f32.mrf.mxu2 }
 0x22a   :  { %v301_v5 = vadd.f32 %v300_v4, %v77_v3 }
 0x22c   :  { %v3761_v6 = vpop.permute.xlu0 %3760  ;;  %v307_v7 = vsel %vm306_vm2, %v301_v5, -inf }
 0x22d   :  { %308 = vmax.xlane.f32.xlu1 %v307_v7  ;;  %v3762_v8 = vunpack.i.l.bf16 %v3761_v6  ;;  %v3763_v12 = vunpack.i.h.bf16 %v3761_v6 }
 0x22f   :  { %400 = vmatpush.msrb.mxu0 %v3762_v8  ;;  %v3796_v8 = vld [vmem:[%s6627_s6] ss:$0 sm:$0xff] }
 0x231   :  { %v303_v13 = vpop.f32.mrf.mxu2  ;;  %401 = vmatpush.msrb.mxu0 %v3763_v12 }
 0x232   :  { %v304_v16 = vadd.f32 %v303_v13, %v78_v11 }
 0x234   :  { %v310_v17 = vsel %vm306_vm2, %v304_v16, -inf }
 0x235   :  { %311 = vmax.xlane.f32.xlu2 %v310_v17 }
 0x246   :  { %207 = vrot.lane.b32.xlu1 %v4047_v15, %s3882_s24  ;;  %v81_v15 = vld [vmem:[%s6638_s17 + $0x10] sm:$0xff] }
 0x247   :  { %338 = vmatpush.msra.mxu3 %v81_v15 }
 0x24d   :  { %209 = vrot.lane.b32.xlu2 %v4042_v14, %s3882_s24  ;;  %v80_v14 = vld [vmem:[%s6638_s17 + $0x8] sm:$0xff] }
 0x24e   :  { %339 = vmatpush.msra.mxu3 %v80_v14 }
 0x250   :  { %340 = vmatpush.msra.mxu3 %v79_v27 }
 0x2a0   :  { %v309_v30 = vpop.xlane.xlu1 %308 }
 0x2a1   :  { %v313_v32 = vsub.f32 %v301_v5, %v309_v30  ;;  %v413_v5 = vld [vmem:[%s6659_s15] sm:$0xff] }
 0x2a3   :  { %v315_v33 = vmul.f32 1.442695, %v313_v32 }
 0x2a5   :  { %3810 = vpow2.f32 %v315_v33 }
 0x2a8   :  { %v312_v34 = vpop.xlane.xlu2 %311 }
 0x2a9   :  { %v314_v37 = vsub.f32 %v304_v16, %v312_v34 }
 0x2ab   :  { %v3811_v38 = vpop.eup %3810  ;;  %v317_v39 = vmul.f32 1.442695, %v314_v37 }
 0x2ac   :  { %3322 = vmatmul.msk.f32.vlgmr.msra.gmra.mxu3 %vm306_vm2, %v3811_v38 }
 0x2ad   :  { %3812 = vpow2.f32 %v317_v39 }
 0x2b0   :  { %v4186_v41 = vpop.permute.xlu2 %209 }
 0x2b1   :  { %v231_v43 = vmul.f32 %v4186_v41, %v4071_v26  ;;  %v414_v26 = vld [vmem:[%s6659_s15 + $0x8] sm:$0xff] }
 0x2b2   :  { %441 = vmatpush.msrb.mxu1 %v414_v26  ;;  %v532_v26 = vld [vmem:[%s6628_s7 + $0x88] sm:$0xff] }
 0x2b3   :  { %v3813_v44 = vpop.eup %3812  ;;  %v3764_v45 = vpack.i.bf16 %v231_v43, %v232_v42 }
 0x2b4   :  { %3323 = vmatmul.msk.f32.gmra.mxu3 %vm306_vm2, %v3813_v44  ;;  %442 = vmatpush.msrb.mxu1 %v413_v5  ;;  %v567_v5 = vld [vmem:[%s6628_s7 + $0x1a0] sm:$0xff] }
 0x2b5   :  { %3765 = vrot.lane.b32.xlu2 %v3764_v45, %s3882_s24  ;;  %v563_v45 = vld [vmem:[%s6628_s7 + $0x180] sm:$0xff] }
 0x2b6   :  { %633 = vmatpush.msrb.mxu3 %v563_v45 }
 0x2b8   :  { %v4194_v46 = vpop.permute.xlu1 %207 }
 0x2b9   :  { %v230_v48 = vmul.f32 %v4194_v46, %v4080_v31 }
 0x2bb   :  { %v3769_v50 = vpack.i.bf16 %v229_v47, %v230_v48  ;;  %v564_v47 = vld [vmem:[%s6628_s7 + $0x188] sm:$0xff]  ;;  %v565_v48 = vld [vmem:[%s6628_s7 + $0x190] sm:$0xff] }
 0x2bc   :  { %679 = vmatpush.msra.mxu1 %v565_v48 }
 0x2bd   :  { %3770 = vrot.lane.b32.xlu1 %v3769_v50, %s3882_s24  ;;  %v566_v50 = vld [vmem:[%s6628_s7 + $0x198] sm:$0xff] }
 0x2be   :  { %702 = vmatpush.msrb.mxu2 %v566_v50 }
 0x2c0   :  { %703 = vmatpush.msrb.mxu2 %v550_v55 }
 0x30f   :  { %v3766_v51 = vpop.permute.xlu2 %3765 }
 0x310   :  { %v3767_v53 = vunpack.i.l.bf16 %v3766_v51  ;;  %v3768_v54 = vunpack.i.h.bf16 %v3766_v51  ;;  %v547_v51 = vld [vmem:[%s6628_s7 + $0x100] sm:$0xff] }
 0x311   :  { %634 = vmatpush.msrb.mxu3 %v547_v51  ;;  %v3798_v51 = vld [vmem:[%s6633_s12] ss:$0 sm:$0xff] }
 0x312   :  { %402 = vmatpush.msrb.mxu0 %v3767_v53  ;;  %v548_v53 = vld [vmem:[%s6628_s7 + $0x108] sm:$0xff] }
 0x313   :  { %635 = vmatpush.msrb.mxu3 %v531_v56 }
 0x314   :  { %403 = vmatpush.msrb.mxu0 %v3768_v54  ;;  %v549_v54 = vld [vmem:[%s6628_s7 + $0x110] sm:$0xff] }
 0x315   :  { %680 = vmatpush.msra.mxu1 %v549_v54 }
 0x32f   :  { %v342_v31 = vpop.f32.mrf.mxu3  ;;  %v3771_v59 = vpop.permute.xlu1 %3770 }
 0x330   :  { %3814 = vrcp.f32 %v342_v31  ;;  %v3772_v60 = vunpack.i.l.bf16 %v3771_v59  ;;  %v3773_v61 = vunpack.i.h.bf16 %v3771_v59  ;;  %v533_v31 = vld [vmem:[%s6628_s7 + $0x90] sm:$0xff]  ;;  %v534_v59 = vld [vmem:[%s6628_s7 + $0x98] sm:$0xff] }
 0x331   :  { %681 = vmatpush.msra.mxu1 %v533_v31  ;;  %704 = vmatpush.msrb.mxu2 %v534_v59  ;;  %v571_v59 = vld [vmem:[%s6628_s7 + $0x1c0] sm:$0xff] }
 0x332   :  { %404 = vmatpush.msrb.mxu0 %v3772_v60  ;;  %v515_v60 = vld [vmem:[%s6628_s7] sm:$0xff] }
 0x333   :  { %636 = vmatpush.msrb.mxu3 %v515_v60  ;;  %v572_v60 = vld [vmem:[%s6628_s7 + $0x1c8] sm:$0xff] }
 0x334   :  { %405 = vmatpush.msrb.mxu0 %v3773_v61  ;;  %v516_v61 = vld [vmem:[%s6628_s7 + $0x8] sm:$0xff] }
 0x335   :  { %725 = vmatpush.msra.mxu3 %v567_v5  ;;  %v558_v5 = vld [vmem:[%s6628_s7 + $0x158] sm:$0xff] }
 0x336   :  { %v3815_v0 = vpop.eup %3814  ;;  %656 = vmatpush.msra.mxu0 %v564_v47  ;;  %v3797_v47 = vld [vmem:[%s6632_s11] ss:$0 sm:$0xff] }
 0x337   :  { %v345_v1 = vpop.f32.mrf.mxu3  ;;  %v350_v2 = vmul.f32 %v3815_v0, %v3811_v38  ;;  %v517_v0 = vld [vmem:[%s6628_s7 + $0x10] sm:$0xff] }
 0x338   :  { %3816 = vrcp.f32 %v345_v1  ;;  %657 = vmatpush.msra.mxu0 %v548_v53  ;;  %v518_v1 = vld [vmem:[%s6628_s7 + $0x18] sm:$0xff]  ;;  %682 = vmatpush.msra.mxu1 %v517_v0 }
 0x339   :  { %3324 = vmatmul.msk.f32.vlgmr.msrb.gmra.mxu0 %vm306_vm2, %v350_v2  ;;  %3818 = vrcp.f32 %v3883_v23  ;;  %705 = vmatpush.msrb.mxu2 %v518_v1  ;;  %v537_v23 = vld [vmem:[%s6628_s7 + $0xb0] sm:$0xff]  ;;  %v555_v1 = vld [vmem:[%s6628_s7 + $0x140] sm:$0xff] }
 0x33a   :  { %658 = vmatpush.msra.mxu0 %v532_v26 }
 0x33c   :  { %659 = vmatpush.msra.mxu0 %v516_v61  ;;  %v574_v61 = vld [vmem:[%s6628_s7 + $0x1d8] sm:$0xff] }
 0x33e   :  { %v3817_v3 = vpop.eup %3816 }
 0x33f   :  { %v351_v4 = vmul.f32 %v3817_v3, %v3813_v44  ;;  %v3819_v24 = vpop.eup %3818 }
 0x340   :  { %v461_v15 = vmul.f32 32.0, %v3819_v24  ;;  %vm465_vm3 = vweird.f32 %v3819_v24 }
 0x341   :  { %3325 = vmatmul.msk.f32.gmra.mxu0 %vm306_vm2, %v351_v4 }
 0x342   :  { %v462_v14 = vsub.f32 1.0, %v461_v15  ;;  %v519_v15 = vld [vmem:[%s6628_s7 + $0x20] sm:$0xff] }
 0x344   :  { %v463_v27 = vmul.f32 %v3819_v24, %v462_v14  ;;  %v520_v14 = vld [vmem:[%s6628_s7 + $0x28] sm:$0xff] }
 0x346   :  { %v464_v30 = vadd.f32 %v3819_v24, %v463_v27 }
 0x348   :  { %v4224_v32 = vsel %vm465_vm3, %v3819_v24, %v464_v30  ;;  %v538_v24 = vld [vmem:[%s6628_s7 + $0xb8] sm:$0xff] }
 0x3b6   :  { %v407_v6 = vpop.f32.mrf.mxu0 }
 0x3b7   :  { %3326 = vmatmul.msk.f32.vlgmr.msrb.gmra.mxu1 %vm133_vm1, %v407_v6  ;;  %v568_v6 = vld [vmem:[%s6628_s7 + $0x1a8] sm:$0xff] }
 0x3b8   :  { %748 = vmatpush.msrb.mxu0 %v568_v6  ;;  %v539_v6 = vld [vmem:[%s6628_s7 + $0xc0] sm:$0xff] }
 0x3be   :  { %v410_v7 = vpop.f32.mrf.mxu0 }
 0x3bf   :  { %3327 = vmatmul.msk.f32.gmra.mxu1 %vm133_vm1, %v410_v7  ;;  %v569_v7 = vld [vmem:[%s6628_s7 + $0x1b0] sm:$0xff] }
 0x3c0   :  { %771 = vmatpush.msrb.mxu1 %v569_v7 }
 0x434   :  { %v444_v9 = vpop.f32.mrf.mxu1 }
 0x435   :  { %v445_v10 = vadd.f32 %v3796_v8, %v444_v9  ;;  %v551_v9 = vld [vmem:[%s6628_s7 + $0x120] sm:$0xff] }
 0x436   :  { %726 = vmatpush.msra.mxu3 %v551_v9  ;;  %v542_v9 = vld [vmem:[%s6628_s7 + $0xd8] sm:$0xff] }
 0x437   :  { %v450_v11 = vadd.f32 %v445_v10, %v4054_v18  ;;  %v552_v10 = vld [vmem:[%s6628_s7 + $0x128] sm:$0xff] }
 0x438   :  { %749 = vmatpush.msrb.mxu0 %v552_v10 }
 0x439   :  { %v454_v12 = vsel %vm133_vm1, %v450_v11, 0.0 }
 0x43a   :  { %455 = vadd.xlane.f32.xlu0 %v454_v12  ;;  %v553_v12 = vld [vmem:[%s6628_s7 + $0x130] sm:$0xff] }
 0x43b   :  { %772 = vmatpush.msrb.mxu1 %v553_v12  ;;  %v524_v12 = vld [vmem:[%s6628_s7 + $0x48] sm:$0xff] }
 0x43c   :  { %v447_v13 = vpop.f32.mrf.mxu1 }
 0x43d   :  { %v448_v16 = vadd.f32 %v3796_v8, %v447_v13  ;;  %v570_v8 = vld [vmem:[%s6628_s7 + $0x1b8] sm:$0xff]  ;;  %773 = vmatpush.msrb.mxu1 %v537_v23  ;;  %v577_v23 = vld [vmem:[%s6628_s7 + $0x1f0] sm:$0xff] }
 0x43e   :  { %794 = vmatpush.msra.mxu2 %v570_v8  ;;  %v554_v13 = vld [vmem:[%s6628_s7 + $0x138] sm:$0xff]  ;;  %v541_v8 = vld [vmem:[%s6628_s7 + $0xd0] sm:$0xff] }
 0x43f   :  { %v451_v17 = vadd.f32 %v448_v16, %v4058_v20  ;;  %v535_v16 = vld [vmem:[%s6628_s7 + $0xa0] sm:$0xff] }
 0x440   :  { %795 = vmatpush.msra.mxu2 %v554_v13  ;;  %727 = vmatpush.msra.mxu3 %v535_v16  ;;  %v525_v13 = vld [vmem:[%s6628_s7 + $0x50] sm:$0xff]  ;;  %v526_v16 = vld [vmem:[%s6628_s7 + $0x58] sm:$0xff] }
 0x441   :  { %v457_v19 = vsel %vm133_vm1, %v451_v17, 0.0 }
 0x442   :  { %458 = vadd.xlane.f32.xlu2 %v457_v19  ;;  %v536_v19 = vld [vmem:[%s6628_s7 + $0xa8] sm:$0xff]  ;;  %796 = vmatpush.msra.mxu2 %v538_v24  ;;  %v578_v24 = vld [vmem:[%s6628_s7 + $0x1f8] sm:$0xff] }
 0x443   :  { %750 = vmatpush.msrb.mxu0 %v536_v19  ;;  %728 = vmatpush.msra.mxu3 %v519_v15  ;;  %v576_v19 = vld [vmem:[%s6628_s7 + $0x1e8] sm:$0xff]  ;;  %v559_v15 = vld [vmem:[%s6628_s7 + $0x160] sm:$0xff] }
 0x445   :  { %751 = vmatpush.msrb.mxu0 %v520_v14  ;;  %v560_v14 = vld [vmem:[%s6628_s7 + $0x168] sm:$0xff] }
 0x4ad   :  { %v456_v18 = vpop.xlane.xlu0 %455 }
 0x4ae   :  { %v467_v33 = vmul.f32 %v4224_v32, %v456_v18  ;;  %v521_v18 = vld [vmem:[%s6628_s7 + $0x30] sm:$0xff] }
 0x4af   :  { %774 = vmatpush.msrb.mxu1 %v521_v18  ;;  %v543_v18 = vld [vmem:[%s6628_s7 + $0xe0] sm:$0xff] }
 0x4b0   :  { %v4227_v34 = vsub.f32 %v450_v11, %v467_v33  ;;  %v522_v33 = vld [vmem:[%s6628_s7 + $0x38] sm:$0xff] }
 0x4b1   :  { %797 = vmatpush.msra.mxu2 %v522_v33  ;;  %v544_v33 = vld [vmem:[%s6628_s7 + $0xe8] sm:$0xff] }
 0x4b2   :  { %v471_v20 = vmul.f32 %v4227_v34, %v4227_v34 }
 0x4b4   :  { %v473_v37 = vsel %vm133_vm1, %v471_v20, 0.0 }
 0x4b5   :  { %474 = vadd.xlane.f32.xlu1 %v473_v37  ;;  %v459_v38 = vpop.xlane.xlu2 %458 }
 0x4b6   :  { %v468_v39 = vmul.f32 %v4224_v32, %v459_v38 }
 0x4b8   :  { %v4233_v42 = vsub.f32 %v451_v17, %v468_v39 }
 0x4ba   :  { %v472_v43 = vmul.f32 %v4233_v42, %v4233_v42 }
 0x4bc   :  { %v476_v44 = vsel %vm133_vm1, %v472_v43, 0.0 }
 0x4bd   :  { %477 = vadd.xlane.f32.xlu0 %v476_v44 }
 0x528   :  { %v475_v2 = vpop.xlane.xlu1 %474 }
 0x529   :  { %v479_v3 = vmul.f32 %v475_v2, %v4224_v32  ;;  %v556_v2 = vld [vmem:[%s6628_s7 + $0x148] sm:$0xff] }
 0x52b   :  { %v481_v4 = vadd.f32 1e-05, %v479_v3 }
 0x52d   :  { %3820 = vrsqrt.f32 %v481_v4  ;;  %vm489_vm5 = vweird.f32 %v481_v4 }
 0x530   :  { %v478_v11 = vpop.xlane.xlu0 %477 }
 0x531   :  { %v480_v17 = vmul.f32 %v478_v11, %v4224_v32  ;;  %v523_v11 = vld [vmem:[%s6628_s7 + $0x40] sm:$0xff] }
 0x533   :  { %v3821_v27 = vpop.eup %3820  ;;  %v482_v30 = vadd.f32 1e-05, %v480_v17  ;;  %v575_v17 = vld [vmem:[%s6628_s7 + $0x1e0] sm:$0xff] }
 0x534   :  { %v484_v20 = vmul.f32 %v3821_v27, %v481_v4  ;;  %vm490_vm4 = vweird.f32 %v3821_v27  ;;  %v557_v4 = vld [vmem:[%s6628_s7 + $0x150] sm:$0xff] }
 0x535   :  { %3822 = vrsqrt.f32 %v482_v30  ;;  %vm491_vm6 = vmor %vm489_vm5, %vm490_vm4  ;;  %vm499_vm8 = vweird.f32 %v482_v30 }
 0x536   :  { %v485_v37 = vmul.f32 %v3821_v27, %v484_v20  ;;  %v545_v20 = vld [vmem:[%s6628_s7 + $0xf0] sm:$0xff] }
 0x538   :  { %v486_v38 = vmul.f32 0.5, %v485_v37  ;;  %v546_v37 = vld [vmem:[%s6628_s7 + $0xf8] sm:$0xff] }
 0x53a   :  { %v487_v39 = vsub.f32 1.5, %v486_v38  ;;  %v527_v38 = vld [vmem:[%s6628_s7 + $0x60] sm:$0xff] }
 0x53b   :  { %v3823_v43 = vpop.eup %3822 }
 0x53c   :  { %v488_v44 = vmul.f32 %v3821_v27, %v487_v39  ;;  %v494_v45 = vmul.f32 %v3823_v43, %v482_v30  ;;  %vm500_vm7 = vweird.f32 %v3823_v43  ;;  %v562_v30 = vld [vmem:[%s6628_s7 + $0x178] sm:$0xff]  ;;  %v528_v39 = vld [vmem:[%s6628_s7 + $0x68] sm:$0xff] }
 0x53d   :  { %vm501_vm9 = vmor %vm499_vm8, %vm500_vm7 }
 0x53e   :  { %v492_v48 = vsel %vm491_vm6, %v3821_v27, %v488_v44  ;;  %v495_v50 = vmul.f32 %v3823_v43, %v494_v45  ;;  %v561_v27 = vld [vmem:[%s6628_s7 + $0x170] sm:$0xff]  ;;  %v530_v44 = vld [vmem:[%s6628_s7 + $0x78] sm:$0xff] }
 0x53f   :  { %v503_v53 = vmul.f32 %v492_v48, %v4227_v34  ;;  %v573_v34 = vld [vmem:[%s6628_s7 + $0x1d0] sm:$0xff]  ;;  %v1052_v45 = vld [vmem:[%s6630_s9 + $0xf8] sm:$0xff] }
 0x540   :  { %v496_v54 = vmul.f32 0.5, %v495_v50  ;;  %v1036_v48 = vld [vmem:[%s6630_s9 + $0x78] sm:$0xff] }
 0x541   :  { %v508_v55 = vmul.f32 %v3797_v47, %v503_v53  ;;  %v1084_v50 = vld [vmem:[%s6630_s9 + $0x1f8] sm:$0xff]  ;;  %v1067_v53 = vld [vmem:[%s6630_s9 + $0x170] sm:$0xff] }
 0x542   :  { %v497_v56 = vsub.f32 1.5, %v496_v54  ;;  %v1035_v54 = vld [vmem:[%s6630_s9 + $0x70] sm:$0xff] }
 0x543   :  { %v4343_v26 = vadd.f32 %v3798_v51, %v508_v55  ;;  %v1083_v55 = vld [vmem:[%s6630_s9 + $0x1f0] sm:$0xff] }
 0x544   :  { %v498_v31 = vmul.f32 %v3823_v43, %v497_v56  ;;  %v1050_v56 = vld [vmem:[%s6630_s9 + $0xe8] sm:$0xff] }
 0x545   :  { %3328 = vmatmul.msk.f32.vlgmr.msrb.gmra.mxu3 %vm133_vm1, %v4343_v26  ;;  %3330 = vmatmul.msk.f32.vlgmr.msra.gmra.mxu0 %vm133_vm1, %v4343_v26 }
 0x546   :  { %v502_v0 = vsel %vm501_vm9, %v3823_v43, %v498_v31  ;;  %3332 = vmatmul.msk.f32.vlgmr.msra.gmra.mxu1 %vm133_vm1, %v4343_v26  ;;  %3334 = vmatmul.msk.f32.vlgmr.msrb.gmra.mxu2 %vm133_vm1, %v4343_v26  ;;  %v529_v43 = vld [vmem:[%s6628_s7 + $0x70] sm:$0xff]  ;;  %v1066_v31 = vld [vmem:[%s6630_s9 + $0x168] sm:$0xff] }
 0x547   :  { %v504_v3 = vmul.f32 %v502_v0, %v4233_v42  ;;  %817 = vmatpush.msrb.mxu3 %v571_v59  ;;  %840 = vmatpush.msra.mxu0 %v572_v60  ;;  %v540_v42 = vld [vmem:[%s6628_s7 + $0xc8] sm:$0xff]  ;;  %v1033_v0 = vld [vmem:[%s6630_s9 + $0x60] sm:$0xff] }
 0x548   :  { %863 = vmatpush.msra.mxu1 %v573_v34  ;;  %886 = vmatpush.msrb.mxu2 %v574_v61  ;;  %v1034_v59 = vld [vmem:[%s6630_s9 + $0x68] sm:$0xff]  ;;  %v1049_v34 = vld [vmem:[%s6630_s9 + $0xe0] sm:$0xff] }
 0x549   :  { %v509_v7 = vmul.f32 %v3797_v47, %v504_v3  ;;  %818 = vmatpush.msrb.mxu3 %v555_v1  ;;  %841 = vmatpush.msra.mxu0 %v556_v2  ;;  %v1068_v47 = vld [vmem:[%s6630_s9 + $0x178] sm:$0xff]  ;;  %v1082_v60 = vld [vmem:[%s6630_s9 + $0x1e8] sm:$0xff]  ;;  %v1065_v61 = vld [vmem:[%s6630_s9 + $0x160] sm:$0xff] }
 0x54a   :  { %864 = vmatpush.msra.mxu1 %v557_v4  ;;  %887 = vmatpush.msrb.mxu2 %v558_v5  ;;  %v1081_v1 = vld [vmem:[%s6630_s9 + $0x1e0] sm:$0xff]  ;;  %v1048_v2 = vld [vmem:[%s6630_s9 + $0xd8] sm:$0xff] }
 0x54b   :  { %v4390_v10 = vadd.f32 %v3798_v51, %v509_v7  ;;  %819 = vmatpush.msrb.mxu3 %v539_v6  ;;  %842 = vmatpush.msra.mxu0 %v540_v42  ;;  %v1051_v51 = vld [vmem:[%s6630_s9 + $0xf0] sm:$0xff]  ;;  %v1064_v3 = vld [vmem:[%s6630_s9 + $0x158] sm:$0xff] }
 0x54c   :  { %865 = vmatpush.msra.mxu1 %v541_v8  ;;  %888 = vmatpush.msrb.mxu2 %v542_v9  ;;  %v1032_v4 = vld [vmem:[%s6630_s9 + $0x58] sm:$0xff]  ;;  %v1047_v6 = vld [vmem:[%s6630_s9 + $0xd0] sm:$0xff]  ;;  %v1046_v9 = vld [vmem:[%s6630_s9 + $0xc8] sm:$0xff] }
 0x54d   :  { %3329 = vmatmul.msk.f32.gmra.mxu3 %vm133_vm1, %v4390_v10  ;;  %3331 = vmatmul.msk.f32.gmra.mxu0 %vm133_vm1, %v4390_v10  ;;  %v1080_v5 = vld [vmem:[%s6630_s9 + $0x1d8] sm:$0xff]  ;;  %v1063_v42 = vld [vmem:[%s6630_s9 + $0x150] sm:$0xff] }
 0x54e   :  { %3333 = vmatmul.msk.f32.gmra.mxu1 %vm133_vm1, %v4390_v10  ;;  %3335 = vmatmul.msk.f32.gmra.mxu2 %vm133_vm1, %v4390_v10  ;;  %v1031_v7 = vld [vmem:[%s6630_s9 + $0x50] sm:$0xff] }
 0x54f   :  { %820 = vmatpush.msrb.mxu3 %v523_v11  ;;  %843 = vmatpush.msra.mxu0 %v524_v12  ;;  %v1079_v8 = vld [vmem:[%s6630_s9 + $0x1d0] sm:$0xff]  ;;  %v1062_v11 = vld [vmem:[%s6630_s9 + $0x148] sm:$0xff] }
 0x550   :  { %866 = vmatpush.msra.mxu1 %v525_v13  ;;  %889 = vmatpush.msrb.mxu2 %v526_v16  ;;  %v1030_v12 = vld [vmem:[%s6630_s9 + $0x48] sm:$0xff]  ;;  %v1045_v16 = vld [vmem:[%s6630_s9 + $0xc0] sm:$0xff] }
 0x551   :  { %v1078_v13 = vld [vmem:[%s6630_s9 + $0x1c8] sm:$0xff] }
 0x555   :  { %3336 = vmatmul.msk.f32.vlgmr.msra.gmra.mxu3 %vm133_vm1, %v4343_v26  ;;  %3338 = vmatmul.msk.f32.vlgmr.msrb.gmra.mxu0 %vm133_vm1, %v4343_v26 }
 0x556   :  { %3340 = vmatmul.msk.f32.vlgmr.msrb.gmra.mxu1 %vm133_vm1, %v4343_v26  ;;  %3342 = vmatmul.msk.f32.vlgmr.msra.gmra.mxu2 %vm133_vm1, %v4343_v26 }
 0x557   :  { %909 = vmatpush.msra.mxu3 %v575_v17  ;;  %932 = vmatpush.msrb.mxu0 %v576_v19  ;;  %v1061_v17 = vld [vmem:[%s6630_s9 + $0x140] sm:$0xff] }
 0x558   :  { %955 = vmatpush.msrb.mxu1 %v577_v23  ;;  %978 = vmatpush.msra.mxu2 %v578_v24  ;;  %v1029_v19 = vld [vmem:[%s6630_s9 + $0x40] sm:$0xff]  ;;  %v1044_v24 = vld [vmem:[%s6630_s9 + $0xb8] sm:$0xff] }
 0x559   :  { %910 = vmatpush.msra.mxu3 %v559_v15  ;;  %933 = vmatpush.msrb.mxu0 %v560_v14  ;;  %v1077_v23 = vld [vmem:[%s6630_s9 + $0x1c0] sm:$0xff]  ;;  %v1060_v15 = vld [vmem:[%s6630_s9 + $0x138] sm:$0xff] }
 0x55a   :  { %956 = vmatpush.msrb.mxu1 %v561_v27  ;;  %979 = vmatpush.msra.mxu2 %v562_v30  ;;  %v1028_v14 = vld [vmem:[%s6630_s9 + $0x38] sm:$0xff]  ;;  %v1043_v30 = vld [vmem:[%s6630_s9 + $0xb0] sm:$0xff] }
 0x55b   :  { %911 = vmatpush.msra.mxu3 %v543_v18  ;;  %934 = vmatpush.msrb.mxu0 %v544_v33  ;;  %v1076_v27 = vld [vmem:[%s6630_s9 + $0x1b8] sm:$0xff]  ;;  %v1059_v18 = vld [vmem:[%s6630_s9 + $0x130] sm:$0xff] }
 0x55c   :  { %957 = vmatpush.msrb.mxu1 %v545_v20  ;;  %980 = vmatpush.msra.mxu2 %v546_v37  ;;  %v1027_v33 = vld [vmem:[%s6630_s9 + $0x30] sm:$0xff]  ;;  %v1042_v37 = vld [vmem:[%s6630_s9 + $0xa8] sm:$0xff] }
 0x55d   :  { %3337 = vmatmul.msk.f32.gmra.mxu3 %vm133_vm1, %v4390_v10  ;;  %3339 = vmatmul.msk.f32.gmra.mxu0 %vm133_vm1, %v4390_v10  ;;  %v1075_v20 = vld [vmem:[%s6630_s9 + $0x1b0] sm:$0xff] }
 0x55e   :  { %3341 = vmatmul.msk.f32.gmra.mxu1 %vm133_vm1, %v4390_v10  ;;  %3343 = vmatmul.msk.f32.gmra.mxu2 %vm133_vm1, %v4390_v10 }
 0x55f   :  { %912 = vmatpush.msra.mxu3 %v527_v38  ;;  %935 = vmatpush.msrb.mxu0 %v528_v39  ;;  %v1058_v38 = vld [vmem:[%s6630_s9 + $0x128] sm:$0xff] }
 0x560   :  { %958 = vmatpush.msrb.mxu1 %v529_v43  ;;  %981 = vmatpush.msra.mxu2 %v530_v44  ;;  %v1026_v39 = vld [vmem:[%s6630_s9 + $0x28] sm:$0xff]  ;;  %v1041_v44 = vld [vmem:[%s6630_s9 + $0xa0] sm:$0xff] }
 0x561   :  { %v1074_v43 = vld [vmem:[%s6630_s9 + $0x1a8] sm:$0xff] }
 0x565   :  { %3344 = vmatmul.msk.f32.vlgmr.msrb.gmra.mxu3 %vm133_vm1, %v4343_v26  ;;  %3346 = vmatmul.msk.f32.vlgmr.msra.gmra.mxu0 %vm133_vm1, %v4343_v26 }
 0x566   :  { %3348 = vmatmul.msk.f32.vlgmr.msra.gmra.mxu1 %vm133_vm1, %v4343_v26  ;;  %3350 = vmatmul.msk.f32.vlgmr.msrb.gmra.mxu2 %vm133_vm1, %v4343_v26 }
 0x567   :  { %1304 = vmatpush.msra.mxu0 %v1052_v45  ;;  %1327 = vmatpush.msra.mxu1 %v1068_v47  ;;  %v1057_v45 = vld [vmem:[%s6630_s9 + $0x120] sm:$0xff] }
 0x568   :  { %1281 = vmatpush.msrb.mxu3 %v1036_v48  ;;  %1350 = vmatpush.msrb.mxu2 %v1084_v50  ;;  %v1025_v47 = vld [vmem:[%s6630_s9 + $0x20] sm:$0xff]  ;;  %v1040_v50 = vld [vmem:[%s6630_s9 + $0x98] sm:$0xff] }
 0x569   :  { %1305 = vmatpush.msra.mxu0 %v1051_v51  ;;  %1328 = vmatpush.msra.mxu1 %v1067_v53  ;;  %v1073_v48 = vld [vmem:[%s6630_s9 + $0x1a0] sm:$0xff]  ;;  %v1056_v51 = vld [vmem:[%s6630_s9 + $0x118] sm:$0xff] }
 0x56a   :  { %1282 = vmatpush.msrb.mxu3 %v1035_v54  ;;  %1351 = vmatpush.msrb.mxu2 %v1083_v55  ;;  %v1024_v53 = vld [vmem:[%s6630_s9 + $0x18] sm:$0xff]  ;;  %v1039_v55 = vld [vmem:[%s6630_s9 + $0x90] sm:$0xff] }
 0x56b   :  { %1306 = vmatpush.msra.mxu0 %v1050_v56  ;;  %1329 = vmatpush.msra.mxu1 %v1066_v31  ;;  %v1072_v54 = vld [vmem:[%s6630_s9 + $0x198] sm:$0xff]  ;;  %v1055_v56 = vld [vmem:[%s6630_s9 + $0x110] sm:$0xff] }
 0x56c   :  { %1283 = vmatpush.msrb.mxu3 %v1034_v59  ;;  %1352 = vmatpush.msrb.mxu2 %v1082_v60  ;;  %v1023_v31 = vld [vmem:[%s6630_s9 + $0x10] sm:$0xff]  ;;  %v1038_v60 = vld [vmem:[%s6630_s9 + $0x88] sm:$0xff] }
 0x56d   :  { %3345 = vmatmul.msk.f32.gmra.mxu3 %vm133_vm1, %v4390_v10  ;;  %3347 = vmatmul.msk.f32.gmra.mxu0 %vm133_vm1, %v4390_v10  ;;  %v1071_v59 = vld [vmem:[%s6630_s9 + $0x190] sm:$0xff] }
 0x56e   :  { %3349 = vmatmul.msk.f32.gmra.mxu1 %vm133_vm1, %v4390_v10  ;;  %3351 = vmatmul.msk.f32.gmra.mxu2 %vm133_vm1, %v4390_v10 }
 0x56f   :  { %1307 = vmatpush.msra.mxu0 %v1049_v34  ;;  %1330 = vmatpush.msra.mxu1 %v1065_v61  ;;  %v1054_v34 = vld [vmem:[%s6630_s9 + $0x108] sm:$0xff] }
 0x570   :  { %1284 = vmatpush.msrb.mxu3 %v1033_v0  ;;  %1353 = vmatpush.msrb.mxu2 %v1081_v1  ;;  %v1022_v61 = vld [vmem:[%s6630_s9 + $0x8] sm:$0xff]  ;;  %v1037_v1 = vld [vmem:[%s6630_s9 + $0x80] sm:$0xff] }
 0x571   :  { %1308 = vmatpush.msra.mxu0 %v1048_v2  ;;  %1331 = vmatpush.msra.mxu1 %v1064_v3  ;;  %v1070_v0 = vld [vmem:[%s6630_s9 + $0x188] sm:$0xff]  ;;  %v1053_v2 = vld [vmem:[%s6630_s9 + $0x100] sm:$0xff]  ;;  %v1116_v3 = vld [vmem:[%s6630_s9 + $0x2f8] sm:$0xff] }
 0x572   :  { %1285 = vmatpush.msrb.mxu3 %v1032_v4  ;;  %1354 = vmatpush.msrb.mxu2 %v1080_v5  ;;  %v1132_v4 = vld [vmem:[%s6630_s9 + $0x378] sm:$0xff]  ;;  %v1021_v5 = vld [vmem:[%s6630_s9] sm:$0xff] }
 0x573   :  { %1309 = vmatpush.msra.mxu0 %v1047_v6  ;;  %1332 = vmatpush.msra.mxu1 %v1063_v42  ;;  %v1069_v6 = vld [vmem:[%s6630_s9 + $0x180] sm:$0xff]  ;;  %v1115_v42 = vld [vmem:[%s6630_s9 + $0x2f0] sm:$0xff] }
 0x574   :  { %1286 = vmatpush.msrb.mxu3 %v1031_v7  ;;  %1355 = vmatpush.msrb.mxu2 %v1079_v8  ;;  %v1131_v7 = vld [vmem:[%s6630_s9 + $0x370] sm:$0xff]  ;;  %v1100_v8 = vld [vmem:[%s6630_s9 + $0x278] sm:$0xff] }
 0x575   :  { %3352 = vmatmul.msk.f32.vlgmr.msra.gmra.mxu3 %vm133_vm1, %v4343_v26  ;;  %3354 = vmatmul.msk.f32.vlgmr.msrb.gmra.mxu0 %vm133_vm1, %v4343_v26 }
 0x576   :  { %3356 = vmatmul.msk.f32.vlgmr.msrb.gmra.mxu1 %vm133_vm1, %v4343_v26  ;;  %3358 = vmatmul.msk.f32.vlgmr.msra.gmra.mxu2 %vm133_vm1, %v4343_v26 }
 0x577   :  { %1310 = vmatpush.msra.mxu0 %v1046_v9  ;;  %1333 = vmatpush.msra.mxu1 %v1062_v11  ;;  %v1148_v9 = vld [vmem:[%s6630_s9 + $0x3f8] sm:$0xff]  ;;  %v1114_v11 = vld [vmem:[%s6630_s9 + $0x2e8] sm:$0xff] }
 0x578   :  { %1287 = vmatpush.msrb.mxu3 %v1030_v12  ;;  %1356 = vmatpush.msrb.mxu2 %v1078_v13  ;;  %v1130_v12 = vld [vmem:[%s6630_s9 + $0x368] sm:$0xff]  ;;  %v1099_v13 = vld [vmem:[%s6630_s9 + $0x270] sm:$0xff] }
 0x579   :  { %1311 = vmatpush.msra.mxu0 %v1045_v16  ;;  %1334 = vmatpush.msra.mxu1 %v1061_v17  ;;  %v1147_v16 = vld [vmem:[%s6630_s9 + $0x3f0] sm:$0xff]  ;;  %v1113_v17 = vld [vmem:[%s6630_s9 + $0x2e0] sm:$0xff] }
 0x57a   :  { %1288 = vmatpush.msrb.mxu3 %v1029_v19  ;;  %1357 = vmatpush.msrb.mxu2 %v1077_v23  ;;  %v1129_v19 = vld [vmem:[%s6630_s9 + $0x360] sm:$0xff]  ;;  %v1098_v23 = vld [vmem:[%s6630_s9 + $0x268] sm:$0xff] }
 0x57b   :  { %1312 = vmatpush.msra.mxu0 %v1044_v24  ;;  %1335 = vmatpush.msra.mxu1 %v1060_v15  ;;  %v1146_v24 = vld [vmem:[%s6630_s9 + $0x3e8] sm:$0xff]  ;;  %v1112_v15 = vld [vmem:[%s6630_s9 + $0x2d8] sm:$0xff] }
 0x57c   :  { %1289 = vmatpush.msrb.mxu3 %v1028_v14  ;;  %1358 = vmatpush.msrb.mxu2 %v1076_v27  ;;  %v1128_v14 = vld [vmem:[%s6630_s9 + $0x358] sm:$0xff]  ;;  %v1097_v27 = vld [vmem:[%s6630_s9 + $0x260] sm:$0xff] }
 0x57d   :  { %3353 = vmatmul.msk.f32.gmra.mxu3 %vm133_vm1, %v4390_v10  ;;  %3355 = vmatmul.msk.f32.gmra.mxu0 %vm133_vm1, %v4390_v10 }
 0x57e   :  { %3357 = vmatmul.msk.f32.gmra.mxu1 %vm133_vm1, %v4390_v10  ;;  %3359 = vmatmul.msk.f32.gmra.mxu2 %vm133_vm1, %v4390_v10 }
 0x57f   :  { %1313 = vmatpush.msra.mxu0 %v1043_v30  ;;  %1336 = vmatpush.msra.mxu1 %v1059_v18  ;;  %v1145_v30 = vld [vmem:[%s6630_s9 + $0x3e0] sm:$0xff]  ;;  %v1111_v18 = vld [vmem:[%s6630_s9 + $0x2d0] sm:$0xff] }
 0x580   :  { %1290 = vmatpush.msrb.mxu3 %v1027_v33  ;;  %1359 = vmatpush.msrb.mxu2 %v1075_v20  ;;  %v1127_v33 = vld [vmem:[%s6630_s9 + $0x350] sm:$0xff]  ;;  %v1096_v20 = vld [vmem:[%s6630_s9 + $0x258] sm:$0xff] }
 0x581   :  { %1314 = vmatpush.msra.mxu0 %v1042_v37  ;;  %1337 = vmatpush.msra.mxu1 %v1058_v38  ;;  %v1144_v37 = vld [vmem:[%s6630_s9 + $0x3d8] sm:$0xff]  ;;  %v1110_v38 = vld [vmem:[%s6630_s9 + $0x2c8] sm:$0xff] }
 0x582   :  { %1291 = vmatpush.msrb.mxu3 %v1026_v39  ;;  %1360 = vmatpush.msrb.mxu2 %v1074_v43  ;;  %v1126_v39 = vld [vmem:[%s6630_s9 + $0x348] sm:$0xff]  ;;  %v1095_v43 = vld [vmem:[%s6630_s9 + $0x250] sm:$0xff] }
 0x583   :  { %1315 = vmatpush.msra.mxu0 %v1041_v44  ;;  %1338 = vmatpush.msra.mxu1 %v1057_v45  ;;  %v1143_v44 = vld [vmem:[%s6630_s9 + $0x3d0] sm:$0xff]  ;;  %v1109_v45 = vld [vmem:[%s6630_s9 + $0x2c0] sm:$0xff] }
 0x584   :  { %1292 = vmatpush.msrb.mxu3 %v1025_v47  ;;  %1361 = vmatpush.msrb.mxu2 %v1073_v48  ;;  %v1125_v47 = vld [vmem:[%s6630_s9 + $0x340] sm:$0xff]  ;;  %v1094_v48 = vld [vmem:[%s6630_s9 + $0x248] sm:$0xff] }
 0x585   :  { %1316 = vmatpush.msra.mxu0 %v1040_v50  ;;  %1339 = vmatpush.msra.mxu1 %v1056_v51  ;;  %v1142_v50 = vld [vmem:[%s6630_s9 + $0x3c8] sm:$0xff]  ;;  %v1108_v51 = vld [vmem:[%s6630_s9 + $0x2b8] sm:$0xff] }
 0x586   :  { %1293 = vmatpush.msrb.mxu3 %v1024_v53  ;;  %1362 = vmatpush.msrb.mxu2 %v1072_v54  ;;  %v1124_v53 = vld [vmem:[%s6630_s9 + $0x338] sm:$0xff]  ;;  %v1093_v54 = vld [vmem:[%s6630_s9 + $0x240] sm:$0xff] }
 0x587   :  { %1317 = vmatpush.msra.mxu0 %v1039_v55  ;;  %1340 = vmatpush.msra.mxu1 %v1055_v56  ;;  %v1141_v55 = vld [vmem:[%s6630_s9 + $0x3c0] sm:$0xff]  ;;  %v1107_v56 = vld [vmem:[%s6630_s9 + $0x2b0] sm:$0xff] }
 0x588   :  { %1294 = vmatpush.msrb.mxu3 %v1023_v31  ;;  %1363 = vmatpush.msrb.mxu2 %v1071_v59  ;;  %v1123_v31 = vld [vmem:[%s6630_s9 + $0x330] sm:$0xff]  ;;  %v1092_v59 = vld [vmem:[%s6630_s9 + $0x238] sm:$0xff] }
 0x589   :  { %1318 = vmatpush.msra.mxu0 %v1038_v60  ;;  %1341 = vmatpush.msra.mxu1 %v1054_v34  ;;  %v1140_v60 = vld [vmem:[%s6630_s9 + $0x3b8] sm:$0xff]  ;;  %v1106_v34 = vld [vmem:[%s6630_s9 + $0x2a8] sm:$0xff] }
 0x58a   :  { %1295 = vmatpush.msrb.mxu3 %v1022_v61  ;;  %1364 = vmatpush.msrb.mxu2 %v1070_v0  ;;  %v1122_v61 = vld [vmem:[%s6630_s9 + $0x328] sm:$0xff]  ;;  %v1091_v0 = vld [vmem:[%s6630_s9 + $0x230] sm:$0xff] }
 0x58b   :  { %1319 = vmatpush.msra.mxu0 %v1037_v1  ;;  %1342 = vmatpush.msra.mxu1 %v1053_v2  ;;  %v1139_v1 = vld [vmem:[%s6630_s9 + $0x3b0] sm:$0xff]  ;;  %v1105_v2 = vld [vmem:[%s6630_s9 + $0x2a0] sm:$0xff] }
 0x58c   :  { %1296 = vmatpush.msrb.mxu3 %v1021_v5  ;;  %1365 = vmatpush.msrb.mxu2 %v1069_v6  ;;  %v1120_v5 = vld [vmem:[%s6630_s9 + $0x318] sm:$0xff]  ;;  %v1090_v6 = vld [vmem:[%s6630_s9 + $0x228] sm:$0xff] }
 0x58d   :  { %1396 = vmatpush.msrb.mxu0 %v1116_v3  ;;  %1419 = vmatpush.msrb.mxu1 %v1132_v4  ;;  %v1121_v3 = vld [vmem:[%s6630_s9 + $0x320] sm:$0xff]  ;;  %v1104_v4 = vld [vmem:[%s6630_s9 + $0x298] sm:$0xff] }
 0x58e   :  { %1373 = vmatpush.msra.mxu3 %v1100_v8  ;;  %1442 = vmatpush.msra.mxu2 %v1148_v9  ;;  %v1138_v8 = vld [vmem:[%s6630_s9 + $0x3a8] sm:$0xff]  ;;  %v1089_v9 = vld [vmem:[%s6630_s9 + $0x220] sm:$0xff] }
 0x58f   :  { %1397 = vmatpush.msrb.mxu0 %v1115_v42  ;;  %1420 = vmatpush.msrb.mxu1 %v1131_v7  ;;  %v1103_v42 = vld [vmem:[%s6630_s9 + $0x290] sm:$0xff] }
 0x590   :  { %1374 = vmatpush.msra.mxu3 %v1099_v13  ;;  %1443 = vmatpush.msra.mxu2 %v1147_v16  ;;  %v1119_v7 = vld [vmem:[%s6630_s9 + $0x310] sm:$0xff]  ;;  %v1137_v13 = vld [vmem:[%s6630_s9 + $0x3a0] sm:$0xff]  ;;  %v1088_v16 = vld [vmem:[%s6630_s9 + $0x218] sm:$0xff] }
 0x591   :  { %1398 = vmatpush.msrb.mxu0 %v1114_v11  ;;  %1421 = vmatpush.msrb.mxu1 %v1130_v12  ;;  %v1102_v11 = vld [vmem:[%s6630_s9 + $0x288] sm:$0xff] }
 0x592   :  { %1375 = vmatpush.msra.mxu3 %v1098_v23  ;;  %1444 = vmatpush.msra.mxu2 %v1146_v24  ;;  %v1118_v12 = vld [vmem:[%s6630_s9 + $0x308] sm:$0xff]  ;;  %v1136_v23 = vld [vmem:[%s6630_s9 + $0x398] sm:$0xff]  ;;  %v1087_v24 = vld [vmem:[%s6630_s9 + $0x210] sm:$0xff] }
 0x593   :  { %1399 = vmatpush.msrb.mxu0 %v1113_v17  ;;  %1422 = vmatpush.msrb.mxu1 %v1129_v19  ;;  %v1101_v17 = vld [vmem:[%s6630_s9 + $0x280] sm:$0xff] }
 0x594   :  { %1376 = vmatpush.msra.mxu3 %v1097_v27  ;;  %1445 = vmatpush.msra.mxu2 %v1145_v30  ;;  %v1117_v19 = vld [vmem:[%s6630_s9 + $0x300] sm:$0xff]  ;;  %v1134_v27 = vld [vmem:[%s6630_s9 + $0x388] sm:$0xff] }
 0x595   :  { %1400 = vmatpush.msrb.mxu0 %v1112_v15  ;;  %1423 = vmatpush.msrb.mxu1 %v1128_v14  ;;  %v1135_v15 = vld [vmem:[%s6630_s9 + $0x390] sm:$0xff]  ;;  %v1086_v14 = vld [vmem:[%s6630_s9 + $0x208] sm:$0xff]  ;;  %v1085_v30 = vld [vmem:[%s6630_s9 + $0x200] sm:$0xff] }
 0x596   :  { %1377 = vmatpush.msra.mxu3 %v1096_v20  ;;  %1446 = vmatpush.msra.mxu2 %v1144_v37 }
 0x597   :  { %1401 = vmatpush.msrb.mxu0 %v1111_v18  ;;  %1424 = vmatpush.msrb.mxu1 %v1127_v33  ;;  %v1133_v18 = vld [vmem:[%s6630_s9 + $0x380] sm:$0xff] }
 0x598   :  { %1378 = vmatpush.msra.mxu3 %v1095_v43  ;;  %1447 = vmatpush.msra.mxu2 %v1143_v44  ;;  %v4895_v33 = vld [vmem:[%s6629_s8] sm:$0xff] }
 0x599   :  { %1402 = vmatpush.msrb.mxu0 %v1110_v38  ;;  %1425 = vmatpush.msrb.mxu1 %v1126_v39  ;;  %v584_v20 = vperm.slane %v4895_v33, 1  ;;  %v585_v37 = vperm.slane %v4895_v33, 2 }
 0x59a   :  { %1379 = vmatpush.msra.mxu3 %v1094_v48  ;;  %1448 = vmatpush.msra.mxu2 %v1142_v50  ;;  %v583_v48 = vperm.slane %v4895_v33, 0 }
 0x59b   :  { %1403 = vmatpush.msrb.mxu0 %v1109_v45  ;;  %1426 = vmatpush.msrb.mxu1 %v1125_v47  ;;  %v1180_v47 = vld [vmem:[%s6630_s9 + $0x4f8] sm:$0xff] }
 0x59c   :  { %1380 = vmatpush.msra.mxu3 %v1093_v54  ;;  %1449 = vmatpush.msra.mxu2 %v1141_v55  ;;  %v1179_v54 = vld [vmem:[%s6630_s9 + $0x4f0] sm:$0xff] }
 0x59d   :  { %1404 = vmatpush.msrb.mxu0 %v1108_v51  ;;  %1427 = vmatpush.msrb.mxu1 %v1124_v53  ;;  %v1196_v51 = vld [vmem:[%s6630_s9 + $0x578] sm:$0xff]  ;;  %v586_v53 = vperm.slane %v4895_v33, 3 }
 0x59e   :  { %1381 = vmatpush.msra.mxu3 %v1092_v59  ;;  %1450 = vmatpush.msra.mxu2 %v1140_v60  ;;  %v1178_v60 = vld [vmem:[%s6630_s9 + $0x4e8] sm:$0xff] }
 0x59f   :  { %1405 = vmatpush.msrb.mxu0 %v1107_v56  ;;  %1428 = vmatpush.msrb.mxu1 %v1123_v31  ;;  %v1195_v56 = vld [vmem:[%s6630_s9 + $0x570] sm:$0xff] }
 0x5a0   :  { %1382 = vmatpush.msra.mxu3 %v1091_v0  ;;  %1451 = vmatpush.msra.mxu2 %v1139_v1  ;;  %v1194_v0 = vld [vmem:[%s6630_s9 + $0x568] sm:$0xff] }
 0x5a1   :  { %1406 = vmatpush.msrb.mxu0 %v1106_v34  ;;  %1429 = vmatpush.msrb.mxu1 %v1122_v61 }
 0x5a2   :  { %1383 = vmatpush.msra.mxu3 %v1090_v6  ;;  %1452 = vmatpush.msra.mxu2 %v1138_v8  ;;  %v1212_v8 = vld [vmem:[%s6630_s9 + $0x5f8] sm:$0xff] }
 0x5a3   :  { %1407 = vmatpush.msrb.mxu0 %v1105_v2  ;;  %1430 = vmatpush.msrb.mxu1 %v1121_v3 }
 0x5a4   :  { %1384 = vmatpush.msra.mxu3 %v1089_v9  ;;  %1453 = vmatpush.msra.mxu2 %v1137_v13  ;;  %v1176_v13 = vld [vmem:[%s6630_s9 + $0x4d8] sm:$0xff] }
 0x5a5   :  { %1408 = vmatpush.msrb.mxu0 %v1104_v4  ;;  %1431 = vmatpush.msrb.mxu1 %v1120_v5  ;;  %v1164_v4 = vld [vmem:[%s6630_s9 + $0x478] sm:$0xff] }
 0x5a6   :  { %1385 = vmatpush.msra.mxu3 %v1088_v16  ;;  %1454 = vmatpush.msra.mxu2 %v1136_v23  ;;  %v1192_v16 = vld [vmem:[%s6630_s9 + $0x558] sm:$0xff] }
 0x5a7   :  { %1409 = vmatpush.msrb.mxu0 %v1103_v42  ;;  %1432 = vmatpush.msrb.mxu1 %v1119_v7  ;;  %v1177_v42 = vld [vmem:[%s6630_s9 + $0x4e0] sm:$0xff] }
 0x5a8   :  { %1386 = vmatpush.msra.mxu3 %v1087_v24  ;;  %1455 = vmatpush.msra.mxu2 %v1135_v15  ;;  %v1193_v7 = vld [vmem:[%s6630_s9 + $0x560] sm:$0xff]  ;;  %v1162_v24 = vld [vmem:[%s6630_s9 + $0x468] sm:$0xff]  ;;  %v589_v15 = vperm.slane %v4895_v33, 6 }
 0x5a9   :  { %1410 = vmatpush.msrb.mxu0 %v1102_v11  ;;  %1433 = vmatpush.msrb.mxu1 %v1118_v12  ;;  %v1163_v12 = vld [vmem:[%s6630_s9 + $0x470] sm:$0xff] }
 0x5aa   :  { %1387 = vmatpush.msra.mxu3 %v1086_v14  ;;  %1456 = vmatpush.msra.mxu2 %v1134_v27 }
 0x5ab   :  { %1411 = vmatpush.msrb.mxu0 %v1101_v17  ;;  %1434 = vmatpush.msrb.mxu1 %v1117_v19  ;;  %v588_v17 = vperm.slane %v4895_v33, 5  ;;  %v1211_v19 = vld [vmem:[%s6630_s9 + $0x5f0] sm:$0xff] }
 0x5ac   :  { %1388 = vmatpush.msra.mxu3 %v1085_v30  ;;  %1457 = vmatpush.msra.mxu2 %v1133_v18  ;;  %v1175_v30 = vld [vmem:[%s6630_s9 + $0x4d0] sm:$0xff] }
 0x5ad   :  { %v1191_v18 = vld [vmem:[%s6630_s9 + $0x550] sm:$0xff] }
 0x5c2   :  { %v661_v38 = vpop.f32.mrf.mxu0 }
 0x5c3   :  { %v662_v39 = vadd.f32 %v661_v38, %v584_v20  ;;  %v684_v43 = vpop.f32.mrf.mxu1 }
 0x5c4   :  { %v685_v44 = vadd.f32 %v684_v43, %v585_v37 }
 0x5c5   :  { %v990_v45 = vmax.f32 %v662_v39, 0.0  ;;  %v1161_v39 = vld [vmem:[%s6630_s9 + $0x460] sm:$0xff] }
 0x5c6   :  { %v991_v50 = vmax.f32 %v685_v44, 0.0 }
 0x5c7   :  { %1320 = vmatmul.f32.vlgmr.msra.gmra.mxu0 %v990_v45  ;;  %v1174_v45 = vld [vmem:[%s6630_s9 + $0x4c8] sm:$0xff] }
 0x5c8   :  { %1343 = vmatmul.f32.vlgmr.msra.gmra.mxu1 %v991_v50  ;;  %1488 = vmatpush.msra.mxu0 %v1180_v47  ;;  %v638_v55 = vpop.f32.mrf.mxu3  ;;  %v1190_v47 = vld [vmem:[%s6630_s9 + $0x548] sm:$0xff] }
 0x5c9   :  { %1511 = vmatpush.msra.mxu1 %v1196_v51  ;;  %v639_v31 = vadd.f32 %v638_v55, %v583_v48  ;;  %v707_v59 = vpop.f32.mrf.mxu2  ;;  %v1209_v51 = vld [vmem:[%s6630_s9 + $0x5e0] sm:$0xff]  ;;  %v587_v55 = vperm.slane %v4895_v33, 4 }
 0x5ca   :  { %v708_v34 = vadd.f32 %v707_v59, %v586_v53  ;;  %1489 = vmatpush.msra.mxu0 %v1179_v54  ;;  %v664_v61 = vpop.f32.mrf.mxu0  ;;  %v1160_v54 = vld [vmem:[%s6630_s9 + $0x458] sm:$0xff]  ;;  %v1189_v59 = vld [vmem:[%s6630_s9 + $0x540] sm:$0xff] }
 0x5cb   :  { %v989_v1 = vmax.f32 %v639_v31, 0.0  ;;  %1512 = vmatpush.msra.mxu1 %v1195_v56  ;;  %v665_v2 = vadd.f32 %v664_v61, %v584_v20  ;;  %v687_v3 = vpop.f32.mrf.mxu1  ;;  %v1173_v31 = vld [vmem:[%s6630_s9 + $0x4c0] sm:$0xff]  ;;  %v1208_v61 = vld [vmem:[%s6630_s9 + $0x5d8] sm:$0xff] }
 0x5cc   :  { %v992_v5 = vmax.f32 %v708_v34, 0.0  ;;  %v688_v6 = vadd.f32 %v687_v3, %v585_v37  ;;  %1490 = vmatpush.msra.mxu0 %v1178_v60  ;;  %v1210_v37 = vld [vmem:[%s6630_s9 + $0x5e8] sm:$0xff]  ;;  %v590_v60 = vperm.slane %v4895_v33, 7  ;;  %v1188_v3 = vld [vmem:[%s6630_s9 + $0x538] sm:$0xff] }
 0x5cd   :  { %1513 = vmatpush.msra.mxu1 %v1194_v0  ;;  %1297 = vmatmul.f32.vlgmr.msrb.gmra.mxu3 %v989_v1  ;;  %v1006_v9 = vmax.f32 %v665_v2, 0.0  ;;  %v1159_v0 = vld [vmem:[%s6630_s9 + $0x450] sm:$0xff]  ;;  %v1172_v2 = vld [vmem:[%s6630_s9 + $0x4b8] sm:$0xff] }
 0x5ce   :  { %1366 = vmatmul.f32.vlgmr.msrb.gmra.mxu2 %v992_v5  ;;  %1465 = vmatpush.msrb.mxu3 %v1164_v4  ;;  %v1007_v11 = vmax.f32 %v688_v6, 0.0  ;;  %v1207_v6 = vld [vmem:[%s6630_s9 + $0x5d0] sm:$0xff] }
 0x5cf   :  { %1491 = vmatpush.msra.mxu0 %v1177_v42  ;;  %1514 = vmatpush.msra.mxu1 %v1193_v7  ;;  %v1158_v7 = vld [vmem:[%s6630_s9 + $0x448] sm:$0xff] }
 0x5d0   :  { %1534 = vmatpush.msrb.mxu2 %v1212_v8  ;;  %1323 = vmatmul.f32.gmra.mxu0 %v1006_v9  ;;  %v641_v23 = vpop.f32.mrf.mxu3  ;;  %v1171_v9 = vld [vmem:[%s6630_s9 + $0x4b0] sm:$0xff] }
 0x5d1   :  { %1346 = vmatmul.f32.gmra.mxu1 %v1007_v11  ;;  %1466 = vmatpush.msrb.mxu3 %v1163_v12  ;;  %v642_v14 = vadd.f32 %v641_v23, %v583_v48  ;;  %v710_v27 = vpop.f32.mrf.mxu2  ;;  %v1187_v11 = vld [vmem:[%s6630_s9 + $0x530] sm:$0xff] }
 0x5d2   :  { %1492 = vmatpush.msra.mxu0 %v1176_v13  ;;  %1515 = vmatpush.msra.mxu1 %v1192_v16  ;;  %v711_v20 = vadd.f32 %v710_v27, %v586_v53  ;;  %v753_v38 = vpop.f32.mrf.mxu0  ;;  %v1206_v13 = vld [vmem:[%s6630_s9 + $0x5c8] sm:$0xff] }
 0x5d3   :  { %1535 = vmatpush.msrb.mxu2 %v1211_v19  ;;  %1467 = vmatpush.msrb.mxu3 %v1162_v24  ;;  %v754_v43 = vadd.f32 %v753_v38, %v588_v17  ;;  %v776_v44 = vpop.f32.mrf.mxu1  ;;  %v1005_v48 = vmax.f32 %v642_v14, 0.0  ;;  %v1157_v19 = vld [vmem:[%s6630_s9 + $0x440] sm:$0xff]  ;;  %v1170_v14 = vld [vmem:[%s6630_s9 + $0x4a8] sm:$0xff] }
 0x5d4   :  { %1493 = vmatpush.msra.mxu0 %v1175_v30  ;;  %1516 = vmatpush.msra.mxu1 %v1191_v18  ;;  %v777_v50 = vadd.f32 %v776_v44, %v589_v15  ;;  %v1008_v53 = vmax.f32 %v711_v20, 0.0  ;;  %v1186_v27 = vld [vmem:[%s6630_s9 + $0x528] sm:$0xff]  ;;  %v1169_v18 = vld [vmem:[%s6630_s9 + $0x4a0] sm:$0xff] }
 0x5d5   :  { %1536 = vmatpush.msrb.mxu2 %v1210_v37  ;;  %1468 = vmatpush.msrb.mxu3 %v1161_v39  ;;  %v994_v56 = vmax.f32 %v754_v43, 0.0  ;;  %v1185_v20 = vld [vmem:[%s6630_s9 + $0x520] sm:$0xff]  ;;  %v1204_v39 = vld [vmem:[%s6630_s9 + $0x5b8] sm:$0xff] }
 0x5d6   :  { %1494 = vmatpush.msra.mxu0 %v1174_v45  ;;  %1517 = vmatpush.msra.mxu1 %v1190_v47  ;;  %v995_v34 = vmax.f32 %v777_v50, 0.0  ;;  %v5046_v45 = vld [vmem:[%s6629_s8 + $0x8] sm:$0xff]  ;;  %v1155_v47 = vld [vmem:[%s6630_s9 + $0x430] sm:$0xff]  ;;  %v1184_v50 = vld [vmem:[%s6630_s9 + $0x518] sm:$0xff] }
 0x5d7   :  { %1537 = vmatpush.msrb.mxu2 %v1209_v51  ;;  %1300 = vmatmul.f32.gmra.mxu3 %v1005_v48  ;;  %v1168_v48 = vld [vmem:[%s6630_s9 + $0x498] sm:$0xff] }
 0x5d8   :  { %1369 = vmatmul.f32.gmra.mxu2 %v1008_v53  ;;  %1469 = vmatpush.msrb.mxu3 %v1160_v54  ;;  %v730_v1 = vpop.f32.mrf.mxu3  ;;  %v1203_v53 = vld [vmem:[%s6630_s9 + $0x5b0] sm:$0xff] }
 0x5d9   :  { %1495 = vmatpush.msra.mxu0 %v1173_v31  ;;  %1518 = vmatpush.msra.mxu1 %v1189_v59  ;;  %v731_v4 = vadd.f32 %v730_v1, %v587_v55  ;;  %v799_v5 = vpop.f32.mrf.mxu2  ;;  %v592_v31 = vperm.slane %v5046_v45, 1  ;;  %v593_v59 = vperm.slane %v5046_v45, 2  ;;  %v1166_v1 = vld [vmem:[%s6630_s9 + $0x488] sm:$0xff] }
 0x5da   :  { %1538 = vmatpush.msrb.mxu2 %v1208_v61  ;;  %1412 = vmatmul.f32.vlgmr.msrb.gmra.mxu0 %v994_v56  ;;  %v800_v42 = vadd.f32 %v799_v5, %v590_v60  ;;  %v756_v8 = vpop.f32.mrf.mxu0  ;;  %v1154_v56 = vld [vmem:[%s6630_s9 + $0x428] sm:$0xff] }
 0x5db   :  { %1435 = vmatmul.f32.vlgmr.msrb.gmra.mxu1 %v995_v34  ;;  %1470 = vmatpush.msrb.mxu3 %v1159_v0  ;;  %v779_v12 = vpop.f32.mrf.mxu1  ;;  %v757_v16 = vadd.f32 %v756_v8, %v588_v17  ;;  %v993_v23 = vmax.f32 %v731_v4, 0.0  ;;  %v1205_v17 = vld [vmem:[%s6630_s9 + $0x5c0] sm:$0xff]  ;;  %v1183_v34 = vld [vmem:[%s6630_s9 + $0x510] sm:$0xff]  ;;  %v1202_v61 = vld [vmem:[%s6630_s9 + $0x5a8] sm:$0xff] }
 0x5dc   :  { %1496 = vmatpush.msra.mxu0 %v1172_v2  ;;  %1519 = vmatpush.msra.mxu1 %v1188_v3  ;;  %v780_v24 = vadd.f32 %v779_v12, %v589_v15  ;;  %v996_v30 = vmax.f32 %v800_v42, 0.0  ;;  %v1156_v15 = vld [vmem:[%s6630_s9 + $0x438] sm:$0xff]  ;;  %v1153_v0 = vld [vmem:[%s6630_s9 + $0x420] sm:$0xff]  ;;  %v1182_v2 = vld [vmem:[%s6630_s9 + $0x508] sm:$0xff] }
 0x5dd   :  { %1539 = vmatpush.msrb.mxu2 %v1207_v6  ;;  %1471 = vmatpush.msrb.mxu3 %v1158_v7  ;;  %v1010_v37 = vmax.f32 %v757_v16, 0.0  ;;  %v1201_v6 = vld [vmem:[%s6630_s9 + $0x5a0] sm:$0xff]  ;;  %v1152_v7 = vld [vmem:[%s6630_s9 + $0x418] sm:$0xff] }
 0x5de   :  { %1497 = vmatpush.msra.mxu0 %v1171_v9  ;;  %1520 = vmatpush.msra.mxu1 %v1187_v11  ;;  %v1011_v43 = vmax.f32 %v780_v24, 0.0  ;;  %v1165_v8 = vld [vmem:[%s6630_s9 + $0x480] sm:$0xff]  ;;  %v1200_v11 = vld [vmem:[%s6630_s9 + $0x598] sm:$0xff]  ;;  %v1151_v24 = vld [vmem:[%s6630_s9 + $0x410] sm:$0xff] }
 0x5df   :  { %1540 = vmatpush.msrb.mxu2 %v1206_v13  ;;  %1472 = vmatpush.msrb.mxu3 %v1157_v19  ;;  %v1181_v9 = vld [vmem:[%s6630_s9 + $0x500] sm:$0xff]  ;;  %v1244_v12 = vld [vmem:[%s6630_s9 + $0x6f8] sm:$0xff]  ;;  %v591_v13 = vperm.slane %v5046_v45, 0 }
 0x5e0   :  { %1498 = vmatpush.msra.mxu0 %v1170_v14  ;;  %1521 = vmatpush.msra.mxu1 %v1186_v27  ;;  %v733_v38 = vpop.f32.mrf.mxu3  ;;  %v594_v27 = vperm.slane %v5046_v45, 3 }
 0x5e1   :  { %1541 = vmatpush.msrb.mxu2 %v1205_v17  ;;  %1389 = vmatmul.f32.vlgmr.msra.gmra.mxu3 %v993_v23  ;;  %v802_v44 = vpop.f32.mrf.mxu2  ;;  %v734_v51 = vadd.f32 %v733_v38, %v587_v55  ;;  %v1167_v55 = vld [vmem:[%s6630_s9 + $0x490] sm:$0xff]  ;;  %v1260_v23 = vld [vmem:[%s6630_s9 + $0x778] sm:$0xff] }
 0x5e2   :  { %1458 = vmatmul.f32.vlgmr.msra.gmra.mxu2 %v996_v30  ;;  %1473 = vmatpush.msrb.mxu3 %v1156_v15  ;;  %v803_v54 = vadd.f32 %v802_v44, %v590_v60  ;;  %v845_v33 = vpop.f32.mrf.mxu0  ;;  %v1199_v17 = vld [vmem:[%s6630_s9 + $0x590] sm:$0xff] }
 0x5e3   :  { %1499 = vmatpush.msra.mxu0 %v1169_v18  ;;  %1522 = vmatpush.msra.mxu1 %v1185_v20  ;;  %v868_v60 = vpop.f32.mrf.mxu1  ;;  %v1009_v3 = vmax.f32 %v734_v51, 0.0  ;;  %v846_v4 = vadd.f32 %v845_v33, %v592_v31  ;;  %v1243_v15 = vld [vmem:[%s6630_s9 + $0x6f0] sm:$0xff] }
 0x5e4   :  { %1542 = vmatpush.msrb.mxu2 %v1204_v39  ;;  %1415 = vmatmul.f32.gmra.mxu0 %v1010_v37  ;;  %v869_v5 = vadd.f32 %v868_v60, %v593_v59  ;;  %v1012_v42 = vmax.f32 %v803_v54, 0.0  ;;  %v1259_v20 = vld [vmem:[%s6630_s9 + $0x770] sm:$0xff]  ;;  %v1150_v37 = vld [vmem:[%s6630_s9 + $0x408] sm:$0xff]  ;;  %v1228_v54 = vld [vmem:[%s6630_s9 + $0x678] sm:$0xff] }
 0x5e5   :  { %1438 = vmatmul.f32.gmra.mxu1 %v1011_v43  ;;  %1474 = vmatpush.msrb.mxu3 %v1155_v47  ;;  %v998_v16 = vmax.f32 %v846_v4, 0.0  ;;  %v1198_v43 = vld [vmem:[%s6630_s9 + $0x588] sm:$0xff]  ;;  %v1276_v60 = vld [vmem:[%s6630_s9 + $0x7f8] sm:$0xff] }
 0x5e6   :  { %1500 = vmatpush.msra.mxu0 %v1168_v48  ;;  %1523 = vmatpush.msra.mxu1 %v1184_v50  ;;  %v999_v19 = vmax.f32 %v869_v5, 0.0  ;;  %v1242_v47 = vld [vmem:[%s6630_s9 + $0x6e8] sm:$0xff]  ;;  %v1149_v50 = vld [vmem:[%s6630_s9 + $0x400] sm:$0xff] }
 0x5e7   :  { %1543 = vmatpush.msrb.mxu2 %v1203_v53  ;;  %1475 = vmatpush.msrb.mxu3 %v1154_v56  ;;  %v1258_v48 = vld [vmem:[%s6630_s9 + $0x768] sm:$0xff]  ;;  %v1197_v53 = vld [vmem:[%s6630_s9 + $0x580] sm:$0xff] }
 0x5e8   :  { %1501 = vmatpush.msra.mxu0 %v1167_v55  ;;  %1524 = vmatpush.msra.mxu1 %v1183_v34  ;;  %v822_v14 = vpop.f32.mrf.mxu3  ;;  %v1241_v34 = vld [vmem:[%s6630_s9 + $0x6e0] sm:$0xff] }
 0x5e9   :  { %1544 = vmatpush.msrb.mxu2 %v1202_v61  ;;  %1476 = vmatpush.msrb.mxu3 %v1153_v0  ;;  %v891_v30 = vpop.f32.mrf.mxu2  ;;  %v823_v18 = vadd.f32 %v822_v14, %v591_v13  ;;  %v1240_v61 = vld [vmem:[%s6630_s9 + $0x6d8] sm:$0xff]  ;;  %v1253_v14 = vld [vmem:[%s6630_s9 + $0x740] sm:$0xff] }
 0x5ea   :  { %1502 = vmatpush.msra.mxu0 %v1166_v1  ;;  %1525 = vmatpush.msra.mxu1 %v1182_v2  ;;  %v848_v38 = vpop.f32.mrf.mxu0  ;;  %v892_v39 = vadd.f32 %v891_v30, %v594_v27  ;;  %v1256_v0 = vld [vmem:[%s6630_s9 + $0x758] sm:$0xff] }
 0x5eb   :  { %1545 = vmatpush.msrb.mxu2 %v1201_v6  ;;  %1392 = vmatmul.f32.gmra.mxu3 %v1009_v3  ;;  %v871_v44 = vpop.f32.mrf.mxu1  ;;  %v849_v51 = vadd.f32 %v848_v38, %v592_v31  ;;  %v997_v56 = vmax.f32 %v823_v18, 0.0  ;;  %v1257_v31 = vld [vmem:[%s6630_s9 + $0x760] sm:$0xff]  ;;  %v1275_v3 = vld [vmem:[%s6630_s9 + $0x7f0] sm:$0xff]  ;;  %v1226_v6 = vld [vmem:[%s6630_s9 + $0x668] sm:$0xff] }
 0x5ec   :  { %1461 = vmatmul.f32.gmra.mxu2 %v1012_v42  ;;  %1477 = vmatpush.msrb.mxu3 %v1152_v7  ;;  %v872_v55 = vadd.f32 %v871_v44, %v593_v59  ;;  %v1000_v33 = vmax.f32 %v892_v39, 0.0  ;;  %v1227_v59 = vld [vmem:[%s6630_s9 + $0x670] sm:$0xff]  ;;  %v1272_v30 = vld [vmem:[%s6630_s9 + $0x7d8] sm:$0xff]  ;;  %v1222_v38 = vld [vmem:[%s6630_s9 + $0x648] sm:$0xff] }
 0x5ed   :  { %1503 = vmatpush.msra.mxu0 %v1165_v8  ;;  %1526 = vmatpush.msra.mxu1 %v1181_v9  ;;  %v1014_v1 = vmax.f32 %v849_v51, 0.0  ;;  %v1239_v7 = vld [vmem:[%s6630_s9 + $0x6d0] sm:$0xff]  ;;  %v1236_v18 = vld [vmem:[%s6630_s9 + $0x6b8] sm:$0xff]  ;;  %v1270_v44 = vld [vmem:[%s6630_s9 + $0x7c8] sm:$0xff] }
 0x5ee   :  { %1546 = vmatpush.msrb.mxu2 %v1200_v11  ;;  %1478 = vmatpush.msrb.mxu3 %v1151_v24  ;;  %v1015_v4 = vmax.f32 %v872_v55, 0.0  ;;  %v1255_v8 = vld [vmem:[%s6630_s9 + $0x750] sm:$0xff]  ;;  %v1274_v11 = vld [vmem:[%s6630_s9 + $0x7e8] sm:$0xff]  ;;  %v1237_v24 = vld [vmem:[%s6630_s9 + $0x6c0] sm:$0xff] }
 0x5ef   :  { %1580 = vmatpush.msrb.mxu0 %v1244_v12  ;;  %1603 = vmatpush.msrb.mxu1 %v1260_v23  ;;  %v1225_v12 = vld [vmem:[%s6630_s9 + $0x660] sm:$0xff]  ;;  %v1224_v23 = vld [vmem:[%s6630_s9 + $0x658] sm:$0xff]  ;;  %v1235_v39 = vld [vmem:[%s6630_s9 + $0x6b0] sm:$0xff] }
 0x5f0   :  { %1504 = vmatmul.f32.vlgmr.msra.gmra.mxu0 %v998_v16  ;;  %1527 = vmatmul.f32.vlgmr.msra.gmra.mxu1 %v999_v19  ;;  %v825_v2 = vpop.f32.mrf.mxu3  ;;  %v1254_v16 = vld [vmem:[%s6630_s9 + $0x748] sm:$0xff]  ;;  %v1273_v19 = vld [vmem:[%s6630_s9 + $0x7e0] sm:$0xff] }
 0x5f1   :  { %1547 = vmatpush.msrb.mxu2 %v1199_v17  ;;  %1581 = vmatpush.msrb.mxu0 %v1243_v15  ;;  %v894_v5 = vpop.f32.mrf.mxu2  ;;  %v826_v42 = vadd.f32 %v825_v2, %v591_v13  ;;  %v1238_v13 = vld [vmem:[%s6630_s9 + $0x6c8] sm:$0xff]  ;;  %v1223_v15 = vld [vmem:[%s6630_s9 + $0x650] sm:$0xff]  ;;  %v1269_v51 = vld [vmem:[%s6630_s9 + $0x7c0] sm:$0xff] }
 0x5f2   :  { %1604 = vmatpush.msrb.mxu1 %v1259_v20  ;;  %1479 = vmatpush.msrb.mxu3 %v1150_v37  ;;  %v895_v9 = vadd.f32 %v894_v5, %v594_v27  ;;  %v1252_v20 = vld [vmem:[%s6630_s9 + $0x738] sm:$0xff]  ;;  %v1271_v37 = vld [vmem:[%s6630_s9 + $0x7d0] sm:$0xff]  ;;  %v937_v55 = vpop.f32.mrf.mxu0  ;;  %v1218_v2 = vld [vmem:[%s6630_s9 + $0x628] sm:$0xff] }
 0x5f3   :  { %1548 = vmatpush.msrb.mxu2 %v1198_v43  ;;  %1582 = vmatpush.msrb.mxu0 %v1242_v47  ;;  %v1013_v27 = vmax.f32 %v826_v42, 0.0  ;;  %v1251_v43 = vld [vmem:[%s6630_s9 + $0x730] sm:$0xff]  ;;  %v1221_v47 = vld [vmem:[%s6630_s9 + $0x640] sm:$0xff]  ;;  %v1266_v5 = vld [vmem:[%s6630_s9 + $0x7a8] sm:$0xff] }
 0x5f4   :  { %1605 = vmatpush.msrb.mxu1 %v1258_v48  ;;  %1480 = vmatpush.msrb.mxu3 %v1149_v50  ;;  %v1016_v17 = vmax.f32 %v895_v9, 0.0  ;;  %v1234_v48 = vld [vmem:[%s6630_s9 + $0x6a8] sm:$0xff] }
 0x5f5   :  { %1549 = vmatpush.msrb.mxu2 %v1197_v53  ;;  %1583 = vmatpush.msrb.mxu0 %v1241_v34  ;;  %v1250_v50 = vld [vmem:[%s6630_s9 + $0x728] sm:$0xff]  ;;  %v1220_v53 = vld [vmem:[%s6630_s9 + $0x638] sm:$0xff] }
 0x5f6   :  { %1557 = vmatpush.msra.mxu3 %v1228_v54  ;;  %1606 = vmatpush.msrb.mxu1 %v1257_v31  ;;  %v1233_v54 = vld [vmem:[%s6630_s9 + $0x6a0] sm:$0xff]  ;;  %v1268_v34 = vld [vmem:[%s6630_s9 + $0x7b8] sm:$0xff]  ;;  %v1219_v31 = vld [vmem:[%s6630_s9 + $0x630] sm:$0xff] }
 0x5f7   :  { %1626 = vmatpush.msra.mxu2 %v1276_v60  ;;  %1481 = vmatmul.f32.vlgmr.msrb.gmra.mxu3 %v997_v56  ;;  %v1249_v56 = vld [vmem:[%s6630_s9 + $0x720] sm:$0xff]  ;;  %v960_v60 = vpop.f32.mrf.mxu1 }
 0x5f8   :  { %1550 = vmatmul.f32.vlgmr.msrb.gmra.mxu2 %v1000_v33  ;;  %1558 = vmatpush.msra.mxu3 %v1227_v59  ;;  %v596_v33 = vperm.slane %v5046_v45, 5  ;;  %v1232_v59 = vld [vmem:[%s6630_s9 + $0x698] sm:$0xff] }
 0x5f9   :  { %1584 = vmatpush.msrb.mxu0 %v1240_v61  ;;  %1607 = vmatpush.msrb.mxu1 %v1256_v0  ;;  %v1248_v61 = vld [vmem:[%s6630_s9 + $0x718] sm:$0xff]  ;;  %v597_v0 = vperm.slane %v5046_v45, 6 }
 0x5fa   :  { %1627 = vmatpush.msra.mxu2 %v1275_v3  ;;  %1507 = vmatmul.f32.gmra.mxu0 %v1014_v1  ;;  %v1267_v1 = vld [vmem:[%s6630_s9 + $0x7b0] sm:$0xff]  ;;  %v938_v42 = vadd.f32 %v937_v55, %v596_v33 }
 0x5fb   :  { %1530 = vmatmul.f32.gmra.mxu1 %v1015_v4  ;;  %1559 = vmatpush.msra.mxu3 %v1226_v6  ;;  %v1231_v3 = vld [vmem:[%s6630_s9 + $0x690] sm:$0xff]  ;;  %v1217_v6 = vld [vmem:[%s6630_s9 + $0x620] sm:$0xff]  ;;  %v961_v9 = vadd.f32 %v960_v60, %v597_v0  ;;  %v3846_v60 = vld [vmem:[%s6638_s17 + $0x28] sm:$0xff] }
 0x5fc   :  { %1585 = vmatpush.msrb.mxu0 %v1239_v7  ;;  %1608 = vmatpush.msrb.mxu1 %v1255_v8  ;;  %v1247_v4 = vld [vmem:[%s6630_s9 + $0x710] sm:$0xff]  ;;  %v1230_v7 = vld [vmem:[%s6630_s9 + $0x688] sm:$0xff] }
 0x5fd   :  { %1628 = vmatpush.msra.mxu2 %v1274_v11  ;;  %1560 = vmatpush.msra.mxu3 %v1225_v12  ;;  %v1246_v8 = vld [vmem:[%s6630_s9 + $0x708] sm:$0xff]  ;;  %v914_v11 = vpop.f32.mrf.mxu3  ;;  %v1265_v12 = vld [vmem:[%s6630_s9 + $0x7a0] sm:$0xff] }
 0x5fe   :  { %1586 = vmatpush.msrb.mxu0 %v1238_v13  ;;  %1609 = vmatpush.msrb.mxu1 %v1254_v16  ;;  %v1216_v13 = vld [vmem:[%s6630_s9 + $0x618] sm:$0xff]  ;;  %v595_v16 = vperm.slane %v5046_v45, 4 }
 0x5ff   :  { %1629 = vmatpush.msra.mxu2 %v1273_v19  ;;  %1561 = vmatpush.msra.mxu3 %v1224_v23  ;;  %v983_v19 = vpop.f32.mrf.mxu2  ;;  %v1229_v23 = vld [vmem:[%s6630_s9 + $0x680] sm:$0xff] }
 0x600   :  { %1587 = vmatpush.msrb.mxu0 %v1237_v24  ;;  %1610 = vmatpush.msrb.mxu1 %v1253_v14  ;;  %v1245_v24 = vld [vmem:[%s6630_s9 + $0x700] sm:$0xff]  ;;  %v598_v14 = vperm.slane %v5046_v45, 7  ;;  %v1263_v45 = vld [vmem:[%s6630_s9 + $0x790] sm:$0xff] }
 0x601   :  { %1630 = vmatpush.msra.mxu2 %v1272_v30  ;;  %1484 = vmatmul.f32.gmra.mxu3 %v1013_v27  ;;  %v1264_v27 = vld [vmem:[%s6630_s9 + $0x798] sm:$0xff]  ;;  %v1002_v30 = vmax.f32 %v938_v42, 0.0 }
 0x602   :  { %1553 = vmatmul.f32.gmra.mxu2 %v1016_v17  ;;  %1562 = vmatpush.msra.mxu3 %v1223_v15  ;;  %v1215_v17 = vld [vmem:[%s6630_s9 + $0x610] sm:$0xff]  ;;  %v1003_v15 = vmax.f32 %v961_v9, 0.0 }
 0x603   :  { %1588 = vmatpush.msrb.mxu0 %v1236_v18  ;;  %1611 = vmatpush.msrb.mxu1 %v1252_v20  ;;  %v940_v18 = vpop.f32.mrf.mxu0  ;;  %v915_v20 = vadd.f32 %v914_v11, %v595_v16 }
 0x604   :  { %1631 = vmatpush.msra.mxu2 %v1271_v37  ;;  %1563 = vmatpush.msra.mxu3 %v1222_v38  ;;  %v963_v37 = vpop.f32.mrf.mxu1  ;;  %v1214_v38 = vld [vmem:[%s6630_s9 + $0x608] sm:$0xff] }
 0x605   :  { %1589 = vmatpush.msrb.mxu0 %v1235_v39  ;;  %1612 = vmatpush.msrb.mxu1 %v1251_v43  ;;  %v984_v39 = vadd.f32 %v983_v19, %v598_v14  ;;  %v1262_v43 = vld [vmem:[%s6630_s9 + $0x788] sm:$0xff]  ;;  %v917_v55 = vpop.f32.mrf.mxu3 }
 0x606   :  { %1632 = vmatpush.msra.mxu2 %v1270_v44  ;;  %1564 = vmatpush.msra.mxu3 %v1221_v47  ;;  %v941_v44 = vadd.f32 %v940_v18, %v596_v33  ;;  %v1213_v47 = vld [vmem:[%s6630_s9 + $0x600] sm:$0xff] }
 0x607   :  { %1590 = vmatpush.msrb.mxu0 %v1234_v48  ;;  %1613 = vmatpush.msrb.mxu1 %v1250_v50  ;;  %v3844_v48 = vld [vmem:[%s6638_s17 + $0x38] sm:$0xff]  ;;  %v964_v50 = vadd.f32 %v963_v37, %v597_v0  ;;  %v3847_v0 = vld [vmem:[%s6638_s17 + $0x20] sm:$0xff] }
 0x608   :  { %1633 = vmatpush.msra.mxu2 %v1269_v51  ;;  %1565 = vmatpush.msra.mxu3 %v1220_v53  ;;  %v1261_v51 = vld [vmem:[%s6630_s9 + $0x780] sm:$0xff]  ;;  %v1001_v53 = vmax.f32 %v915_v20, 0.0 }
 0x609   :  { %1591 = vmatpush.msrb.mxu0 %v1233_v54  ;;  %1614 = vmatpush.msrb.mxu1 %v1249_v56  ;;  %v3845_v54 = vld [vmem:[%s6638_s17 + $0x30] sm:$0xff]  ;;  %v1004_v56 = vmax.f32 %v984_v39, 0.0  ;;  %v1019_v33 = vmax.f32 %v964_v50, 0.0 }
 0x60a   :  { %1634 = vmatpush.msra.mxu2 %v1268_v34  ;;  %1566 = vmatpush.msra.mxu3 %v1219_v31  ;;  %v986_v34 = vpop.f32.mrf.mxu2  ;;  %v1018_v31 = vmax.f32 %v941_v44, 0.0 }
 0x60b   :  { %1592 = vmatpush.msrb.mxu0 %v1232_v59  ;;  %1615 = vmatpush.msrb.mxu1 %v1248_v61  ;;  %v918_v59 = vadd.f32 %v917_v55, %v595_v16  ;;  %v987_v61 = vadd.f32 %v986_v34, %v598_v14  ;;  %v3799_v16 = vld [vmem:[%s6631_s10] ss:$0 sm:$0xff] }
 0x60c   :  { %1635 = vmatpush.msra.mxu2 %v1267_v1  ;;  %1567 = vmatpush.msra.mxu3 %v1218_v2  ;;  %v3848_v2 = vld [vmem:[%s6638_s17 + $0x18] sm:$0xff] }
 0x60d   :  { %1593 = vmatpush.msrb.mxu0 %v1231_v3  ;;  %1616 = vmatpush.msrb.mxu1 %v1247_v4  ;;  %v1017_v1 = vmax.f32 %v918_v59, 0.0  ;;  %v1020_v3 = vmax.f32 %v987_v61, 0.0  ;;  %v3849_v4 = vld [vmem:[%s6638_s17 + $0x10] sm:$0xff] }
 0x60e   :  { %1636 = vmatpush.msra.mxu2 %v1266_v5  ;;  %1568 = vmatpush.msra.mxu3 %v1217_v6  ;;  %v3850_v5 = vld [vmem:[%s6638_s17 + $0x8] sm:$0xff]  ;;  %v3851_v6 = vld [vmem:[%s6638_s17] sm:$0xff] }
 0x60f   :  { %1594 = vmatpush.msrb.mxu0 %v1230_v7  ;;  %1617 = vmatpush.msrb.mxu1 %v1246_v8 }
 0x610   :  { %1637 = vmatpush.msra.mxu2 %v1265_v12  ;;  %1569 = vmatpush.msra.mxu3 %v1216_v13 }
 0x611   :  { %1595 = vmatpush.msrb.mxu0 %v1229_v23  ;;  %1618 = vmatpush.msrb.mxu1 %v1245_v24 }
 0x612   :  { %1638 = vmatpush.msra.mxu2 %v1264_v27  ;;  %1596 = vmatmul.f32.vlgmr.msrb.gmra.mxu0 %v1002_v30 }
 0x613   :  { %1619 = vmatmul.f32.vlgmr.msrb.gmra.mxu1 %v1003_v15  ;;  %1570 = vmatpush.msra.mxu3 %v1215_v17 }
 0x614   :  { %1639 = vmatpush.msra.mxu2 %v1263_v45  ;;  %1859 = vmatpush.msra.mxu1 %v3844_v48 }
 0x615   :  { %1571 = vmatpush.msra.mxu3 %v1214_v38 }
 0x616   :  { %1640 = vmatpush.msra.mxu2 %v1262_v43  ;;  %1860 = vmatpush.msra.mxu1 %v3845_v54 }
 0x617   :  { %1572 = vmatpush.msra.mxu3 %v1213_v47 }
 0x618   :  { %1641 = vmatpush.msra.mxu2 %v1261_v51  ;;  %1573 = vmatmul.f32.vlgmr.msra.gmra.mxu3 %v1001_v53 }
 0x619   :  { %1642 = vmatmul.f32.vlgmr.msra.gmra.mxu2 %v1004_v56  ;;  %1861 = vmatpush.msra.mxu1 %v3846_v60 }
 0x61a   :  { %1599 = vmatmul.f32.gmra.mxu0 %v1018_v31 }
 0x61b   :  { %1622 = vmatmul.f32.gmra.mxu1 %v1019_v33 }
 0x61c   :  { %1862 = vmatpush.msra.mxu1 %v3847_v0 }
 0x61e   :  { %1863 = vmatpush.msra.mxu1 %v3848_v2 }
 0x620   :  { %1576 = vmatmul.f32.gmra.mxu3 %v1017_v1  ;;  %1864 = vmatpush.msra.mxu1 %v3849_v4 }
 0x621   :  { %1645 = vmatmul.f32.gmra.mxu2 %v1020_v3 }
 0x622   :  { %1865 = vmatpush.msra.mxu1 %v3850_v5 }
 0x624   :  { %1866 = vmatpush.msra.mxu1 %v3851_v6 }
 0x644   :  { %v1321_v42 = vpop.f32.mrf.mxu0 }
 0x645   :  { %v1344_v8 = vpop.f32.mrf.mxu1 }
 0x64d   :  { %v1324_v11 = vpop.f32.mrf.mxu0 }
 0x64e   :  { %v1347_v13 = vpop.f32.mrf.mxu1 }
 0x650   :  { %v1298_v7 = vpop.f32.mrf.mxu3 }
 0x651   :  { %v1367_v9 = vpop.f32.mrf.mxu2  ;;  %v1299_v23 = vadd.f32 %v3799_v16, %v1298_v7 }
 0x653   :  { %v1322_v27 = vadd.f32 %v1321_v42, %v1299_v23 }
 0x655   :  { %v1345_v15 = vadd.f32 %v1344_v8, %v1322_v27 }
 0x657   :  { %v1413_v24 = vpop.f32.mrf.mxu0  ;;  %v1368_v45 = vadd.f32 %v1367_v9, %v1345_v15 }
 0x658   :  { %v1436_v30 = vpop.f32.mrf.mxu1 }
 0x65a   :  { %v1301_v12 = vpop.f32.mrf.mxu3 }
 0x65b   :  { %v1370_v19 = vpop.f32.mrf.mxu2  ;;  %v1302_v18 = vadd.f32 %v3799_v16, %v1301_v12 }
 0x65d   :  { %v1325_v20 = vadd.f32 %v1324_v11, %v1302_v18 }
 0x65f   :  { %v1348_v44 = vadd.f32 %v1347_v13, %v1325_v20 }
 0x661   :  { %v1416_v37 = vpop.f32.mrf.mxu0  ;;  %v1371_v50 = vadd.f32 %v1370_v19, %v1348_v44 }
 0x662   :  { %v1439_v43 = vpop.f32.mrf.mxu1 }
 0x664   :  { %v1390_v14 = vpop.f32.mrf.mxu3 }
 0x665   :  { %v1459_v17 = vpop.f32.mrf.mxu2  ;;  %v1391_v39 = vadd.f32 %v1390_v14, %v1368_v45 }
 0x667   :  { %v1414_v48 = vadd.f32 %v1413_v24, %v1391_v39 }
 0x669   :  { %v1437_v51 = vadd.f32 %v1436_v30, %v1414_v48 }
 0x66b   :  { %v1460_v34 = vadd.f32 %v1459_v17, %v1437_v51 }
 0x66d   :  { %v1505_v54 = vpop.f32.mrf.mxu0  ;;  %v1528_v55 = vpop.f32.mrf.mxu1 }
 0x66e   :  { %v1393_v38 = vpop.f32.mrf.mxu3 }
 0x66f   :  { %v1462_v47 = vpop.f32.mrf.mxu2  ;;  %v1394_v53 = vadd.f32 %v1393_v38, %v1371_v50 }
 0x671   :  { %v1417_v31 = vadd.f32 %v1416_v37, %v1394_v53 }
 0x673   :  { %v1440_v59 = vadd.f32 %v1439_v43, %v1417_v31  ;;  %v3362_v31 = vld [vmem:[%s6656_s5 + $0x30] sm:$0xff] }
 0x675   :  { %v1463_v2 = vadd.f32 %v1462_v47, %v1440_v59 }
 0x677   :  { %v1508_v0 = vpop.f32.mrf.mxu0 }
 0x678   :  { %v1531_v3 = vpop.f32.mrf.mxu1 }
 0x67a   :  { %v1482_v56 = vpop.f32.mrf.mxu3 }
 0x67b   :  { %v1551_v33 = vpop.f32.mrf.mxu2  ;;  %v1483_v60 = vadd.f32 %v1482_v56, %v1460_v34 }
 0x67d   :  { %v1506_v61 = vadd.f32 %v1505_v54, %v1483_v60  ;;  %v3360_v60 = vld [vmem:[%s6656_s5 + $0x20] sm:$0xff] }
 0x67f   :  { %v1529_v4 = vadd.f32 %v1528_v55, %v1506_v61 }
 0x681   :  { %v1552_v42 = vadd.f32 %v1551_v33, %v1529_v4  ;;  %v3361_v33 = vld [vmem:[%s6656_s5 + $0x28] sm:$0xff] }
 0x684   :  { %v1485_v1 = vpop.f32.mrf.mxu3 }
 0x685   :  { %v1486_v5 = vadd.f32 %v1485_v1, %v1463_v2  ;;  %v1554_v6 = vpop.f32.mrf.mxu2 }
 0x687   :  { %v1509_v7 = vadd.f32 %v1508_v0, %v1486_v5 }
 0x689   :  { %v1532_v13 = vadd.f32 %v1531_v3, %v1509_v7 }
 0x68b   :  { %v1555_v24 = vadd.f32 %v1554_v6, %v1532_v13 }
 0x68f   :  { %v1597_v8 = vpop.f32.mrf.mxu0 }
 0x690   :  { %v1620_v12 = vpop.f32.mrf.mxu1 }
 0x697   :  { %v1600_v15 = vpop.f32.mrf.mxu0 }
 0x698   :  { %v1623_v20 = vpop.f32.mrf.mxu1 }
 0x69b   :  { %v1574_v9 = vpop.f32.mrf.mxu3 }
 0x69c   :  { %v1575_v11 = vadd.f32 %v1574_v9, %v1552_v42  ;;  %v1643_v19 = vpop.f32.mrf.mxu2 }
 0x69e   :  { %v1598_v16 = vadd.f32 %v1597_v8, %v1575_v11 }
 0x6a0   :  { %v1621_v23 = vadd.f32 %v1620_v12, %v1598_v16  ;;  %v3800_v12 = vld [vmem:[%s6634_s13] ss:$0 sm:$0xff] }
 0x6a2   :  { %v1644_v14 = vadd.f32 %v1643_v19, %v1621_v23  ;;  %v3801_v23 = vld [vmem:[%s6635_s14] ss:$0 sm:$0xff] }
 0x6a3   :  { %v1577_v27 = vpop.f32.mrf.mxu3 }
 0x6a4   :  { %v1578_v30 = vadd.f32 %v1577_v27, %v1555_v24  ;;  %v1649_v17 = vadd.f32 %v1644_v14, %v4343_v26  ;;  %v1646_v38 = vpop.f32.mrf.mxu2 }
 0x6a6   :  { %v1601_v18 = vadd.f32 %v1600_v15, %v1578_v30  ;;  %v1653_v45 = vsel %vm133_vm1, %v1649_v17, 0.0 }
 0x6a7   :  { %1654 = vadd.xlane.f32.xlu2 %v1653_v45 }
 0x6a8   :  { %v1624_v37 = vadd.f32 %v1623_v20, %v1601_v18 }
 0x6aa   :  { %v1647_v39 = vadd.f32 %v1646_v38, %v1624_v37  ;;  %v3802_v37 = vld [vmem:[%s6658_s23 + $0x1] ss:$0 sm:$0xff]  ;;  %s3884_s23 = smov [#allocation2]  }
 0x6ac   :  { %v1650_v43 = vadd.f32 %v1647_v39, %v4390_v10  ;;  %v3363_v10 = vld [vmem:[%s6656_s5 + $0x38] sm:$0xff] }
 0x6ad   :  { %1735 = vmatpush.msrb.mxu3 %v3363_v10 }
 0x6ae   :  { %v1656_v44 = vsel %vm133_vm1, %v1650_v43, 0.0 }
 0x6af   :  { %1657 = vadd.xlane.f32.xlu1 %v1656_v44  ;;  %1736 = vmatpush.msrb.mxu3 %v3362_v31 }
 0x6b1   :  { %1737 = vmatpush.msrb.mxu3 %v3361_v33 }
 0x6b3   :  { %1738 = vmatpush.msrb.mxu3 %v3360_v60 }
 0x71a   :  { %v1655_v47 = vpop.xlane.xlu2 %1654 }
 0x71b   :  { %v1659_v48 = vmul.f32 %v1655_v47, %v4224_v32 }
 0x71d   :  { %v1661_v50 = vsub.f32 %v1649_v17, %v1659_v48 }
 0x71f   :  { %v1663_v51 = vmul.f32 %v1661_v50, %v1661_v50 }
 0x721   :  { %v1665_v26 = vsel %vm133_vm1, %v1663_v51, 0.0 }
 0x722   :  { %1666 = vadd.xlane.f32.xlu0 %v1665_v26  ;;  %v1658_v53 = vpop.xlane.xlu1 %1657 }
 0x723   :  { %v1660_v54 = vmul.f32 %v1658_v53, %v4224_v32 }
 0x725   :  { %v1662_v56 = vsub.f32 %v1650_v43, %v1660_v54 }
 0x727   :  { %v1664_v55 = vmul.f32 %v1662_v56, %v1662_v56 }
 0x729   :  { %v1668_v34 = vsel %vm133_vm1, %v1664_v55, 0.0 }
 0x72a   :  { %1669 = vadd.xlane.f32.xlu2 %v1668_v34 }
 0x795   :  { %v1667_v59 = vpop.xlane.xlu0 %1666 }
 0x796   :  { %v1671_v61 = vmul.f32 %v1667_v59, %v4224_v32 }
 0x798   :  { %v1673_v0 = vadd.f32 1e-05, %v1671_v61 }
 0x79a   :  { %3824 = vrsqrt.f32 %v1673_v0  ;;  %vm1681_vm11 = vweird.f32 %v1673_v0 }
 0x79d   :  { %v1670_v1 = vpop.xlane.xlu2 %1669 }
 0x79e   :  { %v1672_v2 = vmul.f32 %v1670_v1, %v4224_v32 }
 0x7a0   :  { %v3825_v3 = vpop.eup %3824  ;;  %v1674_v4 = vadd.f32 1e-05, %v1672_v2 }
 0x7a1   :  { %v1676_v5 = vmul.f32 %v3825_v3, %v1673_v0  ;;  %vm1682_vm10 = vweird.f32 %v3825_v3 }
 0x7a2   :  { %3826 = vrsqrt.f32 %v1674_v4  ;;  %vm1683_vm12 = vmor %vm1681_vm11, %vm1682_vm10  ;;  %vm1691_vm14 = vweird.f32 %v1674_v4 }
 0x7a3   :  { %v1677_v6 = vmul.f32 %v3825_v3, %v1676_v5 }
 0x7a5   :  { %v1678_v42 = vmul.f32 0.5, %v1677_v6 }
 0x7a7   :  { %v1679_v7 = vsub.f32 1.5, %v1678_v42 }
 0x7a8   :  { %v3827_v8 = vpop.eup %3826 }
 0x7a9   :  { %v1680_v9 = vmul.f32 %v3825_v3, %v1679_v7  ;;  %v1686_v11 = vmul.f32 %v3827_v8, %v1674_v4  ;;  %vm1692_vm13 = vweird.f32 %v3827_v8 }
 0x7aa   :  { %vm1693_vm15 = vmor %vm1691_vm14, %vm1692_vm13 }
 0x7ab   :  { %v1684_v13 = vsel %vm1683_vm12, %v3825_v3, %v1680_v9  ;;  %v1687_v16 = vmul.f32 %v3827_v8, %v1686_v11  ;;  %v3852_v11 = vld [vmem:[%s6637_s16] sm:$0xff] }
 0x7ac   :  { %v1695_v19 = vmul.f32 %v1684_v13, %v1661_v50 }
 0x7ad   :  { %v1688_v24 = vmul.f32 0.5, %v1687_v16 }
 0x7ae   :  { %v1700_v14 = vmul.f32 %v3800_v12, %v1695_v19  ;;  %v3853_v19 = vld [vmem:[%s6637_s16 + $0x8] sm:$0xff] }
 0x7af   :  { %v1689_v27 = vsub.f32 1.5, %v1688_v24 }
 0x7b0   :  { %v5389_v30 = vadd.f32 %v3801_v23, %v1700_v14 }
 0x7b1   :  { %v1690_v17 = vmul.f32 %v3827_v8, %v1689_v27 }
 0x7b2   :  { %3365 = vmatmul.msk.f32.vlgmr.msrb.gmra.mxu3 %vm133_vm1, %v5389_v30 }
 0x7b3   :  { %v1694_v15 = vsel %vm1693_vm15, %v3827_v8, %v1690_v17 }
 0x7b4   :  { %v1696_v18 = vmul.f32 %v1694_v15, %v1662_v56 }
 0x7b6   :  { %v1701_v45 = vmul.f32 %v3800_v12, %v1696_v18 }
 0x7b8   :  { %v5393_v20 = vadd.f32 %v3801_v23, %v1701_v45 }
 0x7ba   :  { %3366 = vmatmul.msk.f32.gmra.mxu3 %vm133_vm1, %v5393_v20 }
 0x835   :  { %v1740_v38 = vpop.f32.mrf.mxu3 }
 0x836   :  { %v1741_v39 = vadd.f32 %v3802_v37, %v1740_v38 }
 0x838   :  { %v1754_v43 = vmul.f32 %v1741_v39, %v4069_v25  ;;  %v1752_v48 = vmul.f32 %v1741_v39, %v4076_v28  ;;  %v1750_v53 = vmul.f32 %v1741_v39, %v4093_v36  ;;  %v1762_v28 = vmul.f32 %v1741_v39, %v4126_v52 }
 0x839   :  { %v1760_v36 = vmul.f32 %v1741_v39, %v4138_v58  ;;  %v1756_v52 = vmul.f32 %v1741_v39, %v4147_v63  ;;  %v1746_v61 = vmul.f32 0.35355338, %v1741_v39 }
 0x83a   :  { %1784 = vrot.lane.b32.xlu0 %v1754_v43, %s3881_s1  ;;  %v3383_v43 = vld [vmem:[%s6659_s15 + $0x30] sm:$0xff] }
 0x83d   :  { %v1743_v44 = vpop.f32.mrf.mxu3 }
 0x83e   :  { %v1744_v47 = vadd.f32 %v3802_v37, %v1743_v44  ;;  %v3382_v44 = vld [vmem:[%s6659_s15 + $0x28] sm:$0xff] }
 0x840   :  { %v1755_v50 = vmul.f32 %v1744_v47, %v4062_v21  ;;  %v1753_v51 = vmul.f32 %v1744_v47, %v4064_v22  ;;  %v1751_v26 = vmul.f32 %v1744_v47, %v4078_v29  ;;  %v1749_v25 = vmul.f32 %v1744_v47, %v4104_v40 }
 0x841   :  { %v1748_v21 = vmul.f32 %v1741_v39, %v4091_v35  ;;  %v1763_v22 = vmul.f32 %v1744_v47, %v4121_v49  ;;  %v1761_v29 = vmul.f32 %v1744_v47, %v4135_v57  ;;  %v1759_v56 = vmul.f32 %v1744_v47, %v4145_v62 }
 0x842   :  { %1780 = vrot.lane.b32.xlu0 %v1752_v48, %s3881_s1  ;;  %1786 = vrot.lane.b32.xlu1 %v1755_v50, %s3881_s1  ;;  %v1758_v35 = vmul.f32 %v1741_v39, %v4186_v41  ;;  %v1757_v49 = vmul.f32 %v1744_v47, %v4194_v46  ;;  %v1747_v3 = vmul.f32 0.35355338, %v1744_v47  ;;  %v3384_v39 = vld [vmem:[%s6659_s15 + $0x38] sm:$0xff] }
 0x843   :  { %1782 = vrot.lane.b32.xlu2 %v1753_v51, %s3881_s1  ;;  %v3774_v54 = vpack.i.bf16 %v1762_v28, %v1763_v22  ;;  %v3779_v40 = vpack.i.bf16 %v1760_v36, %v1761_v29  ;;  %1967 = vmatpush.msra.mxu3 %v3384_v39  ;;  %v3803_v28 = vld [vmem:[%s6627_s6 + $0x1] ss:$0 sm:$0xff]  ;;  %v3413_v39 = vld [vmem:[%s6628_s7 + $0x2b8] sm:$0xff] }
 0x844   :  { %v3784_v55 = vpack.i.bf16 %v1758_v35, %v1759_v56  ;;  %v3789_v34 = vpack.i.bf16 %v1756_v52, %v1757_v49 }
 0x845   :  { %1968 = vmatpush.msra.mxu3 %v3383_v43  ;;  %v3394_v43 = vld [vmem:[%s6628_s7 + $0x220] sm:$0xff] }
 0x847   :  { %1969 = vmatpush.msra.mxu3 %v3382_v44  ;;  %v3395_v44 = vld [vmem:[%s6628_s7 + $0x228] sm:$0xff] }
 0x84a   :  { %1778 = vrot.lane.b32.xlu1 %v1751_v26, %s3881_s1  ;;  %1774 = vrot.lane.b32.xlu0 %v1749_v25, %s3881_s1 }
 0x84b   :  { %1776 = vrot.lane.b32.xlu2 %v1750_v53, %s3881_s1  ;;  %v3381_v53 = vld [vmem:[%s6659_s15 + $0x20] sm:$0xff] }
 0x84c   :  { %1970 = vmatpush.msra.mxu3 %v3381_v53 }
 0x852   :  { %1772 = vrot.lane.b32.xlu1 %v1748_v21, %s3881_s1  ;;  %s3297_s1 = sshll.u32 %s3884_s23, 4  ;;  %s3298_s1 = int_to_ptr.vmem [resolvable:$true] %s3297_s1 }
 0x85a   :  { %3775 = vrot.lane.b32.xlu1 %v3774_v54, %s3882_s24 }
 0x862   :  { %3780 = vrot.lane.b32.xlu1 %v3779_v40, %s3882_s24 }
 0x86a   :  { %3785 = vrot.lane.b32.xlu1 %v3784_v55, %s3882_s24 }
 0x872   :  { %3790 = vrot.lane.b32.xlu1 %v3789_v34, %s3882_s24 }
 0x89d   :  { %v1783_v10 = vpop.permute.xlu2 %1782 }
 0x8a5   :  { %v1777_v63 = vpop.permute.xlu2 %1776 }
 0x8ac   :  { %v1785_v58 = vpop.permute.xlu0 %1784 }
 0x8b4   :  { %v1787_v57 = vpop.permute.xlu1 %1786  ;;  %v1781_v41 = vpop.permute.xlu0 %1780 }
 0x8b5   :  { %3367 = vmatpush.xpose.msk.msra.mxu0 %vm133_vm1, %v1787_v57 }
 0x8b9   :  { %3368 = vmatpush.xpose.msk.msra.mxu0 %vm133_vm1, %v1785_v58 }
 0x8bc   :  { %v1779_v62 = vpop.permute.xlu1 %1778  ;;  %v1775_v46 = vpop.permute.xlu0 %1774 }
 0x8bd   :  { %3369 = vmatpush.xpose.msk.msra.mxu0 %vm133_vm1, %v1783_v10 }
 0x8c1   :  { %3370 = vmatpush.xpose.msk.msra.mxu0 %vm133_vm1, %v1781_v41 }
 0x8c4   :  { %v1773_v31 = vpop.permute.xlu1 %1772 }
 0x8c5   :  { %3371 = vmatpush.xpose.msk.msra.mxu0 %vm133_vm1, %v1779_v62 }
 0x8c9   :  { %3372 = vmatpush.xpose.msk.msra.mxu0 %vm133_vm1, %v1777_v63  ;;  %v3438_v63 = vld [vmem:[%s6628_s7 + $0x380] sm:$0xff] }
 0x8ca   :  { %2158 = vmatpush.msrb.mxu1 %v3438_v63  ;;  %v3431_v63 = vld [vmem:[%s6628_s7 + $0x348] sm:$0xff] }
 0x8cc   :  { %v3776_v33 = vpop.permute.xlu1 %3775 }
 0x8cd   :  { %v3777_v60 = vunpack.i.l.bf16 %v3776_v33  ;;  %3373 = vmatpush.xpose.msk.msra.mxu0 %vm133_vm1, %v1775_v46  ;;  %v3778_v59 = vunpack.i.h.bf16 %v3776_v33  ;;  %v3439_v46 = vld [vmem:[%s6628_s7 + $0x388] sm:$0xff]  ;;  %v3440_v33 = vld [vmem:[%s6628_s7 + $0x390] sm:$0xff] }
 0x8ce   :  { %2204 = vmatpush.msrb.mxu3 %v3440_v33  ;;  %v3432_v33 = vld [vmem:[%s6628_s7 + $0x350] sm:$0xff] }
 0x8cf   :  { %1924 = vmatpush.msrb.mxu2 %v3777_v60  ;;  %v3441_v60 = vld [vmem:[%s6628_s7 + $0x398] sm:$0xff] }
 0x8d1   :  { %3374 = vmatpush.xpose.msk.msra.mxu0 %vm133_vm1, %v1773_v31  ;;  %1925 = vmatpush.msrb.mxu2 %v3778_v59  ;;  %v3422_v59 = vld [vmem:[%s6628_s7 + $0x300] sm:$0xff] }
 0x8d2   :  { %2159 = vmatpush.msrb.mxu1 %v3422_v59  ;;  %v3414_v59 = vld [vmem:[%s6628_s7 + $0x2c0] sm:$0xff] }
 0x8d4   :  { %v3781_v0 = vpop.permute.xlu1 %3780  ;;  %3375 = vmatmul.msk.f32.vlgmr.msra.gmra.mxu0 %vm133_vm1, %v1746_v61  ;;  %v3423_v61 = vld [vmem:[%s6628_s7 + $0x308] sm:$0xff] }
 0x8d5   :  { %v3782_v1 = vunpack.i.l.bf16 %v3781_v0  ;;  %v3783_v2 = vunpack.i.h.bf16 %v3781_v0  ;;  %2227 = vmatpush.msrb.mxu0 %v3441_v60  ;;  %v3424_v0 = vld [vmem:[%s6628_s7 + $0x310] sm:$0xff]  ;;  %v3433_v60 = vld [vmem:[%s6628_s7 + $0x358] sm:$0xff] }
 0x8d6   :  { %2205 = vmatpush.msrb.mxu3 %v3424_v0  ;;  %v3416_v0 = vld [vmem:[%s6628_s7 + $0x2d0] sm:$0xff] }
 0x8d7   :  { %1926 = vmatpush.msrb.mxu2 %v3782_v1  ;;  %v3425_v1 = vld [vmem:[%s6628_s7 + $0x318] sm:$0xff] }
 0x8d8   :  { %2228 = vmatpush.msrb.mxu0 %v3425_v1  ;;  %v3417_v1 = vld [vmem:[%s6628_s7 + $0x2d8] sm:$0xff] }
 0x8d9   :  { %1927 = vmatpush.msrb.mxu2 %v3783_v2  ;;  %v3406_v2 = vld [vmem:[%s6628_s7 + $0x280] sm:$0xff] }
 0x8da   :  { %2160 = vmatpush.msrb.mxu1 %v3406_v2 }
 0x8dc   :  { %v3786_v4 = vpop.permute.xlu1 %3785  ;;  %3376 = vmatmul.msk.f32.gmra.mxu0 %vm133_vm1, %v1747_v3  ;;  %v3407_v3 = vld [vmem:[%s6628_s7 + $0x288] sm:$0xff] }
 0x8dd   :  { %v3787_v5 = vunpack.i.l.bf16 %v3786_v4  ;;  %v3788_v6 = vunpack.i.h.bf16 %v3786_v4  ;;  %v3408_v4 = vld [vmem:[%s6628_s7 + $0x290] sm:$0xff] }
 0x8de   :  { %2206 = vmatpush.msrb.mxu3 %v3408_v4  ;;  %v3399_v4 = vld [vmem:[%s6628_s7 + $0x248] sm:$0xff] }
 0x8df   :  { %1928 = vmatpush.msrb.mxu2 %v3787_v5  ;;  %v3409_v5 = vld [vmem:[%s6628_s7 + $0x298] sm:$0xff] }
 0x8e0   :  { %2229 = vmatpush.msrb.mxu0 %v3409_v5  ;;  %v3400_v5 = vld [vmem:[%s6628_s7 + $0x250] sm:$0xff] }
 0x8e1   :  { %1929 = vmatpush.msrb.mxu2 %v3788_v6  ;;  %v3390_v6 = vld [vmem:[%s6628_s7 + $0x200] sm:$0xff] }
 0x8e2   :  { %2161 = vmatpush.msrb.mxu1 %v3390_v6  ;;  %v3401_v6 = vld [vmem:[%s6628_s7 + $0x258] sm:$0xff] }
 0x8e4   :  { %v3791_v42 = vpop.permute.xlu1 %3790 }
 0x8e5   :  { %v3792_v7 = vunpack.i.l.bf16 %v3791_v42  ;;  %v3793_v8 = vunpack.i.h.bf16 %v3791_v42  ;;  %v3391_v42 = vld [vmem:[%s6628_s7 + $0x208] sm:$0xff] }
 0x8e7   :  { %1930 = vmatpush.msrb.mxu2 %v3792_v7  ;;  %v3392_v7 = vld [vmem:[%s6628_s7 + $0x210] sm:$0xff] }
 0x8e8   :  { %2207 = vmatpush.msrb.mxu3 %v3392_v7  ;;  %v3451_v7 = vld [vmem:[%s6628_s7 + $0x3e8] sm:$0xff] }
 0x8e9   :  { %1931 = vmatpush.msrb.mxu2 %v3793_v8  ;;  %v3393_v8 = vld [vmem:[%s6628_s7 + $0x218] sm:$0xff] }
 0x8ea   :  { %2230 = vmatpush.msrb.mxu0 %v3393_v8  ;;  %v3452_v8 = vld [vmem:[%s6628_s7 + $0x3f0] sm:$0xff] }
 0x8eb   :  { %2181 = vmatpush.msra.mxu2 %v3439_v46 }
 0x8ed   :  { %2182 = vmatpush.msra.mxu2 %v3423_v61 }
 0x8ef   :  { %2183 = vmatpush.msra.mxu2 %v3407_v3  ;;  %v3398_v3 = vld [vmem:[%s6628_s7 + $0x240] sm:$0xff] }
 0x8f1   :  { %2184 = vmatpush.msra.mxu2 %v3391_v42  ;;  %v3450_v42 = vld [vmem:[%s6628_s7 + $0x3e0] sm:$0xff] }
 0x951   :  { %v1827_v9 = vpop.f32.mrf.mxu0 }
 0x952   :  { %v1828_v12 = vadd.f32 %v3852_v11, %v1827_v9 }
 0x954   :  { %v1833_v13 = vsel %vm306_vm2, %v1828_v12, -inf }
 0x955   :  { %1834 = vmax.xlane.f32.xlu2 %v1833_v13  ;;  %v3442_v13 = vld [vmem:[%s6628_s7 + $0x3a0] sm:$0xff] }
 0x959   :  { %v1830_v16 = vpop.f32.mrf.mxu0 }
 0x95a   :  { %v1831_v23 = vadd.f32 %v3853_v19, %v1830_v16  ;;  %v3443_v16 = vld [vmem:[%s6628_s7 + $0x3a8] sm:$0xff]  ;;  %v3444_v19 = vld [vmem:[%s6628_s7 + $0x3b0] sm:$0xff] }
 0x95c   :  { %v1836_v24 = vsel %vm306_vm2, %v1831_v23, -inf }
 0x95d   :  { %1837 = vmax.xlane.f32.xlu0 %v1836_v24  ;;  %v3426_v24 = vld [vmem:[%s6628_s7 + $0x320] sm:$0xff] }
 0x9c8   :  { %v1835_v14 = vpop.xlane.xlu2 %1834 }
 0x9c9   :  { %v1839_v27 = vsub.f32 %v1828_v12, %v1835_v14  ;;  %v3427_v14 = vld [vmem:[%s6628_s7 + $0x328] sm:$0xff] }
 0x9cb   :  { %v1841_v17 = vmul.f32 1.442695, %v1839_v27 }
 0x9cd   :  { %3828 = vpow2.f32 %v1841_v17  ;;  %v3428_v17 = vld [vmem:[%s6628_s7 + $0x330] sm:$0xff] }
 0x9d0   :  { %v1838_v15 = vpop.xlane.xlu0 %1837 }
 0x9d1   :  { %v1840_v18 = vsub.f32 %v1831_v23, %v1838_v15  ;;  %v3445_v23 = vld [vmem:[%s6628_s7 + $0x3b8] sm:$0xff] }
 0x9d2   :  { %2319 = vmatpush.msra.mxu0 %v3445_v23  ;;  %v3429_v15 = vld [vmem:[%s6628_s7 + $0x338] sm:$0xff]  ;;  %v3419_v23 = vld [vmem:[%s6628_s7 + $0x2e8] sm:$0xff] }
 0x9d3   :  { %v3829_v45 = vpop.eup %3828  ;;  %v1843_v37 = vmul.f32 1.442695, %v1840_v18  ;;  %v3410_v18 = vld [vmem:[%s6628_s7 + $0x2a0] sm:$0xff] }
 0x9d4   :  { %3377 = vmatmul.msk.f32.vlgmr.msra.gmra.mxu1 %vm306_vm2, %v3829_v45  ;;  %2320 = vmatpush.msra.mxu0 %v3429_v15  ;;  %v3404_v15 = vld [vmem:[%s6628_s7 + $0x270] sm:$0xff] }
 0x9d5   :  { %3830 = vpow2.f32 %v1843_v37  ;;  %2250 = vmatpush.msra.mxu1 %v3442_v13  ;;  %v3411_v37 = vld [vmem:[%s6628_s7 + $0x2a8] sm:$0xff]  ;;  %v3436_v13 = vld [vmem:[%s6628_s7 + $0x370] sm:$0xff] }
 0x9d6   :  { %2321 = vmatpush.msra.mxu0 %v3413_v39  ;;  %v3535_v39 = vld [vmem:[%s6630_s9 + $0x978] sm:$0xff] }
 0x9d7   :  { %2251 = vmatpush.msra.mxu1 %v3426_v24  ;;  %v3420_v24 = vld [vmem:[%s6628_s7 + $0x2f0] sm:$0xff] }
 0x9d9   :  { %2252 = vmatpush.msra.mxu1 %v3410_v18  ;;  %v3405_v18 = vld [vmem:[%s6628_s7 + $0x278] sm:$0xff] }
 0x9db   :  { %v3831_v38 = vpop.eup %3830  ;;  %2253 = vmatpush.msra.mxu1 %v3394_v43  ;;  %v3502_v43 = vld [vmem:[%s6630_s9 + $0x870] sm:$0xff] }
 0x9dc   :  { %3378 = vmatmul.msk.f32.gmra.mxu1 %vm306_vm2, %v3831_v38 }
 0xa51   :  { %v1868_v47 = vpop.f32.mrf.mxu1 }
 0xa52   :  { %3832 = vrcp.f32 %v1868_v47 }
 0xa58   :  { %v3833_v48 = vpop.eup %3832 }
 0xa59   :  { %v1876_v50 = vmul.f32 %v3833_v48, %v3829_v45  ;;  %v1871_v51 = vpop.f32.mrf.mxu1 }
 0xa5a   :  { %3834 = vrcp.f32 %v1871_v51  ;;  %v3397_v51 = vld [vmem:[%s6628_s7 + $0x238] sm:$0xff] }
 0xa5b   :  { %3379 = vmatmul.msk.f32.vlgmr.msrb.gmra.mxu2 %vm306_vm2, %v1876_v50  ;;  %v3396_v50 = vld [vmem:[%s6628_s7 + $0x230] sm:$0xff]  ;;  %2322 = vmatpush.msra.mxu0 %v3397_v51  ;;  %v3549_v51 = vld [vmem:[%s6630_s9 + $0x9e8] sm:$0xff] }
 0xa5c   :  { %2273 = vmatpush.msrb.mxu2 %v3443_v16  ;;  %v3437_v16 = vld [vmem:[%s6628_s7 + $0x378] sm:$0xff] }
 0xa5e   :  { %2274 = vmatpush.msrb.mxu2 %v3427_v14  ;;  %v3421_v14 = vld [vmem:[%s6628_s7 + $0x2f8] sm:$0xff] }
 0xa60   :  { %v3835_v26 = vpop.eup %3834  ;;  %2275 = vmatpush.msrb.mxu2 %v3411_v37  ;;  %v3551_v37 = vld [vmem:[%s6630_s9 + $0x9f8] sm:$0xff] }
 0xa61   :  { %v1877_v25 = vmul.f32 %v3835_v26, %v3831_v38  ;;  %v3412_v38 = vld [vmem:[%s6628_s7 + $0x2b0] sm:$0xff] }
 0xa62   :  { %2276 = vmatpush.msrb.mxu2 %v3395_v44  ;;  %v3550_v44 = vld [vmem:[%s6630_s9 + $0x9f0] sm:$0xff] }
 0xa63   :  { %3380 = vmatmul.msk.f32.gmra.mxu2 %vm306_vm2, %v1877_v25 }
 0xade   :  { %v1933_v21 = vpop.f32.mrf.mxu2 }
 0xadf   :  { %3386 = vmatmul.msk.f32.vlgmr.msra.gmra.mxu3 %vm133_vm1, %v1933_v21 }
 0xae0   :  { %2296 = vmatpush.msra.mxu3 %v3444_v19  ;;  %v3418_v19 = vld [vmem:[%s6628_s7 + $0x2e0] sm:$0xff] }
 0xae2   :  { %2297 = vmatpush.msra.mxu3 %v3428_v17  ;;  %v3403_v17 = vld [vmem:[%s6628_s7 + $0x268] sm:$0xff] }
 0xae4   :  { %2298 = vmatpush.msra.mxu3 %v3412_v38  ;;  %v3519_v38 = vld [vmem:[%s6630_s9 + $0x8f8] sm:$0xff] }
 0xae6   :  { %v1936_v22 = vpop.f32.mrf.mxu2  ;;  %2299 = vmatpush.msra.mxu3 %v3396_v50  ;;  %v3501_v50 = vld [vmem:[%s6630_s9 + $0x868] sm:$0xff] }
 0xae7   :  { %3387 = vmatmul.msk.f32.gmra.mxu3 %vm133_vm1, %v1936_v22 }
 0xb62   :  { %v1972_v54 = vpop.f32.mrf.mxu3 }
 0xb63   :  { %v1973_v29 = vadd.f32 %v3803_v28, %v1972_v54 }
 0xb65   :  { %v1978_v36 = vadd.f32 %v1973_v29, %v5389_v30  ;;  %v3804_v29 = vld [vmem:[%s6632_s11 + $0x1] ss:$0 sm:$0xff] }
 0xb67   :  { %v1984_v40 = vsel %vm133_vm1, %v1978_v36, 0.0 }
 0xb68   :  { %1985 = vadd.xlane.f32.xlu1 %v1984_v40 }
 0xb6a   :  { %v1975_v56 = vpop.f32.mrf.mxu3 }
 0xb6b   :  { %v1976_v35 = vadd.f32 %v3803_v28, %v1975_v56  ;;  %v3805_v56 = vld [vmem:[%s6633_s12 + $0x1] ss:$0 sm:$0xff] }
 0xb6d   :  { %v1979_v55 = vadd.f32 %v1976_v35, %v5393_v20 }
 0xb6f   :  { %v1987_v49 = vsel %vm133_vm1, %v1979_v55, 0.0 }
 0xb70   :  { %1988 = vadd.xlane.f32.xlu2 %v1987_v49 }
 0xbdb   :  { %v1986_v52 = vpop.xlane.xlu1 %1985 }
 0xbdc   :  { %v1990_v34 = vmul.f32 %v1986_v52, %v4224_v32 }
 0xbde   :  { %v5472_v57 = vsub.f32 %v1978_v36, %v1990_v34 }
 0xbe0   :  { %v1994_v58 = vmul.f32 %v5472_v57, %v5472_v57 }
 0xbe2   :  { %v1996_v30 = vsel %vm133_vm1, %v1994_v58, 0.0 }
 0xbe3   :  { %1997 = vadd.xlane.f32.xlu0 %v1996_v30  ;;  %v1989_v10 = vpop.xlane.xlu2 %1988  ;;  %v3446_v30 = vld [vmem:[%s6628_s7 + $0x3c0] sm:$0xff] }
 0xbe4   :  { %v1991_v62 = vmul.f32 %v1989_v10, %v4224_v32  ;;  %v3447_v10 = vld [vmem:[%s6628_s7 + $0x3c8] sm:$0xff] }
 0xbe6   :  { %v5478_v41 = vsub.f32 %v1979_v55, %v1991_v62  ;;  %v3449_v62 = vld [vmem:[%s6628_s7 + $0x3d8] sm:$0xff] }
 0xbe8   :  { %v1995_v20 = vmul.f32 %v5478_v41, %v5478_v41 }
 0xbea   :  { %v1999_v31 = vsel %vm133_vm1, %v1995_v20, 0.0 }
 0xbeb   :  { %2000 = vadd.xlane.f32.xlu2 %v1999_v31  ;;  %v3430_v31 = vld [vmem:[%s6628_s7 + $0x340] sm:$0xff] }
 0xc56   :  { %v1998_v9 = vpop.xlane.xlu0 %1997 }
 0xc57   :  { %v2002_v11 = vmul.f32 %v1998_v9, %v4224_v32  ;;  %v3453_v9 = vld [vmem:[%s6628_s7 + $0x3f8] sm:$0xff] }
 0xc59   :  { %v2004_v12 = vadd.f32 1e-05, %v2002_v11  ;;  %v3434_v11 = vld [vmem:[%s6628_s7 + $0x360] sm:$0xff] }
 0xc5b   :  { %3836 = vrsqrt.f32 %v2004_v12  ;;  %vm2012_vm3 = vweird.f32 %v2004_v12 }
 0xc5e   :  { %v2001_v27 = vpop.xlane.xlu2 %2000 }
 0xc5f   :  { %v2003_v45 = vmul.f32 %v2001_v27, %v4224_v32  ;;  %v3402_v27 = vld [vmem:[%s6628_s7 + $0x260] sm:$0xff] }
 0xc61   :  { %v3837_v47 = vpop.eup %3836  ;;  %v2005_v48 = vadd.f32 1e-05, %v2003_v45  ;;  %v3503_v45 = vld [vmem:[%s6630_s9 + $0x878] sm:$0xff] }
 0xc62   :  { %v2007_v26 = vmul.f32 %v3837_v47, %v2004_v12  ;;  %vm2013_vm2 = vweird.f32 %v3837_v47  ;;  %v3435_v12 = vld [vmem:[%s6628_s7 + $0x368] sm:$0xff] }
 0xc63   :  { %3838 = vrsqrt.f32 %v2005_v48  ;;  %vm2014_vm4 = vmor %vm2012_vm3, %vm2013_vm2  ;;  %vm2022_vm6 = vweird.f32 %v2005_v48 }
 0xc64   :  { %v2008_v25 = vmul.f32 %v3837_v47, %v2007_v26  ;;  %v3517_v26 = vld [vmem:[%s6630_s9 + $0x8e8] sm:$0xff] }
 0xc66   :  { %v2009_v53 = vmul.f32 0.5, %v2008_v25  ;;  %v3533_v25 = vld [vmem:[%s6630_s9 + $0x968] sm:$0xff] }
 0xc68   :  { %v2010_v21 = vsub.f32 1.5, %v2009_v53  ;;  %v3500_v53 = vld [vmem:[%s6630_s9 + $0x860] sm:$0xff] }
 0xc69   :  { %v3839_v22 = vpop.eup %3838 }
 0xc6a   :  { %v2011_v28 = vmul.f32 %v3837_v47, %v2010_v21  ;;  %v2017_v54 = vmul.f32 %v3839_v22, %v2005_v48  ;;  %vm2023_vm5 = vweird.f32 %v3839_v22  ;;  %v3534_v48 = vld [vmem:[%s6630_s9 + $0x970] sm:$0xff]  ;;  %v3548_v21 = vld [vmem:[%s6630_s9 + $0x9e0] sm:$0xff] }
 0xc6b   :  { %vm2024_vm7 = vmor %vm2022_vm6, %vm2023_vm5 }
 0xc6c   :  { %v2015_v36 = vsel %vm2014_vm4, %v3837_v47, %v2011_v28  ;;  %v2018_v40 = vmul.f32 %v3839_v22, %v2017_v54  ;;  %v3518_v47 = vld [vmem:[%s6630_s9 + $0x8f0] sm:$0xff]  ;;  %v3532_v28 = vld [vmem:[%s6630_s9 + $0x960] sm:$0xff]  ;;  %v3499_v54 = vld [vmem:[%s6630_s9 + $0x858] sm:$0xff] }
 0xc6d   :  { %v2026_v35 = vmul.f32 %v2015_v36, %v5472_v57  ;;  %v3448_v57 = vld [vmem:[%s6628_s7 + $0x3d0] sm:$0xff]  ;;  %v3515_v36 = vld [vmem:[%s6630_s9 + $0x8d8] sm:$0xff] }
 0xc6e   :  { %v2019_v55 = vmul.f32 0.5, %v2018_v40  ;;  %v3531_v40 = vld [vmem:[%s6630_s9 + $0x958] sm:$0xff] }
 0xc6f   :  { %v2031_v49 = vmul.f32 %v3804_v29, %v2026_v35  ;;  %v3546_v35 = vld [vmem:[%s6630_s9 + $0x9d0] sm:$0xff] }
 0xc70   :  { %v2020_v52 = vsub.f32 1.5, %v2019_v55  ;;  %v3514_v55 = vld [vmem:[%s6630_s9 + $0x8d0] sm:$0xff] }
 0xc71   :  { %v5588_v34 = vadd.f32 %v3805_v56, %v2031_v49  ;;  %v3530_v49 = vld [vmem:[%s6630_s9 + $0x950] sm:$0xff] }
 0xc72   :  { %v2021_v58 = vmul.f32 %v3839_v22, %v2020_v52  ;;  %v3497_v52 = vld [vmem:[%s6630_s9 + $0x848] sm:$0xff] }
 0xc73   :  { %3456 = vmatmul.msk.f32.vlgmr.msrb.gmra.mxu1 %vm133_vm1, %v5588_v34  ;;  %3458 = vmatmul.msk.f32.vlgmr.msra.gmra.mxu2 %vm133_vm1, %v5588_v34 }
 0xc74   :  { %v2025_v20 = vsel %vm2024_vm7, %v3839_v22, %v2021_v58  ;;  %3460 = vmatmul.msk.f32.vlgmr.msrb.gmra.mxu3 %vm133_vm1, %v5588_v34  ;;  %3462 = vmatmul.msk.f32.vlgmr.msrb.gmra.mxu0 %vm133_vm1, %v5588_v34  ;;  %v3516_v22 = vld [vmem:[%s6630_s9 + $0x8e0] sm:$0xff]  ;;  %v3545_v58 = vld [vmem:[%s6630_s9 + $0x9c8] sm:$0xff] }
 0xc75   :  { %v2027_v46 = vmul.f32 %v2025_v20, %v5478_v41  ;;  %2342 = vmatpush.msrb.mxu1 %v3446_v30  ;;  %2365 = vmatpush.msra.mxu2 %v3447_v10  ;;  %v3415_v41 = vld [vmem:[%s6628_s7 + $0x2c8] sm:$0xff]  ;;  %v3512_v20 = vld [vmem:[%s6630_s9 + $0x8c0] sm:$0xff] }
 0xc76   :  { %2388 = vmatpush.msrb.mxu3 %v3448_v57  ;;  %2411 = vmatpush.msrb.mxu0 %v3449_v62  ;;  %v3513_v30 = vld [vmem:[%s6630_s9 + $0x8c8] sm:$0xff]  ;;  %v3496_v57 = vld [vmem:[%s6630_s9 + $0x840] sm:$0xff] }
 0xc77   :  { %v2032_v61 = vmul.f32 %v3804_v29, %v2027_v46  ;;  %2343 = vmatpush.msrb.mxu1 %v3430_v31  ;;  %2366 = vmatpush.msra.mxu2 %v3431_v63  ;;  %v3547_v29 = vld [vmem:[%s6630_s9 + $0x9d8] sm:$0xff]  ;;  %v3529_v10 = vld [vmem:[%s6630_s9 + $0x948] sm:$0xff]  ;;  %v3544_v62 = vld [vmem:[%s6630_s9 + $0x9c0] sm:$0xff] }
 0xc78   :  { %2389 = vmatpush.msrb.mxu3 %v3432_v33  ;;  %2412 = vmatpush.msrb.mxu0 %v3433_v60  ;;  %v3528_v31 = vld [vmem:[%s6630_s9 + $0x940] sm:$0xff]  ;;  %v3495_v63 = vld [vmem:[%s6630_s9 + $0x838] sm:$0xff] }
 0xc79   :  { %v5635_v2 = vadd.f32 %v3805_v56, %v2032_v61  ;;  %2344 = vmatpush.msrb.mxu1 %v3414_v59  ;;  %2367 = vmatpush.msra.mxu2 %v3415_v41  ;;  %v3498_v56 = vld [vmem:[%s6630_s9 + $0x850] sm:$0xff]  ;;  %v3543_v46 = vld [vmem:[%s6630_s9 + $0x9b8] sm:$0xff] }
 0xc7a   :  { %2390 = vmatpush.msrb.mxu3 %v3416_v0  ;;  %2413 = vmatpush.msrb.mxu0 %v3417_v1  ;;  %v3511_v33 = vld [vmem:[%s6630_s9 + $0x8b8] sm:$0xff]  ;;  %v3494_v59 = vld [vmem:[%s6630_s9 + $0x830] sm:$0xff]  ;;  %v3493_v1 = vld [vmem:[%s6630_s9 + $0x828] sm:$0xff] }
 0xc7b   :  { %3457 = vmatmul.msk.f32.gmra.mxu1 %vm133_vm1, %v5635_v2  ;;  %3459 = vmatmul.msk.f32.gmra.mxu2 %vm133_vm1, %v5635_v2  ;;  %v3527_v60 = vld [vmem:[%s6630_s9 + $0x938] sm:$0xff]  ;;  %v3542_v41 = vld [vmem:[%s6630_s9 + $0x9b0] sm:$0xff] }
 0xc7c   :  { %3461 = vmatmul.msk.f32.gmra.mxu3 %vm133_vm1, %v5635_v2  ;;  %3463 = vmatmul.msk.f32.gmra.mxu0 %vm133_vm1, %v5635_v2  ;;  %v3510_v61 = vld [vmem:[%s6630_s9 + $0x8b0] sm:$0xff] }
 0xc7d   :  { %2345 = vmatpush.msrb.mxu1 %v3398_v3  ;;  %2368 = vmatpush.msra.mxu2 %v3399_v4  ;;  %v3526_v0 = vld [vmem:[%s6630_s9 + $0x930] sm:$0xff]  ;;  %v3541_v3 = vld [vmem:[%s6630_s9 + $0x9a8] sm:$0xff] }
 0xc7e   :  { %2391 = vmatpush.msrb.mxu3 %v3400_v5  ;;  %2414 = vmatpush.msrb.mxu0 %v3401_v6  ;;  %v3509_v4 = vld [vmem:[%s6630_s9 + $0x8a8] sm:$0xff]  ;;  %v3492_v6 = vld [vmem:[%s6630_s9 + $0x820] sm:$0xff] }
 0xc7f   :  { %v3525_v5 = vld [vmem:[%s6630_s9 + $0x928] sm:$0xff] }
 0xc83   :  { %3464 = vmatmul.msk.f32.vlgmr.msra.gmra.mxu1 %vm133_vm1, %v5588_v34  ;;  %3466 = vmatmul.msk.f32.vlgmr.msrb.gmra.mxu2 %vm133_vm1, %v5588_v34 }
 0xc84   :  { %3468 = vmatmul.msk.f32.vlgmr.msra.gmra.mxu3 %vm133_vm1, %v5588_v34  ;;  %3470 = vmatmul.msk.f32.vlgmr.msra.gmra.mxu0 %vm133_vm1, %v5588_v34 }
 0xc85   :  { %2434 = vmatpush.msra.mxu1 %v3450_v42  ;;  %2457 = vmatpush.msrb.mxu2 %v3451_v7  ;;  %v3540_v42 = vld [vmem:[%s6630_s9 + $0x9a0] sm:$0xff] }
 0xc86   :  { %2480 = vmatpush.msra.mxu3 %v3452_v8  ;;  %2503 = vmatpush.msra.mxu0 %v3453_v9  ;;  %v3508_v7 = vld [vmem:[%s6630_s9 + $0x8a0] sm:$0xff]  ;;  %v3491_v9 = vld [vmem:[%s6630_s9 + $0x818] sm:$0xff] }
 0xc87   :  { %2435 = vmatpush.msra.mxu1 %v3434_v11  ;;  %2458 = vmatpush.msrb.mxu2 %v3435_v12  ;;  %v3524_v8 = vld [vmem:[%s6630_s9 + $0x920] sm:$0xff]  ;;  %v3539_v11 = vld [vmem:[%s6630_s9 + $0x998] sm:$0xff] }
 0xc88   :  { %2481 = vmatpush.msra.mxu3 %v3436_v13  ;;  %2504 = vmatpush.msra.mxu0 %v3437_v16  ;;  %v3507_v12 = vld [vmem:[%s6630_s9 + $0x898] sm:$0xff]  ;;  %v3490_v16 = vld [vmem:[%s6630_s9 + $0x810] sm:$0xff] }
 0xc89   :  { %2436 = vmatpush.msra.mxu1 %v3418_v19  ;;  %2459 = vmatpush.msrb.mxu2 %v3419_v23  ;;  %v3523_v13 = vld [vmem:[%s6630_s9 + $0x918] sm:$0xff]  ;;  %v3538_v19 = vld [vmem:[%s6630_s9 + $0x990] sm:$0xff] }
 0xc8a   :  { %2482 = vmatpush.msra.mxu3 %v3420_v24  ;;  %2505 = vmatpush.msra.mxu0 %v3421_v14  ;;  %v3506_v23 = vld [vmem:[%s6630_s9 + $0x890] sm:$0xff]  ;;  %v3489_v14 = vld [vmem:[%s6630_s9 + $0x808] sm:$0xff] }
 0xc8b   :  { %3465 = vmatmul.msk.f32.gmra.mxu1 %vm133_vm1, %v5635_v2  ;;  %3467 = vmatmul.msk.f32.gmra.mxu2 %vm133_vm1, %v5635_v2  ;;  %v3522_v24 = vld [vmem:[%s6630_s9 + $0x910] sm:$0xff] }
 0xc8c   :  { %3469 = vmatmul.msk.f32.gmra.mxu3 %vm133_vm1, %v5635_v2  ;;  %3471 = vmatmul.msk.f32.gmra.mxu0 %vm133_vm1, %v5635_v2 }
 0xc8d   :  { %2437 = vmatpush.msra.mxu1 %v3402_v27  ;;  %2460 = vmatpush.msrb.mxu2 %v3403_v17  ;;  %v3537_v27 = vld [vmem:[%s6630_s9 + $0x988] sm:$0xff] }
 0xc8e   :  { %2483 = vmatpush.msra.mxu3 %v3404_v15  ;;  %2506 = vmatpush.msra.mxu0 %v3405_v18  ;;  %v3505_v17 = vld [vmem:[%s6630_s9 + $0x888] sm:$0xff]  ;;  %v3488_v18 = vld [vmem:[%s6630_s9 + $0x800] sm:$0xff] }
 0xc8f   :  { %v3521_v15 = vld [vmem:[%s6630_s9 + $0x908] sm:$0xff] }
 0xc93   :  { %3472 = vmatmul.msk.f32.vlgmr.msrb.gmra.mxu1 %vm133_vm1, %v5588_v34  ;;  %3474 = vmatmul.msk.f32.vlgmr.msra.gmra.mxu2 %vm133_vm1, %v5588_v34 }
 0xc94   :  { %3476 = vmatmul.msk.f32.vlgmr.msrb.gmra.mxu3 %vm133_vm1, %v5588_v34  ;;  %3478 = vmatmul.msk.f32.vlgmr.msrb.gmra.mxu0 %vm133_vm1, %v5588_v34 }
 0xc95   :  { %2808 = vmatpush.msrb.mxu1 %v3503_v45  ;;  %2877 = vmatpush.msrb.mxu0 %v3551_v37  ;;  %v3536_v45 = vld [vmem:[%s6630_s9 + $0x980] sm:$0xff]  ;;  %v3567_v37 = vld [vmem:[%s6630_s9 + $0xa78] sm:$0xff] }
 0xc96   :  { %2831 = vmatpush.msra.mxu2 %v3519_v38  ;;  %2854 = vmatpush.msrb.mxu3 %v3535_v39  ;;  %v3615_v38 = vld [vmem:[%s6630_s9 + $0xbf8] sm:$0xff]  ;;  %v3504_v39 = vld [vmem:[%s6630_s9 + $0x880] sm:$0xff] }
 0xc97   :  { %2809 = vmatpush.msrb.mxu1 %v3502_v43  ;;  %2878 = vmatpush.msrb.mxu0 %v3550_v44  ;;  %v3520_v43 = vld [vmem:[%s6630_s9 + $0x900] sm:$0xff]  ;;  %v3566_v44 = vld [vmem:[%s6630_s9 + $0xa70] sm:$0xff] }
 0xc98   :  { %2832 = vmatpush.msra.mxu2 %v3518_v47  ;;  %2855 = vmatpush.msrb.mxu3 %v3534_v48  ;;  %v3614_v47 = vld [vmem:[%s6630_s9 + $0xbf0] sm:$0xff]  ;;  %v3583_v48 = vld [vmem:[%s6630_s9 + $0xaf8] sm:$0xff] }
 0xc99   :  { %2810 = vmatpush.msrb.mxu1 %v3501_v50  ;;  %2879 = vmatpush.msrb.mxu0 %v3549_v51  ;;  %v3599_v50 = vld [vmem:[%s6630_s9 + $0xb78] sm:$0xff]  ;;  %v3565_v51 = vld [vmem:[%s6630_s9 + $0xa68] sm:$0xff] }
 0xc9a   :  { %2833 = vmatpush.msra.mxu2 %v3517_v26  ;;  %2856 = vmatpush.msrb.mxu3 %v3533_v25  ;;  %v3613_v26 = vld [vmem:[%s6630_s9 + $0xbe8] sm:$0xff]  ;;  %v3582_v25 = vld [vmem:[%s6630_s9 + $0xaf0] sm:$0xff] }
 0xc9b   :  { %3473 = vmatmul.msk.f32.gmra.mxu1 %vm133_vm1, %v5635_v2  ;;  %3475 = vmatmul.msk.f32.gmra.mxu2 %vm133_vm1, %v5635_v2 }
 0xc9c   :  { %3477 = vmatmul.msk.f32.gmra.mxu3 %vm133_vm1, %v5635_v2  ;;  %3479 = vmatmul.msk.f32.gmra.mxu0 %vm133_vm1, %v5635_v2 }
 0xc9d   :  { %2811 = vmatpush.msrb.mxu1 %v3500_v53  ;;  %2880 = vmatpush.msrb.mxu0 %v3548_v21  ;;  %v3598_v53 = vld [vmem:[%s6630_s9 + $0xb70] sm:$0xff]  ;;  %v3564_v21 = vld [vmem:[%s6630_s9 + $0xa60] sm:$0xff] }
 0xc9e   :  { %2834 = vmatpush.msra.mxu2 %v3516_v22  ;;  %2857 = vmatpush.msrb.mxu3 %v3532_v28  ;;  %v3612_v22 = vld [vmem:[%s6630_s9 + $0xbe0] sm:$0xff]  ;;  %v3581_v28 = vld [vmem:[%s6630_s9 + $0xae8] sm:$0xff] }
 0xc9f   :  { %2812 = vmatpush.msrb.mxu1 %v3499_v54  ;;  %2881 = vmatpush.msrb.mxu0 %v3547_v29  ;;  %v3597_v54 = vld [vmem:[%s6630_s9 + $0xb68] sm:$0xff]  ;;  %v3563_v29 = vld [vmem:[%s6630_s9 + $0xa58] sm:$0xff] }
 0xca0   :  { %2835 = vmatpush.msra.mxu2 %v3515_v36  ;;  %2858 = vmatpush.msrb.mxu3 %v3531_v40  ;;  %v3611_v36 = vld [vmem:[%s6630_s9 + $0xbd8] sm:$0xff]  ;;  %v3580_v40 = vld [vmem:[%s6630_s9 + $0xae0] sm:$0xff] }
 0xca1   :  { %2813 = vmatpush.msrb.mxu1 %v3498_v56  ;;  %2882 = vmatpush.msrb.mxu0 %v3546_v35  ;;  %v3596_v56 = vld [vmem:[%s6630_s9 + $0xb60] sm:$0xff]  ;;  %v3562_v35 = vld [vmem:[%s6630_s9 + $0xa50] sm:$0xff] }
 0xca2   :  { %2836 = vmatpush.msra.mxu2 %v3514_v55  ;;  %2859 = vmatpush.msrb.mxu3 %v3530_v49  ;;  %v3610_v55 = vld [vmem:[%s6630_s9 + $0xbd0] sm:$0xff]  ;;  %v3579_v49 = vld [vmem:[%s6630_s9 + $0xad8] sm:$0xff] }
 0xca3   :  { %3480 = vmatmul.msk.f32.vlgmr.msra.gmra.mxu1 %vm133_vm1, %v5588_v34  ;;  %3482 = vmatmul.msk.f32.vlgmr.msrb.gmra.mxu2 %vm133_vm1, %v5588_v34 }
 0xca4   :  { %3484 = vmatmul.msk.f32.vlgmr.msra.gmra.mxu3 %vm133_vm1, %v5588_v34  ;;  %3486 = vmatmul.msk.f32.vlgmr.msra.gmra.mxu0 %vm133_vm1, %v5588_v34 }
 0xca5   :  { %2814 = vmatpush.msrb.mxu1 %v3497_v52  ;;  %2883 = vmatpush.msrb.mxu0 %v3545_v58  ;;  %v3595_v52 = vld [vmem:[%s6630_s9 + $0xb58] sm:$0xff]  ;;  %v3561_v58 = vld [vmem:[%s6630_s9 + $0xa48] sm:$0xff] }
 0xca6   :  { %2837 = vmatpush.msra.mxu2 %v3513_v30  ;;  %2860 = vmatpush.msrb.mxu3 %v3529_v10  ;;  %v3609_v30 = vld [vmem:[%s6630_s9 + $0xbc8] sm:$0xff]  ;;  %v3578_v10 = vld [vmem:[%s6630_s9 + $0xad0] sm:$0xff] }
 0xca7   :  { %2815 = vmatpush.msrb.mxu1 %v3496_v57  ;;  %2884 = vmatpush.msrb.mxu0 %v3544_v62  ;;  %v3594_v57 = vld [vmem:[%s6630_s9 + $0xb50] sm:$0xff]  ;;  %v3560_v62 = vld [vmem:[%s6630_s9 + $0xa40] sm:$0xff] }
 0xca8   :  { %2838 = vmatpush.msra.mxu2 %v3512_v20  ;;  %2861 = vmatpush.msrb.mxu3 %v3528_v31  ;;  %v3608_v20 = vld [vmem:[%s6630_s9 + $0xbc0] sm:$0xff]  ;;  %v3577_v31 = vld [vmem:[%s6630_s9 + $0xac8] sm:$0xff] }
 0xca9   :  { %2816 = vmatpush.msrb.mxu1 %v3495_v63  ;;  %2885 = vmatpush.msrb.mxu0 %v3543_v46  ;;  %v3593_v63 = vld [vmem:[%s6630_s9 + $0xb48] sm:$0xff]  ;;  %v3559_v46 = vld [vmem:[%s6630_s9 + $0xa38] sm:$0xff] }
 0xcaa   :  { %2839 = vmatpush.msra.mxu2 %v3511_v33  ;;  %2862 = vmatpush.msrb.mxu3 %v3527_v60  ;;  %v3607_v33 = vld [vmem:[%s6630_s9 + $0xbb8] sm:$0xff]  ;;  %v3576_v60 = vld [vmem:[%s6630_s9 + $0xac0] sm:$0xff] }
 0xcab   :  { %3481 = vmatmul.msk.f32.gmra.mxu1 %vm133_vm1, %v5635_v2  ;;  %3483 = vmatmul.msk.f32.gmra.mxu2 %vm133_vm1, %v5635_v2 }
 0xcac   :  { %3485 = vmatmul.msk.f32.gmra.mxu3 %vm133_vm1, %v5635_v2  ;;  %3487 = vmatmul.msk.f32.gmra.mxu0 %vm133_vm1, %v5635_v2 }
 0xcad   :  { %2817 = vmatpush.msrb.mxu1 %v3494_v59  ;;  %2886 = vmatpush.msrb.mxu0 %v3542_v41  ;;  %v3592_v59 = vld [vmem:[%s6630_s9 + $0xb40] sm:$0xff]  ;;  %v3558_v41 = vld [vmem:[%s6630_s9 + $0xa30] sm:$0xff] }
 0xcae   :  { %2840 = vmatpush.msra.mxu2 %v3510_v61  ;;  %2863 = vmatpush.msrb.mxu3 %v3526_v0  ;;  %v3606_v61 = vld [vmem:[%s6630_s9 + $0xbb0] sm:$0xff]  ;;  %v3575_v0 = vld [vmem:[%s6630_s9 + $0xab8] sm:$0xff] }
 0xcaf   :  { %2818 = vmatpush.msrb.mxu1 %v3493_v1  ;;  %2887 = vmatpush.msrb.mxu0 %v3541_v3  ;;  %v3591_v1 = vld [vmem:[%s6630_s9 + $0xb38] sm:$0xff]  ;;  %v3557_v3 = vld [vmem:[%s6630_s9 + $0xa28] sm:$0xff] }
 0xcb0   :  { %2841 = vmatpush.msra.mxu2 %v3509_v4  ;;  %2864 = vmatpush.msrb.mxu3 %v3525_v5  ;;  %v3605_v4 = vld [vmem:[%s6630_s9 + $0xba8] sm:$0xff]  ;;  %v3574_v5 = vld [vmem:[%s6630_s9 + $0xab0] sm:$0xff] }
 0xcb1   :  { %2819 = vmatpush.msrb.mxu1 %v3492_v6  ;;  %2888 = vmatpush.msrb.mxu0 %v3540_v42  ;;  %v3590_v6 = vld [vmem:[%s6630_s9 + $0xb30] sm:$0xff]  ;;  %v3556_v42 = vld [vmem:[%s6630_s9 + $0xa20] sm:$0xff] }
 0xcb2   :  { %2842 = vmatpush.msra.mxu2 %v3508_v7  ;;  %2865 = vmatpush.msrb.mxu3 %v3524_v8  ;;  %v3604_v7 = vld [vmem:[%s6630_s9 + $0xba0] sm:$0xff]  ;;  %v3555_v8 = vld [vmem:[%s6630_s9 + $0xa18] sm:$0xff] }
 0xcb3   :  { %2820 = vmatpush.msrb.mxu1 %v3491_v9  ;;  %2889 = vmatpush.msrb.mxu0 %v3539_v11  ;;  %v3603_v9 = vld [vmem:[%s6630_s9 + $0xb98] sm:$0xff]  ;;  %v3554_v11 = vld [vmem:[%s6630_s9 + $0xa10] sm:$0xff] }
 0xcb4   :  { %2843 = vmatpush.msra.mxu2 %v3507_v12  ;;  %2866 = vmatpush.msrb.mxu3 %v3523_v13  ;;  %v3573_v12 = vld [vmem:[%s6630_s9 + $0xaa8] sm:$0xff] }
 0xcb5   :  { %2821 = vmatpush.msrb.mxu1 %v3490_v16  ;;  %2890 = vmatpush.msrb.mxu0 %v3538_v19  ;;  %v3589_v13 = vld [vmem:[%s6630_s9 + $0xb28] sm:$0xff]  ;;  %v3602_v16 = vld [vmem:[%s6630_s9 + $0xb90] sm:$0xff] }
 0xcb6   :  { %2844 = vmatpush.msra.mxu2 %v3506_v23  ;;  %2867 = vmatpush.msrb.mxu3 %v3522_v24  ;;  %v3553_v19 = vld [vmem:[%s6630_s9 + $0xa08] sm:$0xff]  ;;  %v3572_v23 = vld [vmem:[%s6630_s9 + $0xaa0] sm:$0xff] }
 0xcb7   :  { %2822 = vmatpush.msrb.mxu1 %v3489_v14  ;;  %2891 = vmatpush.msrb.mxu0 %v3537_v27  ;;  %v3588_v24 = vld [vmem:[%s6630_s9 + $0xb20] sm:$0xff]  ;;  %v3601_v14 = vld [vmem:[%s6630_s9 + $0xb88] sm:$0xff]  ;;  %v3571_v27 = vld [vmem:[%s6630_s9 + $0xa98] sm:$0xff] }
 0xcb8   :  { %2845 = vmatpush.msra.mxu2 %v3505_v17  ;;  %2868 = vmatpush.msrb.mxu3 %v3521_v15  ;;  %v3552_v17 = vld [vmem:[%s6630_s9 + $0xa00] sm:$0xff]  ;;  %v3587_v15 = vld [vmem:[%s6630_s9 + $0xb18] sm:$0xff] }
 0xcb9   :  { %2823 = vmatpush.msrb.mxu1 %v3488_v18  ;;  %2892 = vmatpush.msrb.mxu0 %v3536_v45  ;;  %v3600_v18 = vld [vmem:[%s6630_s9 + $0xb80] sm:$0xff]  ;;  %v3570_v45 = vld [vmem:[%s6630_s9 + $0xa90] sm:$0xff] }
 0xcba   :  { %2846 = vmatpush.msra.mxu2 %v3504_v39  ;;  %2869 = vmatpush.msrb.mxu3 %v3520_v43  ;;  %v3585_v39 = vld [vmem:[%s6630_s9 + $0xb08] sm:$0xff]  ;;  %v3568_v43 = vld [vmem:[%s6630_s9 + $0xa80] sm:$0xff] }
 0xcbb   :  { %2900 = vmatpush.msra.mxu1 %v3567_v37  ;;  %2969 = vmatpush.msra.mxu0 %v3615_v38  ;;  %v3586_v37 = vld [vmem:[%s6630_s9 + $0xb10] sm:$0xff]  ;;  %v3569_v38 = vld [vmem:[%s6630_s9 + $0xa88] sm:$0xff] }
 0xcbc   :  { %2923 = vmatpush.msrb.mxu2 %v3583_v48  ;;  %2946 = vmatpush.msra.mxu3 %v3599_v50 }
 0xcbd   :  { %2901 = vmatpush.msra.mxu1 %v3566_v44  ;;  %2970 = vmatpush.msra.mxu0 %v3614_v47  ;;  %v3584_v44 = vld [vmem:[%s6630_s9 + $0xb00] sm:$0xff]  ;;  %v6140_v47 = vld [vmem:[%s6629_s8 + $0x10] sm:$0xff] }
 0xcbe   :  { %2924 = vmatpush.msrb.mxu2 %v3582_v25  ;;  %2947 = vmatpush.msra.mxu3 %v3598_v53  ;;  %v2108_v48 = vperm.slane %v6140_v47, 0  ;;  %v2111_v50 = vperm.slane %v6140_v47, 3 }
 0xcbf   :  { %2902 = vmatpush.msra.mxu1 %v3565_v51  ;;  %2971 = vmatpush.msra.mxu0 %v3613_v26 }
 0xcc0   :  { %2925 = vmatpush.msrb.mxu2 %v3581_v28  ;;  %2948 = vmatpush.msra.mxu3 %v3597_v54  ;;  %v2109_v28 = vperm.slane %v6140_v47, 1 }
 0xcc1   :  { %2903 = vmatpush.msra.mxu1 %v3564_v21  ;;  %2972 = vmatpush.msra.mxu0 %v3612_v22  ;;  %v3631_v22 = vld [vmem:[%s6630_s9 + $0xc78] sm:$0xff] }
 0xcc2   :  { %2926 = vmatpush.msrb.mxu2 %v3580_v40  ;;  %2949 = vmatpush.msra.mxu3 %v3596_v56  ;;  %v3630_v40 = vld [vmem:[%s6630_s9 + $0xc70] sm:$0xff] }
 0xcc3   :  { %2904 = vmatpush.msra.mxu1 %v3563_v29  ;;  %2973 = vmatpush.msra.mxu0 %v3611_v36  ;;  %v3679_v29 = vld [vmem:[%s6630_s9 + $0xdf8] sm:$0xff]  ;;  %v2110_v36 = vperm.slane %v6140_v47, 2 }
 0xcc4   :  { %2927 = vmatpush.msrb.mxu2 %v3579_v49  ;;  %2950 = vmatpush.msra.mxu3 %v3595_v52  ;;  %v3629_v52 = vld [vmem:[%s6630_s9 + $0xc68] sm:$0xff] }
 0xcc5   :  { %2905 = vmatpush.msra.mxu1 %v3562_v35  ;;  %2974 = vmatpush.msra.mxu0 %v3610_v55  ;;  %v3678_v35 = vld [vmem:[%s6630_s9 + $0xdf0] sm:$0xff] }
 0xcc6   :  { %2928 = vmatpush.msrb.mxu2 %v3578_v10  ;;  %2951 = vmatpush.msra.mxu3 %v3594_v57  ;;  %v3677_v10 = vld [vmem:[%s6630_s9 + $0xde8] sm:$0xff] }
 0xcc7   :  { %2906 = vmatpush.msra.mxu1 %v3561_v58  ;;  %2975 = vmatpush.msra.mxu0 %v3609_v30 }
 0xcc8   :  { %2929 = vmatpush.msrb.mxu2 %v3577_v31  ;;  %2952 = vmatpush.msra.mxu3 %v3593_v63  ;;  %v3628_v31 = vld [vmem:[%s6630_s9 + $0xc60] sm:$0xff] }
 0xcc9   :  { %2907 = vmatpush.msra.mxu1 %v3560_v62  ;;  %2976 = vmatpush.msra.mxu0 %v3608_v20 }
 0xcca   :  { %2930 = vmatpush.msrb.mxu2 %v3576_v60  ;;  %2953 = vmatpush.msra.mxu3 %v3592_v59  ;;  %v3663_v60 = vld [vmem:[%s6630_s9 + $0xd78] sm:$0xff] }
 0xccb   :  { %2908 = vmatpush.msra.mxu1 %v3559_v46  ;;  %2977 = vmatpush.msra.mxu0 %v3607_v33  ;;  %v3647_v33 = vld [vmem:[%s6630_s9 + $0xcf8] sm:$0xff] }
 0xccc   :  { %2931 = vmatpush.msrb.mxu2 %v3575_v0  ;;  %2954 = vmatpush.msra.mxu3 %v3591_v1  ;;  %v3627_v0 = vld [vmem:[%s6630_s9 + $0xc58] sm:$0xff]  ;;  %v3646_v1 = vld [vmem:[%s6630_s9 + $0xcf0] sm:$0xff] }
 0xccd   :  { %2909 = vmatpush.msra.mxu1 %v3558_v41  ;;  %2978 = vmatpush.msra.mxu0 %v3606_v61  ;;  %v3676_v41 = vld [vmem:[%s6630_s9 + $0xde0] sm:$0xff] }
 0xcce   :  { %2932 = vmatpush.msrb.mxu2 %v3574_v5  ;;  %2955 = vmatpush.msra.mxu3 %v3590_v6  ;;  %v3675_v5 = vld [vmem:[%s6630_s9 + $0xdd8] sm:$0xff] }
 0xccf   :  { %2910 = vmatpush.msra.mxu1 %v3557_v3  ;;  %2979 = vmatpush.msra.mxu0 %v3605_v4  ;;  %v3662_v3 = vld [vmem:[%s6630_s9 + $0xd70] sm:$0xff]  ;;  %v2112_v4 = vperm.slane %v6140_v47, 4 }
 0xcd0   :  { %2933 = vmatpush.msrb.mxu2 %v3573_v12  ;;  %2956 = vmatpush.msra.mxu3 %v3589_v13  ;;  %v3661_v12 = vld [vmem:[%s6630_s9 + $0xd68] sm:$0xff] }
 0xcd1   :  { %2911 = vmatpush.msra.mxu1 %v3556_v42  ;;  %2980 = vmatpush.msra.mxu0 %v3604_v7  ;;  %v3626_v42 = vld [vmem:[%s6630_s9 + $0xc50] sm:$0xff]  ;;  %v2115_v7 = vperm.slane %v6140_v47, 7 }
 0xcd2   :  { %2934 = vmatpush.msrb.mxu2 %v3572_v23  ;;  %2957 = vmatpush.msra.mxu3 %v3588_v24  ;;  %v3625_v23 = vld [vmem:[%s6630_s9 + $0xc48] sm:$0xff] }
 0xcd3   :  { %2912 = vmatpush.msra.mxu1 %v3555_v8  ;;  %2981 = vmatpush.msra.mxu0 %v3603_v9 }
 0xcd4   :  { %2935 = vmatpush.msrb.mxu2 %v3571_v27  ;;  %2958 = vmatpush.msra.mxu3 %v3587_v15  ;;  %v3660_v15 = vld [vmem:[%s6630_s9 + $0xd60] sm:$0xff] }
 0xcd5   :  { %2913 = vmatpush.msra.mxu1 %v3554_v11  ;;  %2982 = vmatpush.msra.mxu0 %v3602_v16  ;;  %v3645_v11 = vld [vmem:[%s6630_s9 + $0xce8] sm:$0xff]  ;;  %v3674_v16 = vld [vmem:[%s6630_s9 + $0xdd0] sm:$0xff] }
 0xcd6   :  { %2936 = vmatpush.msrb.mxu2 %v3570_v45  ;;  %2959 = vmatpush.msra.mxu3 %v3586_v37  ;;  %v3673_v37 = vld [vmem:[%s6630_s9 + $0xdc8] sm:$0xff] }
 0xcd7   :  { %2914 = vmatpush.msra.mxu1 %v3553_v19  ;;  %2983 = vmatpush.msra.mxu0 %v3601_v14 }
 0xcd8   :  { %2937 = vmatpush.msrb.mxu2 %v3569_v38  ;;  %2960 = vmatpush.msra.mxu3 %v3585_v39  ;;  %v3624_v38 = vld [vmem:[%s6630_s9 + $0xc40] sm:$0xff]  ;;  %v2113_v39 = vperm.slane %v6140_v47, 5 }
 0xcd9   :  { %2915 = vmatpush.msra.mxu1 %v3552_v17  ;;  %2984 = vmatpush.msra.mxu0 %v3600_v18  ;;  %v3644_v17 = vld [vmem:[%s6630_s9 + $0xce0] sm:$0xff] }
 0xcda   :  { %2938 = vmatpush.msrb.mxu2 %v3568_v43  ;;  %2961 = vmatpush.msra.mxu3 %v3584_v44  ;;  %v3643_v44 = vld [vmem:[%s6630_s9 + $0xcd8] sm:$0xff] }
 0xcf0   :  { %v2163_v51 = vpop.f32.mrf.mxu1 }
 0xcf1   :  { %v2164_v26 = vadd.f32 %v2163_v51, %v2108_v48  ;;  %v2232_v25 = vpop.f32.mrf.mxu0 }
 0xcf2   :  { %v2233_v53 = vadd.f32 %v2232_v25, %v2111_v50  ;;  %v3623_v25 = vld [vmem:[%s6630_s9 + $0xc38] sm:$0xff] }
 0xcf3   :  { %v2514_v21 = vmax.f32 %v2164_v26, 0.0  ;;  %v3672_v26 = vld [vmem:[%s6630_s9 + $0xdc0] sm:$0xff] }
 0xcf4   :  { %v2517_v54 = vmax.f32 %v2233_v53, 0.0 }
 0xcf5   :  { %2824 = vmatmul.f32.vlgmr.msrb.gmra.mxu1 %v2514_v21  ;;  %v3642_v21 = vld [vmem:[%s6630_s9 + $0xcd0] sm:$0xff] }
 0xcf6   :  { %2893 = vmatmul.f32.vlgmr.msrb.gmra.mxu0 %v2517_v54  ;;  %2992 = vmatpush.msrb.mxu1 %v3631_v22  ;;  %v2186_v56 = vpop.f32.mrf.mxu2  ;;  %v3658_v22 = vld [vmem:[%s6630_s9 + $0xd50] sm:$0xff] }
 0xcf7   :  { %3061 = vmatpush.msrb.mxu0 %v3679_v29  ;;  %v2187_v55 = vadd.f32 %v2186_v56, %v2109_v28  ;;  %v2209_v49 = vpop.f32.mrf.mxu3  ;;  %v3671_v29 = vld [vmem:[%s6630_s9 + $0xdb8] sm:$0xff] }
 0xcf8   :  { %v2210_v58 = vadd.f32 %v2209_v49, %v2110_v36  ;;  %2993 = vmatpush.msrb.mxu1 %v3630_v40  ;;  %v2166_v30 = vpop.f32.mrf.mxu1  ;;  %v3622_v40 = vld [vmem:[%s6630_s9 + $0xc30] sm:$0xff] }
 0xcf9   :  { %v2515_v57 = vmax.f32 %v2187_v55, 0.0  ;;  %3062 = vmatpush.msrb.mxu0 %v3678_v35  ;;  %v2167_v62 = vadd.f32 %v2166_v30, %v2108_v48  ;;  %v2235_v20 = vpop.f32.mrf.mxu0  ;;  %v3659_v48 = vld [vmem:[%s6630_s9 + $0xd58] sm:$0xff]  ;;  %v3641_v35 = vld [vmem:[%s6630_s9 + $0xcc8] sm:$0xff] }
 0xcfa   :  { %v2516_v63 = vmax.f32 %v2210_v58, 0.0  ;;  %v2236_v46 = vadd.f32 %v2235_v20, %v2111_v50  ;;  %2994 = vmatpush.msrb.mxu1 %v3629_v52  ;;  %v2114_v50 = vperm.slane %v6140_v47, 6  ;;  %v3657_v55 = vld [vmem:[%s6630_s9 + $0xd48] sm:$0xff]  ;;  %v3670_v52 = vld [vmem:[%s6630_s9 + $0xdb0] sm:$0xff]  ;;  %v3656_v20 = vld [vmem:[%s6630_s9 + $0xd40] sm:$0xff] }
 0xcfb   :  { %v2530_v59 = vmax.f32 %v2167_v62, 0.0  ;;  %3063 = vmatpush.msrb.mxu0 %v3677_v10  ;;  %2847 = vmatmul.f32.vlgmr.msra.gmra.mxu2 %v2515_v57  ;;  %v3621_v30 = vld [vmem:[%s6630_s9 + $0xc28] sm:$0xff]  ;;  %v3640_v62 = vld [vmem:[%s6630_s9 + $0xcc0] sm:$0xff]  ;;  %v3666_v47 = vld [vmem:[%s6630_s9 + $0xd90] sm:$0xff] }
 0xcfc   :  { %v2533_v61 = vmax.f32 %v2236_v46, 0.0  ;;  %2870 = vmatmul.f32.vlgmr.msrb.gmra.mxu3 %v2516_v63  ;;  %2995 = vmatpush.msrb.mxu1 %v3628_v31  ;;  %v3669_v63 = vld [vmem:[%s6630_s9 + $0xda8] sm:$0xff]  ;;  %v3620_v46 = vld [vmem:[%s6630_s9 + $0xc20] sm:$0xff] }
 0xcfd   :  { %3015 = vmatpush.msra.mxu2 %v3647_v33  ;;  %3038 = vmatpush.msrb.mxu3 %v3663_v60  ;;  %v3639_v60 = vld [vmem:[%s6630_s9 + $0xcb8] sm:$0xff] }
 0xcfe   :  { %3064 = vmatpush.msrb.mxu0 %v3676_v41  ;;  %2827 = vmatmul.f32.gmra.mxu1 %v2530_v59  ;;  %v2189_v6 = vpop.f32.mrf.mxu2  ;;  %v3655_v59 = vld [vmem:[%s6630_s9 + $0xd38] sm:$0xff] }
 0xcff   :  { %2896 = vmatmul.f32.gmra.mxu0 %v2533_v61  ;;  %2996 = vmatpush.msrb.mxu1 %v3627_v0  ;;  %v2190_v8 = vadd.f32 %v2189_v6, %v2109_v28  ;;  %v2212_v9 = vpop.f32.mrf.mxu3  ;;  %v6288_v61 = vld [vmem:[%s6629_s8 + $0x18] sm:$0xff]  ;;  %v3654_v6 = vld [vmem:[%s6630_s9 + $0xd30] sm:$0xff] }
 0xd00   :  { %3016 = vmatpush.msra.mxu2 %v3646_v1  ;;  %3039 = vmatpush.msrb.mxu3 %v3662_v3  ;;  %v2213_v13 = vadd.f32 %v2212_v9, %v2110_v36  ;;  %v2255_v19 = vpop.f32.mrf.mxu1  ;;  %v3668_v1 = vld [vmem:[%s6630_s9 + $0xda0] sm:$0xff] }
 0xd01   :  { %3065 = vmatpush.msrb.mxu0 %v3675_v5  ;;  %v2531_v24 = vmax.f32 %v2190_v8, 0.0  ;;  %2997 = vmatpush.msrb.mxu1 %v3626_v42  ;;  %v2256_v14 = vadd.f32 %v2255_v19, %v2112_v4  ;;  %v2324_v27 = vpop.f32.mrf.mxu0  ;;  %v3638_v5 = vld [vmem:[%s6630_s9 + $0xcb0] sm:$0xff]  ;;  %v3667_v8 = vld [vmem:[%s6630_s9 + $0xd98] sm:$0xff]  ;;  %v2119_v19 = vperm.slane %v6288_v61, 3 }
 0xd02   :  { %v2532_v18 = vmax.f32 %v2213_v13, 0.0  ;;  %3017 = vmatpush.msra.mxu2 %v3645_v11  ;;  %3040 = vmatpush.msrb.mxu3 %v3661_v12  ;;  %v2325_v45 = vadd.f32 %v2324_v27, %v2115_v7  ;;  %v3618_v11 = vld [vmem:[%s6630_s9 + $0xc10] sm:$0xff]  ;;  %v3637_v13 = vld [vmem:[%s6630_s9 + $0xca8] sm:$0xff] }
 0xd03   :  { %3066 = vmatpush.msrb.mxu0 %v3674_v16  ;;  %2998 = vmatpush.msrb.mxu1 %v3625_v23  ;;  %v2518_v43 = vmax.f32 %v2256_v14, 0.0  ;;  %v3653_v16 = vld [vmem:[%s6630_s9 + $0xd28] sm:$0xff] }
 0xd04   :  { %3018 = vmatpush.msra.mxu2 %v3644_v17  ;;  %3041 = vmatpush.msrb.mxu3 %v3660_v15  ;;  %v2521_v51 = vmax.f32 %v2325_v45, 0.0  ;;  %v3636_v17 = vld [vmem:[%s6630_s9 + $0xca0] sm:$0xff]  ;;  %v3665_v45 = vld [vmem:[%s6630_s9 + $0xd88] sm:$0xff] }
 0xd05   :  { %3067 = vmatpush.msrb.mxu0 %v3673_v37  ;;  %2850 = vmatmul.f32.gmra.mxu2 %v2531_v24  ;;  %v3617_v24 = vld [vmem:[%s6630_s9 + $0xc08] sm:$0xff]  ;;  %v3652_v15 = vld [vmem:[%s6630_s9 + $0xd20] sm:$0xff] }
 0xd06   :  { %2873 = vmatmul.f32.gmra.mxu3 %v2532_v18  ;;  %2999 = vmatpush.msrb.mxu1 %v3624_v38  ;;  %v2278_v53 = vpop.f32.mrf.mxu2  ;;  %v3616_v38 = vld [vmem:[%s6630_s9 + $0xc00] sm:$0xff] }
 0xd07   :  { %3019 = vmatpush.msra.mxu2 %v3643_v44  ;;  %3042 = vmatpush.msrb.mxu3 %v3659_v48  ;;  %v2279_v28 = vadd.f32 %v2278_v53, %v2113_v39  ;;  %v2301_v54 = vpop.f32.mrf.mxu3  ;;  %v3664_v48 = vld [vmem:[%s6630_s9 + $0xd80] sm:$0xff]  ;;  %v2118_v53 = vperm.slane %v6288_v61, 2 }
 0xd08   :  { %3068 = vmatpush.msrb.mxu0 %v3672_v26  ;;  %2916 = vmatmul.f32.vlgmr.msra.gmra.mxu1 %v2518_v43  ;;  %v2302_v36 = vadd.f32 %v2301_v54, %v2114_v50  ;;  %v2258_v56 = vpop.f32.mrf.mxu1  ;;  %v3651_v43 = vld [vmem:[%s6630_s9 + $0xd18] sm:$0xff] }
 0xd09   :  { %2985 = vmatmul.f32.vlgmr.msra.gmra.mxu0 %v2521_v51  ;;  %3000 = vmatpush.msrb.mxu1 %v3623_v25  ;;  %v2327_v49 = vpop.f32.mrf.mxu0  ;;  %v2259_v58 = vadd.f32 %v2258_v56, %v2112_v4  ;;  %v2519_v10 = vmax.f32 %v2279_v28, 0.0  ;;  %v3619_v4 = vld [vmem:[%s6630_s9 + $0xc18] sm:$0xff]  ;;  %v2117_v51 = vperm.slane %v6288_v61, 1  ;;  %v3650_v28 = vld [vmem:[%s6630_s9 + $0xd10] sm:$0xff]  ;;  %v3633_v56 = vld [vmem:[%s6630_s9 + $0xc88] sm:$0xff] }
 0xd0a   :  { %3020 = vmatpush.msra.mxu2 %v3642_v21  ;;  %3043 = vmatpush.msrb.mxu3 %v3658_v22  ;;  %v2328_v57 = vadd.f32 %v2327_v49, %v2115_v7  ;;  %v2520_v31 = vmax.f32 %v2302_v36, 0.0  ;;  %v2116_v7 = vperm.slane %v6288_v61, 0  ;;  %v3743_v26 = vld [vmem:[%s6630_s9 + $0xff8] sm:$0xff]  ;;  %v3634_v22 = vld [vmem:[%s6630_s9 + $0xc90] sm:$0xff]  ;;  %v3649_v49 = vld [vmem:[%s6630_s9 + $0xd08] sm:$0xff] }
 0xd0b   :  { %3069 = vmatpush.msrb.mxu0 %v3671_v29  ;;  %3001 = vmatpush.msrb.mxu1 %v3622_v40  ;;  %v2534_v33 = vmax.f32 %v2259_v58, 0.0  ;;  %v3694_v29 = vld [vmem:[%s6630_s9 + $0xe70] sm:$0xff]  ;;  %v3693_v58 = vld [vmem:[%s6630_s9 + $0xe68] sm:$0xff] }
 0xd0c   :  { %3021 = vmatpush.msra.mxu2 %v3641_v35  ;;  %3044 = vmatpush.msrb.mxu3 %v3657_v55  ;;  %v2537_v0 = vmax.f32 %v2328_v57, 0.0  ;;  %v3742_v40 = vld [vmem:[%s6630_s9 + $0xff0] sm:$0xff] }
 0xd0d   :  { %3070 = vmatpush.msrb.mxu0 %v3670_v52  ;;  %3002 = vmatpush.msrb.mxu1 %v3621_v30  ;;  %v3741_v30 = vld [vmem:[%s6630_s9 + $0xfe8] sm:$0xff] }
 0xd0e   :  { %3022 = vmatpush.msra.mxu2 %v3640_v62  ;;  %3045 = vmatpush.msrb.mxu3 %v3656_v20  ;;  %v2281_v41 = vpop.f32.mrf.mxu2  ;;  %v3648_v62 = vld [vmem:[%s6630_s9 + $0xd00] sm:$0xff] }
 0xd0f   :  { %3071 = vmatpush.msrb.mxu0 %v3669_v63  ;;  %2939 = vmatmul.f32.vlgmr.msrb.gmra.mxu2 %v2519_v10  ;;  %v2304_v3 = vpop.f32.mrf.mxu3  ;;  %v2282_v42 = vadd.f32 %v2281_v41, %v2113_v39  ;;  %v3635_v39 = vld [vmem:[%s6630_s9 + $0xc98] sm:$0xff]  ;;  %v3632_v10 = vld [vmem:[%s6630_s9 + $0xc80] sm:$0xff] }
 0xd10   :  { %2962 = vmatmul.f32.vlgmr.msra.gmra.mxu3 %v2520_v31  ;;  %3003 = vmatpush.msrb.mxu1 %v3620_v46  ;;  %v2305_v9 = vadd.f32 %v2304_v3, %v2114_v50  ;;  %v2347_v12 = vpop.f32.mrf.mxu1  ;;  %v3695_v50 = vld [vmem:[%s6630_s9 + $0xe78] sm:$0xff]  ;;  %v3692_v20 = vld [vmem:[%s6630_s9 + $0xe60] sm:$0xff]  ;;  %v3726_v3 = vld [vmem:[%s6630_s9 + $0xf70] sm:$0xff] }
 0xd11   :  { %3023 = vmatpush.msra.mxu2 %v3639_v60  ;;  %3046 = vmatpush.msrb.mxu3 %v3655_v59  ;;  %v2416_v23 = vpop.f32.mrf.mxu0  ;;  %v2535_v14 = vmax.f32 %v2282_v42, 0.0  ;;  %v2348_v27 = vadd.f32 %v2347_v12, %v2116_v7  ;;  %v3711_v46 = vld [vmem:[%s6630_s9 + $0xef8] sm:$0xff]  ;;  %v3740_v59 = vld [vmem:[%s6630_s9 + $0xfe0] sm:$0xff] }
 0xd12   :  { %3072 = vmatpush.msrb.mxu0 %v3668_v1  ;;  %2919 = vmatmul.f32.gmra.mxu1 %v2534_v33  ;;  %v2536_v18 = vmax.f32 %v2305_v9, 0.0  ;;  %v2417_v37 = vadd.f32 %v2416_v23, %v2119_v19  ;;  %v3727_v33 = vld [vmem:[%s6630_s9 + $0xf78] sm:$0xff]  ;;  %v3710_v1 = vld [vmem:[%s6630_s9 + $0xef0] sm:$0xff]  ;;  %v3709_v9 = vld [vmem:[%s6630_s9 + $0xee8] sm:$0xff] }
 0xd13   :  { %2988 = vmatmul.f32.gmra.mxu0 %v2537_v0  ;;  %3004 = vmatpush.msrb.mxu1 %v3619_v4  ;;  %v2522_v44 = vmax.f32 %v2348_v27, 0.0  ;;  %v3691_v41 = vld [vmem:[%s6630_s9 + $0xe58] sm:$0xff]  ;;  %v3737_v23 = vld [vmem:[%s6630_s9 + $0xfc8] sm:$0xff] }
 0xd14   :  { %3024 = vmatpush.msra.mxu2 %v3638_v5  ;;  %3047 = vmatpush.msrb.mxu3 %v3654_v6  ;;  %v2525_v21 = vmax.f32 %v2417_v37, 0.0  ;;  %v3739_v6 = vld [vmem:[%s6630_s9 + $0xfd8] sm:$0xff]  ;;  %v3706_v37 = vld [vmem:[%s6630_s9 + $0xed0] sm:$0xff] }
 0xd15   :  { %3073 = vmatpush.msrb.mxu0 %v3667_v8  ;;  %3005 = vmatpush.msrb.mxu1 %v3618_v11  ;;  %v3725_v11 = vld [vmem:[%s6630_s9 + $0xf68] sm:$0xff]  ;;  %v3707_v27 = vld [vmem:[%s6630_s9 + $0xed8] sm:$0xff] }
 0xd16   :  { %3025 = vmatpush.msra.mxu2 %v3637_v13  ;;  %3048 = vmatpush.msrb.mxu3 %v3653_v16  ;;  %v2370_v25 = vpop.f32.mrf.mxu2  ;;  %v3738_v13 = vld [vmem:[%s6630_s9 + $0xfd0] sm:$0xff]  ;;  %v3689_v16 = vld [vmem:[%s6630_s9 + $0xe48] sm:$0xff] }
 0xd17   :  { %3074 = vmatpush.msrb.mxu0 %v3666_v47  ;;  %3006 = vmatpush.msrb.mxu1 %v3617_v24  ;;  %v2393_v54 = vpop.f32.mrf.mxu3  ;;  %v2371_v36 = vadd.f32 %v2370_v25, %v2117_v51  ;;  %v3724_v47 = vld [vmem:[%s6630_s9 + $0xf60] sm:$0xff] }
 0xd18   :  { %3026 = vmatpush.msra.mxu2 %v3636_v17  ;;  %3049 = vmatpush.msrb.mxu3 %v3652_v15  ;;  %v2350_v35 = vpop.f32.mrf.mxu1  ;;  %v2394_v55 = vadd.f32 %v2393_v54, %v2118_v53  ;;  %v3688_v24 = vld [vmem:[%s6630_s9 + $0xe40] sm:$0xff]  ;;  %v3723_v17 = vld [vmem:[%s6630_s9 + $0xf58] sm:$0xff] }
 0xd19   :  { %3075 = vmatpush.msrb.mxu0 %v3665_v45  ;;  %2942 = vmatmul.f32.gmra.mxu2 %v2535_v14  ;;  %v2419_v52 = vpop.f32.mrf.mxu0  ;;  %v2351_v57 = vadd.f32 %v2350_v35, %v2116_v7  ;;  %v2523_v31 = vmax.f32 %v2371_v36, 0.0  ;;  %v3690_v7 = vld [vmem:[%s6630_s9 + $0xe50] sm:$0xff]  ;;  %v3687_v45 = vld [vmem:[%s6630_s9 + $0xe38] sm:$0xff]  ;;  %v3720_v25 = vld [vmem:[%s6630_s9 + $0xf40] sm:$0xff] }
 0xd1a   :  { %2965 = vmatmul.f32.gmra.mxu3 %v2536_v18  ;;  %3007 = vmatpush.msrb.mxu1 %v3616_v38  ;;  %v2420_v63 = vadd.f32 %v2419_v52, %v2119_v19  ;;  %v2524_v60 = vmax.f32 %v2394_v55, 0.0  ;;  %v3708_v19 = vld [vmem:[%s6630_s9 + $0xee0] sm:$0xff]  ;;  %v3722_v38 = vld [vmem:[%s6630_s9 + $0xf50] sm:$0xff]  ;;  %v3683_v36 = vld [vmem:[%s6630_s9 + $0xe18] sm:$0xff] }
 0xd1b   :  { %3027 = vmatpush.msra.mxu2 %v3635_v39  ;;  %3050 = vmatpush.msrb.mxu3 %v3651_v43  ;;  %v2538_v0 = vmax.f32 %v2351_v57, 0.0  ;;  %v3736_v18 = vld [vmem:[%s6630_s9 + $0xfc0] sm:$0xff]  ;;  %v3735_v39 = vld [vmem:[%s6630_s9 + $0xfb8] sm:$0xff]  ;;  %v3686_v43 = vld [vmem:[%s6630_s9 + $0xe30] sm:$0xff] }
 0xd1c   :  { %3076 = vmatpush.msrb.mxu0 %v3664_v48  ;;  %3084 = vmatpush.msra.mxu1 %v3695_v50  ;;  %v2541_v5 = vmax.f32 %v2420_v63, 0.0  ;;  %v3721_v48 = vld [vmem:[%s6630_s9 + $0xf48] sm:$0xff]  ;;  %v3734_v50 = vld [vmem:[%s6630_s9 + $0xfb0] sm:$0xff]  ;;  %v3731_v52 = vld [vmem:[%s6630_s9 + $0xf98] sm:$0xff] }
 0xd1d   :  { %3008 = vmatmul.f32.vlgmr.msrb.gmra.mxu1 %v2522_v44  ;;  %3028 = vmatpush.msra.mxu2 %v3634_v22  ;;  %v3705_v44 = vld [vmem:[%s6630_s9 + $0xec8] sm:$0xff]  ;;  %v3703_v22 = vld [vmem:[%s6630_s9 + $0xeb8] sm:$0xff]  ;;  %v3702_v35 = vld [vmem:[%s6630_s9 + $0xeb0] sm:$0xff] }
 0xd1e   :  { %3153 = vmatpush.msra.mxu0 %v3743_v26  ;;  %3051 = vmatpush.msrb.mxu3 %v3650_v28  ;;  %v2373_v4 = vpop.f32.mrf.mxu2  ;;  %v3704_v26 = vld [vmem:[%s6630_s9 + $0xec0] sm:$0xff]  ;;  %v3719_v28 = vld [vmem:[%s6630_s9 + $0xf38] sm:$0xff]  ;;  %v3718_v55 = vld [vmem:[%s6630_s9 + $0xf30] sm:$0xff] }
 0xd1f   :  { %3077 = vmatmul.f32.vlgmr.msrb.gmra.mxu0 %v2525_v21  ;;  %3085 = vmatpush.msra.mxu1 %v3694_v29  ;;  %v2396_v42 = vpop.f32.mrf.mxu3  ;;  %v2374_v8 = vadd.f32 %v2373_v4, %v2117_v51  ;;  %v3685_v51 = vld [vmem:[%s6630_s9 + $0xe28] sm:$0xff]  ;;  %v3684_v21 = vld [vmem:[%s6630_s9 + $0xe20] sm:$0xff]  ;;  %v3730_v57 = vld [vmem:[%s6630_s9 + $0xf90] sm:$0xff]  ;;  %v2122_v4 = vperm.slane %v6288_v61, 6 }
 0xd20   :  { %3154 = vmatpush.msra.mxu0 %v3742_v40  ;;  %3029 = vmatpush.msra.mxu2 %v3633_v56  ;;  %v2397_v12 = vadd.f32 %v2396_v42, %v2118_v53  ;;  %v3733_v53 = vld [vmem:[%s6630_s9 + $0xfa8] sm:$0xff]  ;;  %v2439_v54 = vpop.f32.mrf.mxu1  ;;  %v3732_v29 = vld [vmem:[%s6630_s9 + $0xfa0] sm:$0xff]  ;;  %v2120_v40 = vperm.slane %v6288_v61, 4  ;;  %v3698_v42 = vld [vmem:[%s6630_s9 + $0xe90] sm:$0xff] }
 0xd21   :  { %3052 = vmatpush.msrb.mxu3 %v3649_v49  ;;  %3086 = vmatpush.msra.mxu1 %v3693_v58  ;;  %v2539_v14 = vmax.f32 %v2374_v8, 0.0  ;;  %v2508_v56 = vpop.f32.mrf.mxu0  ;;  %v2123_v49 = vperm.slane %v6288_v61, 7  ;;  %v3682_v58 = vld [vmem:[%s6630_s9 + $0xe10] sm:$0xff]  ;;  %v3716_v63 = vld [vmem:[%s6630_s9 + $0xf20] sm:$0xff] }
 0xd22   :  { %3155 = vmatpush.msra.mxu0 %v3741_v30  ;;  %3030 = vmatpush.msra.mxu2 %v3632_v10  ;;  %v2540_v15 = vmax.f32 %v2397_v12, 0.0  ;;  %v3701_v30 = vld [vmem:[%s6630_s9 + $0xea8] sm:$0xff] }
 0xd23   :  { %3053 = vmatpush.msrb.mxu3 %v3648_v62  ;;  %3087 = vmatpush.msra.mxu1 %v3692_v20  ;;  %v3717_v10 = vld [vmem:[%s6630_s9 + $0xf28] sm:$0xff]  ;;  %v2440_v20 = vadd.f32 %v2439_v54, %v2120_v40 }
 0xd24   :  { %3107 = vmatpush.msrb.mxu2 %v3711_v46  ;;  %3156 = vmatpush.msra.mxu0 %v3740_v59  ;;  %v3681_v62 = vld [vmem:[%s6630_s9 + $0xe08] sm:$0xff]  ;;  %v2509_v46 = vadd.f32 %v2508_v56, %v2123_v49  ;;  %v3680_v59 = vld [vmem:[%s6630_s9 + $0xe00] sm:$0xff] }
 0xd25   :  { %3130 = vmatpush.msra.mxu3 %v3727_v33  ;;  %3031 = vmatmul.f32.vlgmr.msra.gmra.mxu2 %v2523_v31  ;;  %v3700_v31 = vld [vmem:[%s6630_s9 + $0xea0] sm:$0xff]  ;;  %v3697_v12 = vld [vmem:[%s6630_s9 + $0xe88] sm:$0xff] }
 0xd26   :  { %3054 = vmatmul.f32.vlgmr.msrb.gmra.mxu3 %v2524_v60  ;;  %3088 = vmatpush.msra.mxu1 %v3691_v41  ;;  %v2462_v33 = vpop.f32.mrf.mxu2  ;;  %v3729_v60 = vld [vmem:[%s6630_s9 + $0xf88] sm:$0xff]  ;;  %v2121_v41 = vperm.slane %v6288_v61, 5  ;;  %v3714_v61 = vld [vmem:[%s6630_s9 + $0xf10] sm:$0xff] }
 0xd27   :  { %3108 = vmatpush.msrb.mxu2 %v3710_v1  ;;  %3131 = vmatpush.msra.mxu3 %v3726_v3  ;;  %v3699_v1 = vld [vmem:[%s6630_s9 + $0xe98] sm:$0xff] }
 0xd28   :  { %3157 = vmatpush.msra.mxu0 %v3739_v6  ;;  %3011 = vmatmul.f32.gmra.mxu1 %v2538_v0  ;;  %v2485_v0 = vpop.f32.mrf.mxu3  ;;  %v3715_v3 = vld [vmem:[%s6630_s9 + $0xf18] sm:$0xff]  ;;  %v2526_v6 = vmax.f32 %v2440_v20, 0.0  ;;  %v2442_v8 = vpop.f32.mrf.mxu1 }
 0xd29   :  { %3080 = vmatmul.f32.gmra.mxu0 %v2541_v5  ;;  %3089 = vmatpush.msra.mxu1 %v3690_v7  ;;  %v3728_v5 = vld [vmem:[%s6630_s9 + $0xf80] sm:$0xff]  ;;  %v2529_v7 = vmax.f32 %v2509_v46, 0.0 }
 0xd2a   :  { %3109 = vmatpush.msrb.mxu2 %v3709_v9  ;;  %3132 = vmatpush.msra.mxu3 %v3725_v11  ;;  %v2463_v9 = vadd.f32 %v2462_v33, %v2121_v41  ;;  %v2511_v11 = vpop.f32.mrf.mxu0 }
 0xd2b   :  { %3158 = vmatpush.msra.mxu0 %v3738_v13  ;;  %3090 = vmatpush.msra.mxu1 %v3689_v16  ;;  %v2486_v13 = vadd.f32 %v2485_v0, %v2122_v4  ;;  %v3713_v16 = vld [vmem:[%s6630_s9 + $0xf08] sm:$0xff] }
 0xd2c   :  { %3110 = vmatpush.msrb.mxu2 %v3708_v19  ;;  %3133 = vmatpush.msra.mxu3 %v3724_v47  ;;  %v2443_v19 = vadd.f32 %v2442_v8, %v2120_v40  ;;  %v3696_v47 = vld [vmem:[%s6630_s9 + $0xe80] sm:$0xff] }
 0xd2d   :  { %3159 = vmatpush.msra.mxu0 %v3737_v23  ;;  %3091 = vmatpush.msra.mxu1 %v3688_v24  ;;  %v2512_v23 = vadd.f32 %v2511_v11, %v2123_v49  ;;  %v3712_v24 = vld [vmem:[%s6630_s9 + $0xf00] sm:$0xff] }
 0xd2e   :  { %3111 = vmatpush.msrb.mxu2 %v3707_v27  ;;  %3134 = vmatpush.msra.mxu3 %v3723_v17  ;;  %v2528_v27 = vmax.f32 %v2486_v13, 0.0  ;;  %v2465_v17 = vpop.f32.mrf.mxu2 }
 0xd2f   :  { %3160 = vmatpush.msra.mxu0 %v3736_v18  ;;  %3034 = vmatmul.f32.gmra.mxu2 %v2539_v14  ;;  %v2527_v14 = vmax.f32 %v2463_v9, 0.0 }
 0xd30   :  { %3057 = vmatmul.f32.gmra.mxu3 %v2540_v15  ;;  %3092 = vmatpush.msra.mxu1 %v3687_v45  ;;  %v2542_v15 = vmax.f32 %v2443_v19, 0.0  ;;  %v2488_v18 = vpop.f32.mrf.mxu3  ;;  %v2545_v45 = vmax.f32 %v2512_v23, 0.0 }
 0xd31   :  { %3112 = vmatpush.msrb.mxu2 %v3706_v37  ;;  %3135 = vmatpush.msra.mxu3 %v3722_v38  ;;  %v2466_v37 = vadd.f32 %v2465_v17, %v2121_v41  ;;  %v2489_v38 = vadd.f32 %v2488_v18, %v2122_v4 }
 0xd32   :  { %3161 = vmatpush.msra.mxu0 %v3735_v39  ;;  %3093 = vmatpush.msra.mxu1 %v3686_v43 }
 0xd33   :  { %3113 = vmatpush.msrb.mxu2 %v3705_v44  ;;  %3136 = vmatpush.msra.mxu3 %v3721_v48  ;;  %v2543_v39 = vmax.f32 %v2466_v37, 0.0  ;;  %v2544_v43 = vmax.f32 %v2489_v38, 0.0 }
 0xd34   :  { %3162 = vmatpush.msra.mxu0 %v3734_v50  ;;  %3094 = vmatpush.msra.mxu1 %v3685_v51 }
 0xd35   :  { %3114 = vmatpush.msrb.mxu2 %v3704_v26  ;;  %3137 = vmatpush.msra.mxu3 %v3720_v25 }
 0xd36   :  { %3163 = vmatpush.msra.mxu0 %v3733_v53  ;;  %3095 = vmatpush.msra.mxu1 %v3684_v21 }
 0xd37   :  { %3115 = vmatpush.msrb.mxu2 %v3703_v22  ;;  %3138 = vmatpush.msra.mxu3 %v3719_v28  ;;  %v3806_v22 = vld [vmem:[%s6631_s10 + $0x1] ss:$0 sm:$0xff] }
 0xd38   :  { %3164 = vmatpush.msra.mxu0 %v3732_v29  ;;  %3096 = vmatpush.msra.mxu1 %v3683_v36 }
 0xd39   :  { %3116 = vmatpush.msrb.mxu2 %v3702_v35  ;;  %3139 = vmatpush.msra.mxu3 %v3718_v55 }
 0xd3a   :  { %3165 = vmatpush.msra.mxu0 %v3731_v52  ;;  %3097 = vmatpush.msra.mxu1 %v3682_v58 }
 0xd3b   :  { %3117 = vmatpush.msrb.mxu2 %v3701_v30  ;;  %3140 = vmatpush.msra.mxu3 %v3717_v10 }
 0xd3c   :  { %3166 = vmatpush.msra.mxu0 %v3730_v57  ;;  %3098 = vmatpush.msra.mxu1 %v3681_v62 }
 0xd3d   :  { %3118 = vmatpush.msrb.mxu2 %v3700_v31  ;;  %3141 = vmatpush.msra.mxu3 %v3716_v63 }
 0xd3e   :  { %3167 = vmatpush.msra.mxu0 %v3729_v60  ;;  %3099 = vmatpush.msra.mxu1 %v3680_v59 }
 0xd3f   :  { %3119 = vmatpush.msrb.mxu2 %v3699_v1  ;;  %3142 = vmatpush.msra.mxu3 %v3715_v3 }
 0xd40   :  { %3168 = vmatpush.msra.mxu0 %v3728_v5  ;;  %3100 = vmatmul.f32.vlgmr.msra.gmra.mxu1 %v2526_v6 }
 0xd41   :  { %3169 = vmatmul.f32.vlgmr.msra.gmra.mxu0 %v2529_v7  ;;  %3120 = vmatpush.msrb.mxu2 %v3698_v42 }
 0xd42   :  { %3143 = vmatpush.msra.mxu3 %v3714_v61 }
 0xd43   :  { %3121 = vmatpush.msrb.mxu2 %v3697_v12 }
 0xd44   :  { %3144 = vmatpush.msra.mxu3 %v3713_v16 }
 0xd45   :  { %3122 = vmatpush.msrb.mxu2 %v3696_v47 }
 0xd46   :  { %3145 = vmatpush.msra.mxu3 %v3712_v24  ;;  %3123 = vmatmul.f32.vlgmr.msrb.gmra.mxu2 %v2527_v14 }
 0xd47   :  { %3146 = vmatmul.f32.vlgmr.msra.gmra.mxu3 %v2528_v27 }
 0xd48   :  { %3103 = vmatmul.f32.gmra.mxu1 %v2542_v15 }
 0xd49   :  { %3172 = vmatmul.f32.gmra.mxu0 %v2545_v45 }
 0xd4e   :  { %3126 = vmatmul.f32.gmra.mxu2 %v2543_v39 }
 0xd4f   :  { %3149 = vmatmul.f32.gmra.mxu3 %v2544_v43 }
 0xd72   :  { %v2825_v44 = vpop.f32.mrf.mxu1 }
 0xd73   :  { %v2894_v51 = vpop.f32.mrf.mxu0  ;;  %v2826_v54 = vadd.f32 %v3806_v22, %v2825_v44 }
 0xd7b   :  { %v2828_v26 = vpop.f32.mrf.mxu1 }
 0xd7c   :  { %v2897_v21 = vpop.f32.mrf.mxu0  ;;  %v2829_v49 = vadd.f32 %v3806_v22, %v2828_v26 }
 0xd7e   :  { %v2848_v48 = vpop.f32.mrf.mxu2 }
 0xd7f   :  { %v2871_v50 = vpop.f32.mrf.mxu3  ;;  %v2849_v29 = vadd.f32 %v2848_v48, %v2826_v54 }
 0xd81   :  { %v2872_v35 = vadd.f32 %v2871_v50, %v2849_v29 }
 0xd83   :  { %v2895_v52 = vadd.f32 %v2894_v51, %v2872_v35 }
 0xd85   :  { %v2917_v28 = vpop.f32.mrf.mxu1 }
 0xd86   :  { %v2986_v56 = vpop.f32.mrf.mxu0  ;;  %v2918_v10 = vadd.f32 %v2917_v28, %v2895_v52 }
 0xd88   :  { %v2851_v25 = vpop.f32.mrf.mxu2 }
 0xd89   :  { %v2874_v53 = vpop.f32.mrf.mxu3  ;;  %v2852_v58 = vadd.f32 %v2851_v25, %v2829_v49 }
 0xd8b   :  { %v2875_v57 = vadd.f32 %v2874_v53, %v2852_v58 }
 0xd8d   :  { %v2898_v46 = vadd.f32 %v2897_v21, %v2875_v57 }
 0xd8f   :  { %v2920_v55 = vpop.f32.mrf.mxu1 }
 0xd90   :  { %v2989_v20 = vpop.f32.mrf.mxu0  ;;  %v2921_v60 = vadd.f32 %v2920_v55, %v2898_v46 }
 0xd92   :  { %v2940_v36 = vpop.f32.mrf.mxu2 }
 0xd93   :  { %v2963_v40 = vpop.f32.mrf.mxu3  ;;  %v2941_v31 = vadd.f32 %v2940_v36, %v2918_v10 }
 0xd95   :  { %v2964_v33 = vadd.f32 %v2963_v40, %v2941_v31 }
 0xd97   :  { %v2987_v41 = vadd.f32 %v2986_v56, %v2964_v33 }
 0xd9a   :  { %v3009_v63 = vpop.f32.mrf.mxu1 }
 0xd9b   :  { %v3010_v5 = vadd.f32 %v3009_v63, %v2987_v41 }
 0xd9c   :  { %v2943_v30 = vpop.f32.mrf.mxu2  ;;  %v3078_v3 = vpop.f32.mrf.mxu0 }
 0xd9d   :  { %v2966_v62 = vpop.f32.mrf.mxu3  ;;  %v2944_v0 = vadd.f32 %v2943_v30, %v2921_v60 }
 0xd9f   :  { %v2967_v6 = vadd.f32 %v2966_v62, %v2944_v0 }
 0xda1   :  { %v2990_v7 = vadd.f32 %v2989_v20, %v2967_v6 }
 0xda5   :  { %v3012_v4 = vpop.f32.mrf.mxu1 }
 0xda6   :  { %v3081_v11 = vpop.f32.mrf.mxu0  ;;  %v3013_v13 = vadd.f32 %v3012_v4, %v2990_v7  ;;  %v3808_v7 = vld [vmem:[%s6635_s14 + $0x1] ss:$0 sm:$0xff] }
 0xda8   :  { %v3032_v59 = vpop.f32.mrf.mxu2 }
 0xda9   :  { %v3055_v1 = vpop.f32.mrf.mxu3  ;;  %v3033_v42 = vadd.f32 %v3032_v59, %v3010_v5 }
 0xdab   :  { %v3056_v61 = vadd.f32 %v3055_v1, %v3033_v42 }
 0xdad   :  { %v3079_v19 = vadd.f32 %v3078_v3, %v3056_v61 }
 0xdb2   :  { %v3035_v8 = vpop.f32.mrf.mxu2 }
 0xdb3   :  { %v3058_v9 = vpop.f32.mrf.mxu3  ;;  %v3036_v16 = vadd.f32 %v3035_v8, %v3013_v13  ;;  %v3262_v13 = vld [vmem:[%s6640_s19 + $0x10] sm:$0xff] }
 0xdb5   :  { %v3059_v24 = vadd.f32 %v3058_v9, %v3036_v16  ;;  %v3261_v16 = vld [vmem:[%s6640_s19 + $0x8] sm:$0xff] }
 0xdb7   :  { %v3082_v45 = vadd.f32 %v3081_v11, %v3059_v24  ;;  %v3236_v11 = vld [vmem:[%s6639_s18] sm:$0x3] }
 0xdbd   :  { %v3101_v12 = vpop.f32.mrf.mxu1 }
 0xdbe   :  { %v3102_v47 = vadd.f32 %v3101_v12, %v3079_v19  ;;  %v3170_v17 = vpop.f32.mrf.mxu0  ;;  %v3263_v12 = vld [vmem:[%s6640_s19 + $0x18] sm:$0xff]  ;;  %v3260_v19 = vld [vmem:[%s6640_s19] sm:$0xff] }
 0xdc5   :  { %v3104_v18 = vpop.f32.mrf.mxu1 }
 0xdc6   :  { %v3105_v38 = vadd.f32 %v3104_v18, %v3082_v45  ;;  %v3173_v26 = vpop.f32.mrf.mxu0 }
 0xdc9   :  { %v3124_v23 = vpop.f32.mrf.mxu2 }
 0xdca   :  { %v3125_v14 = vadd.f32 %v3124_v23, %v3102_v47  ;;  %v3147_v27 = vpop.f32.mrf.mxu3  ;;  %v3809_v23 = vld [vmem:[%s6641_s20] ss:$0 sm:$0xff] }
 0xdcc   :  { %v3148_v15 = vadd.f32 %v3147_v27, %v3125_v14 }
 0xdce   :  { %v3171_v37 = vadd.f32 %v3170_v17, %v3148_v15 }
 0xdd0   :  { %v3176_v39 = vadd.f32 %v3171_v37, %v5588_v34 }
 0xdd1   :  { %v3127_v43 = vpop.f32.mrf.mxu2 }
 0xdd2   :  { %v3128_v44 = vadd.f32 %v3127_v43, %v3105_v38  ;;  %v3182_v48 = vsel %vm133_vm1, %v3176_v39, 0.0  ;;  %v3150_v50 = vpop.f32.mrf.mxu3 }
 0xdd3   :  { %3183 = vadd.xlane.f32.xlu2 %v3182_v48 }
 0xdd4   :  { %v3151_v51 = vadd.f32 %v3150_v50, %v3128_v44 }
 0xdd6   :  { %v3174_v25 = vadd.f32 %v3173_v26, %v3151_v51 }
 0xdd8   :  { %v3177_v53 = vadd.f32 %v3174_v25, %v5635_v2 }
 0xdda   :  { %v3185_v21 = vsel %vm133_vm1, %v3177_v53, 0.0 }
 0xddb   :  { %3186 = vadd.xlane.f32.xlu0 %v3185_v21 }
 0xe46   :  { %v3184_v22 = vpop.xlane.xlu2 %3183 }
 0xe47   :  { %v3188_v28 = vmul.f32 %v3184_v22, %v4224_v32 }
 0xe49   :  { %v3190_v54 = vsub.f32 %v3176_v39, %v3188_v28 }
 0xe4b   :  { %v3192_v29 = vmul.f32 %v3190_v54, %v3190_v54 }
 0xe4d   :  { %v3194_v34 = vsel %vm133_vm1, %v3192_v29, 0.0 }
 0xe4e   :  { %v3187_v36 = vpop.xlane.xlu0 %3186  ;;  %3195 = vadd.xlane.f32.xlu2 %v3194_v34 }
 0xe4f   :  { %v3189_v40 = vmul.f32 %v3187_v36, %v4224_v32 }
 0xe51   :  { %v3191_v56 = vsub.f32 %v3177_v53, %v3189_v40 }
 0xe53   :  { %v3193_v35 = vmul.f32 %v3191_v56, %v3191_v56 }
 0xe55   :  { %v3197_v55 = vsel %vm133_vm1, %v3193_v35, 0.0 }
 0xe56   :  { %3198 = vadd.xlane.f32.xlu0 %v3197_v55 }
 0xec1   :  { %v3196_v2 = vpop.xlane.xlu2 %3195 }
 0xec2   :  { %v3200_v49 = vmul.f32 %v3196_v2, %v4224_v32 }
 0xec4   :  { %v3202_v52 = vadd.f32 1e-05, %v3200_v49 }
 0xec6   :  { %3840 = vrsqrt.f32 %v3202_v52  ;;  %vm3210_vm9 = vweird.f32 %v3202_v52 }
 0xec9   :  { %v3199_v58 = vpop.xlane.xlu0 %3198 }
 0xeca   :  { %v3201_v30 = vmul.f32 %v3199_v58, %v4224_v32  ;;  %v3807_v32 = vld [vmem:[%s6634_s13 + $0x1] ss:$0 sm:$0xff] }
 0xecc   :  { %v3841_v10 = vpop.eup %3840  ;;  %v3203_v57 = vadd.f32 1e-05, %v3201_v30 }
 0xecd   :  { %v3205_v62 = vmul.f32 %v3841_v10, %v3202_v52  ;;  %vm3211_vm8 = vweird.f32 %v3841_v10 }
 0xece   :  { %3842 = vrsqrt.f32 %v3203_v57  ;;  %vm3212_vm10 = vmor %vm3210_vm9, %vm3211_vm8  ;;  %vm3220_vm12 = vweird.f32 %v3203_v57 }
 0xecf   :  { %v3206_v20 = vmul.f32 %v3841_v10, %v3205_v62 }
 0xed1   :  { %v3207_v31 = vmul.f32 0.5, %v3206_v20 }
 0xed3   :  { %v3208_v63 = vsub.f32 1.5, %v3207_v31 }
 0xed4   :  { %v3843_v46 = vpop.eup %3842 }
 0xed5   :  { %v3215_v33 = vmul.f32 %v3843_v46, %v3203_v57  ;;  %v3209_v60 = vmul.f32 %v3841_v10, %v3208_v63  ;;  %vm3221_vm11 = vweird.f32 %v3843_v46 }
 0xed6   :  { %vm3222_vm13 = vmor %vm3220_vm12, %vm3221_vm11 }
 0xed7   :  { %v3216_v59 = vmul.f32 %v3843_v46, %v3215_v33  ;;  %v3213_v0 = vsel %vm3212_vm10, %v3841_v10, %v3209_v60 }
 0xed8   :  { %v3224_v4 = vmul.f32 %v3213_v0, %v3190_v54 }
 0xed9   :  { %v3217_v41 = vmul.f32 0.5, %v3216_v59 }
 0xeda   :  { %v3229_v8 = vmul.f32 %v3807_v32, %v3224_v4 }
 0xedb   :  { %v3218_v1 = vsub.f32 1.5, %v3217_v41 }
 0xedc   :  { %v3234_v9 = vadd.f32 %v3808_v7, %v3229_v8 }
 0xedd   :  { %v3219_v3 = vmul.f32 %v3843_v46, %v3218_v1 }
 0xedf   :  { %v3223_v5 = vsel %vm3222_vm13, %v3843_v46, %v3219_v3 }
 0xee0   :  { %v3225_v6 = vmul.f32 %v3223_v5, %v3191_v56 }
 0xee2   :  { %v3230_v42 = vmul.f32 %v3807_v32, %v3225_v6 }
 0xee4   :  { %v3235_v61 = vadd.f32 %v3808_v7, %v3230_v42 }
 0xee6   :  { %3254 = vmatpush.msrb.mxu1 %v3235_v61 }
 0xee8   :  { %3255 = vmatpush.msrb.mxu1 %v3234_v9 }
 0xee9   :  { %3747 = vmatmul.msk.f32.vlgmr.msrb.gmra.mxu1 %vm95_vm0, %v3236_v11 }
 0xeea   :  { %3283 = vmatpush.msra.mxu1 %v3263_v12 }
 0xeec   :  { %3284 = vmatpush.msra.mxu1 %v3262_v13 }
 0xeee   :  { %3285 = vmatpush.msra.mxu1 %v3261_v16 }
 0xef0   :  { %3286 = vmatpush.msra.mxu1 %v3260_v19 }
 0xf66   :  { %v3257_v47 = vpop.f32.mrf.mxu1 }
 0xf67   :  { %3748 = vmatmul.msk.f32.vlgmr.msra.gmra.mxu1 %vm133_vm1, %v3257_v47 }
 0xfe4   :  { %v3288_v24 = vpop.f32.mrf.mxu1 }
 0xfe5   :  { %v3289_v14 = vadd.f32 %v3809_v23, %v3288_v24 }
 0xfe7   :  { %3291 = vst [vmem:[#allocation2] sm:$0x3] %v3289_v14 }
 0xfe8   :  { %3302 = dma.vmem_to_hbm [thread:$0]  %s3298_s1, 32, %s3300_s26, [#allocation3]  }
 0xfe9   :  { %3878 = dma.done.wait [#allocation3], 32  }
 0xfea   :  { %3879 = vsyncadd [#allocation3], 4294967264 }
 0xfeb   :  { %3307 = vsyncpa [#allocation3], 1 }

</bundles_post_ra>
